<compile_context>
chip_gen: v7x
topology: tpu7x:2x2x1
jax: 0.10.0
libtpu: 0.0.40
codegen_flags: <defaults>
</compile_context>

<pallas_src>
import jax
import jax.numpy as jnp
from jax.experimental import pallas as pl
from jax.experimental.pallas import tpu as pltpu

NEG_SLOPE = 0.01  # PyTorch F.leaky_relu default


def _round_up(x, m):
    return (x + m - 1) // m * m


def _leaky_relu(h):
    return jnp.where(h > 0, h, NEG_SLOPE * h)


def mlp_kernel(x_ref, w1_ref, b1_ref, w2_ref, b2_ref, w3_ref, b3_ref,
               w4_ref, b4_ref, o_ref):
    xr = x_ref[...]                                                  # (1, TN) lane-dense
    # fc1: contraction depth K == 1 -> VPU broadcast outer product.
    h = _leaky_relu(w1_ref[...] * xr + b1_ref[...])                  # (H1P, TN)
    # fc2 / fc3: real matmuls on the MXU, f32 accumulation.
    h = _leaky_relu(
        jnp.dot(w2_ref[...], h, preferred_element_type=jnp.float32) + b2_ref[...])  # (H2P, TN)
    h = _leaky_relu(
        jnp.dot(w3_ref[...], h, preferred_element_type=jnp.float32) + b3_ref[...])  # (H3P, TN)
    # fc4: output width 1 -> VPU multiply + sublane reduce + SMEM scalar bias.
    y = jnp.sum(h * w4_ref[...], axis=0, keepdims=True) + b4_ref[0, 0]               # (1, TN)
    o_ref[...] = y.astype(o_ref.dtype)


def prepare_params(params):
    """One-time pad + transpose of weights into the lane-major (batch-on-lanes)
    layout.  Zero padding keeps results identical: leaky_relu(0) == 0 and zero
    rows/columns contribute nothing downstream."""
    (w1, b1), (w2, b2), (w3, b3), (w4, b4) = params
    h1p = _round_up(w1.shape[1], 128)   # 200 -> 256
    h2p = _round_up(w2.shape[1], 128)   # 100 -> 128
    h3p = _round_up(w3.shape[1], 128)   #  50 -> 128

    def pad(a, r, c):
        a = a.astype(jnp.float32)
        return jnp.zeros((r, c), jnp.float32).at[:a.shape[0], :a.shape[1]].set(a)

    w1c = pad(w1.T, h1p, 1)                      # (H1P, 1) column
    b1c = pad(b1.reshape(-1, 1), h1p, 1)
    w2t = pad(w2.T, h2p, h1p)                    # (H2P, H1P)
    b2c = pad(b2.reshape(-1, 1), h2p, 1)
    w3t = pad(w3.T, h3p, h2p)                    # (H3P, H2P)
    b3c = pad(b3.reshape(-1, 1), h3p, 1)
    w4c = pad(w4, h3p, 1)                        # (H3P, 1) column
    b4s = b4.reshape(1, 1).astype(jnp.float32)   # SMEM scalar
    return (w1c, b1c, w2t, b2c, w3t, b3c, w4c, b4s)


def regression_forward(x, prepared, *, max_tn=2048):
    """x: (N, 1) f32 -> (N, 1) f32.  Batch lives on the lane axis inside the kernel."""
    w1c, b1c, w2t, b2c, w3t, b3c, w4c, b4s = prepared
    h1p, h2p, h3p = w1c.shape[0], w2t.shape[0], w3t.shape[0]

    n = x.shape[0]
    # Lane-axis tiling: keep everything a multiple of 128 so stores stay unmasked.
    n_pad = _round_up(n, 128)
    tn = min(n_pad, _round_up(max_tn, 128))
    n_pad = _round_up(n_pad, tn)
    steps = n_pad // tn

    xr = jnp.zeros((1, n_pad), jnp.float32).at[0, :n].set(
        x.reshape(-1).astype(jnp.float32))

    # Constant-index weight blocks don't need double-buffering when the grid
    # has more than one step; for the single-step case use the plain spec.
    def wspec(shape):
        if steps == 1:
            return pl.BlockSpec(shape, lambda i: (0, 0))
        return pl.BlockSpec(shape, lambda i: (0, 0), pipeline_mode=pl.Buffered(1))

    out = pl.pallas_call(
        mlp_kernel,
        out_shape=jax.ShapeDtypeStruct((1, n_pad), jnp.float32),
        grid=(steps,),
        in_specs=[
            pl.BlockSpec((1, tn), lambda i: (0, i)),             # x row tile (lane-dense)
            wspec((h1p, 1)), wspec((h1p, 1)),                    # w1, b1
            wspec((h2p, h1p)), wspec((h2p, 1)),                  # w2^T, b2
            wspec((h3p, h2p)), wspec((h3p, 1)),                  # w3^T, b3
            wspec((h3p, 1)),                                     # w4 column
            pl.BlockSpec(memory_space=pltpu.MemorySpace.SMEM),   # b4 scalar
        ],
        out_specs=pl.BlockSpec((1, tn), lambda i: (0, i)),       # lane-dense output row
        compiler_params=pltpu.CompilerParams(
            dimension_semantics=("parallel",),
            vmem_limit_bytes=32 * 1024 * 1024,
        ),
    )(xr, w1c, b1c, w2t, b2c, w3t, b3c, w4c, b4s)
    return out[0, :n].reshape(n, 1)


def init_params(key, hidden1=200, hidden2=100, hidden3=50):
    """Deterministic init mimicking nn.Linear (uniform +/- 1/sqrt(fan_in))."""
    dims = [(1, hidden1), (hidden1, hidden2), (hidden2, hidden3), (hidden3, 1)]
    params = []
    for (fan_in, fan_out) in dims:
        key, kw, kb = jax.random.split(key, 3)
        bound = 1.0 / jnp.sqrt(jnp.float32(fan_in))
        w = jax.random.uniform(kw, (fan_in, fan_out), jnp.float32, -bound, bound)
        b = jax.random.uniform(kb, (1, fan_out), jnp.float32, -bound, bound)
        params.append((w, b))
    return params


def reference_forward(x, params):
    h = x
    for i, (w, b) in enumerate(params):
        h = h @ w + b.reshape(1, -1)
        if i < len(params) - 1:
            h = jnp.where(h > 0, h, NEG_SLOPE * h)
    return h


if __name__ == "__main__":
    key = jax.random.PRNGKey(0)
    params = init_params(key)
    prepared = prepare_params(params)          # pad/transpose once, reuse per call

    # Matches the spec's input: torch.linspace(-3, 3, 500).unsqueeze(1).
    n = 500
    x = jnp.linspace(-3.0, 3.0, n, dtype=jnp.float32).reshape(n, 1)

    fwd = jax.jit(regression_forward)
    out = jax.block_until_ready(fwd(x, prepared))
    ref = reference_forward(x, params)

    assert out.shape == (n, 1), out.shape
    max_err = float(jnp.max(jnp.abs(out - ref)))
    assert jnp.allclose(out, ref, atol=1e-4, rtol=1e-4), max_err

    print("KERNEL_OK")
</pallas_src>

<mosaic_0001>
module attributes {stable_mosaic.version = 11 : i64} {
  func.func @mlp_kernel(%arg0: i32, %arg1: memref<1x512xf32, #tpu.memory_space<vmem>>, %arg2: memref<256x1xf32, #tpu.memory_space<vmem>>, %arg3: memref<256x1xf32, #tpu.memory_space<vmem>>, %arg4: memref<128x256xf32, #tpu.memory_space<vmem>>, %arg5: memref<128x1xf32, #tpu.memory_space<vmem>>, %arg6: memref<128x128xf32, #tpu.memory_space<vmem>>, %arg7: memref<128x1xf32, #tpu.memory_space<vmem>>, %arg8: memref<128x1xf32, #tpu.memory_space<vmem>>, %arg9: memref<1x1xf32, #tpu.memory_space<smem>>, %arg10: memref<1x512xf32, #tpu.memory_space<vmem>>) attributes {dimension_semantics = [#tpu.dimension_semantics<parallel>], iteration_bounds = array<i64: 1>, scalar_prefetch = 0 : i64, scratch_operands = 0 : i64, tpu.core_type = #tpu.core_type<tc>, window_params = [{transform_indices = @transform_0, window_bounds = array<i64: 1, 512>}, {pipeline_mode = #tpu.pipeline_mode<synchronous>, transform_indices = @transform_1, window_bounds = array<i64: 256, 1>}, {pipeline_mode = #tpu.pipeline_mode<synchronous>, transform_indices = @transform_2, window_bounds = array<i64: 256, 1>}, {pipeline_mode = #tpu.pipeline_mode<synchronous>, transform_indices = @transform_3, window_bounds = array<i64: 128, 256>}, {pipeline_mode = #tpu.pipeline_mode<synchronous>, transform_indices = @transform_4, window_bounds = array<i64: 128, 1>}, {pipeline_mode = #tpu.pipeline_mode<synchronous>, transform_indices = @transform_5, window_bounds = array<i64: 128, 128>}, {pipeline_mode = #tpu.pipeline_mode<synchronous>, transform_indices = @transform_6, window_bounds = array<i64: 128, 1>}, {pipeline_mode = #tpu.pipeline_mode<synchronous>, transform_indices = @transform_7, window_bounds = array<i64: 128, 1>}, {transform_indices = @transform_8, window_bounds = array<i64: 1, 1>}, {transform_indices = @transform_9, window_bounds = array<i64: 1, 512>}]} {
    %c0 = arith.constant 0 : index
    %c0_0 = arith.constant 0 : index
    %0 = vector.load %arg1[%c0, %c0_0] : memref<1x512xf32, #tpu.memory_space<vmem>>, vector<1x512xf32>
    %c0_1 = arith.constant 0 : index
    %c0_2 = arith.constant 0 : index
    %1 = vector.load %arg2[%c0_1, %c0_2] : memref<256x1xf32, #tpu.memory_space<vmem>>, vector<256x1xf32>
    %2 = vector.broadcast %1 : vector<256x1xf32> to vector<256x512xf32>
    %3 = vector.broadcast %0 : vector<1x512xf32> to vector<256x512xf32>
    %4 = arith.mulf %2, %3 : vector<256x512xf32>
    %c0_3 = arith.constant 0 : index
    %c0_4 = arith.constant 0 : index
    %5 = vector.load %arg3[%c0_3, %c0_4] : memref<256x1xf32, #tpu.memory_space<vmem>>, vector<256x1xf32>
    %6 = vector.broadcast %5 : vector<256x1xf32> to vector<256x512xf32>
    %7 = arith.addf %4, %6 : vector<256x512xf32>
    %cst = arith.constant 0.000000e+00 : f32
    %8 = vector.broadcast %cst : f32 to vector<256x512xf32>
    %9 = arith.cmpf ogt, %7, %8 : vector<256x512xf32>
    %cst_5 = arith.constant 0.00999999977 : f32
    %10 = vector.broadcast %cst_5 : f32 to vector<256x512xf32>
    %11 = arith.mulf %10, %7 : vector<256x512xf32>
    %12 = arith.select %9, %7, %11 : vector<256x512xi1>, vector<256x512xf32>
    %c0_6 = arith.constant 0 : index
    %c0_7 = arith.constant 0 : index
    %13 = vector.load %arg4[%c0_6, %c0_7] : memref<128x256xf32, #tpu.memory_space<vmem>>, vector<128x256xf32>
    %cst_8 = arith.constant dense<0.000000e+00> : vector<128x512xf32>
    %14 = tpu.matmul %13, %12, %cst_8 {dimension_numbers = #tpu.dot_dimension_numbers<[1], [0], [0], [1], [0, 0, 1, 1], [], []>} : vector<128x256xf32>, vector<256x512xf32>, vector<128x512xf32> -> vector<128x512xf32>
    %c0_9 = arith.constant 0 : index
    %c0_10 = arith.constant 0 : index
    %15 = vector.load %arg5[%c0_9, %c0_10] : memref<128x1xf32, #tpu.memory_space<vmem>>, vector<128x1xf32>
    %16 = vector.broadcast %15 : vector<128x1xf32> to vector<128x512xf32>
    %17 = arith.addf %14, %16 : vector<128x512xf32>
    %cst_11 = arith.constant 0.000000e+00 : f32
    %18 = vector.broadcast %cst_11 : f32 to vector<128x512xf32>
    %19 = arith.cmpf ogt, %17, %18 : vector<128x512xf32>
    %cst_12 = arith.constant 0.00999999977 : f32
    %20 = vector.broadcast %cst_12 : f32 to vector<128x512xf32>
    %21 = arith.mulf %20, %17 : vector<128x512xf32>
    %22 = arith.select %19, %17, %21 : vector<128x512xi1>, vector<128x512xf32>
    %c0_13 = arith.constant 0 : index
    %c0_14 = arith.constant 0 : index
    %23 = vector.load %arg6[%c0_13, %c0_14] : memref<128x128xf32, #tpu.memory_space<vmem>>, vector<128x128xf32>
    %cst_15 = arith.constant dense<0.000000e+00> : vector<128x512xf32>
    %24 = tpu.matmul %23, %22, %cst_15 {dimension_numbers = #tpu.dot_dimension_numbers<[1], [0], [0], [1], [0, 0, 1, 1], [], []>} : vector<128x128xf32>, vector<128x512xf32>, vector<128x512xf32> -> vector<128x512xf32>
    %c0_16 = arith.constant 0 : index
    %c0_17 = arith.constant 0 : index
    %25 = vector.load %arg7[%c0_16, %c0_17] : memref<128x1xf32, #tpu.memory_space<vmem>>, vector<128x1xf32>
    %26 = vector.broadcast %25 : vector<128x1xf32> to vector<128x512xf32>
    %27 = arith.addf %24, %26 : vector<128x512xf32>
    %cst_18 = arith.constant 0.000000e+00 : f32
    %28 = vector.broadcast %cst_18 : f32 to vector<128x512xf32>
    %29 = arith.cmpf ogt, %27, %28 : vector<128x512xf32>
    %cst_19 = arith.constant 0.00999999977 : f32
    %30 = vector.broadcast %cst_19 : f32 to vector<128x512xf32>
    %31 = arith.mulf %30, %27 : vector<128x512xf32>
    %32 = arith.select %29, %27, %31 : vector<128x512xi1>, vector<128x512xf32>
    %c0_20 = arith.constant 0 : index
    %c0_21 = arith.constant 0 : index
    %33 = vector.load %arg8[%c0_20, %c0_21] : memref<128x1xf32, #tpu.memory_space<vmem>>, vector<128x1xf32>
    %34 = vector.broadcast %33 : vector<128x1xf32> to vector<128x512xf32>
    %35 = arith.mulf %32, %34 : vector<128x512xf32>
    %cst_22 = arith.constant dense<0.000000e+00> : vector<512xf32>
    %36 = vector.multi_reduction <add>, %35, %cst_22 [0] : vector<128x512xf32> to vector<512xf32>
    %37 = vector.shape_cast %36 : vector<512xf32> to vector<1x512xf32>
    %c0_23 = arith.constant 0 : index
    %c0_24 = arith.constant 0 : index
    %38 = memref.load %arg9[%c0_23, %c0_24] : memref<1x1xf32, #tpu.memory_space<smem>>
    %39 = vector.broadcast %38 : f32 to vector<1x512xf32>
    %40 = arith.addf %37, %39 : vector<1x512xf32>
    %c0_25 = arith.constant 0 : index
    %c0_26 = arith.constant 0 : index
    %41 = vector.load %arg10[%c0_25, %c0_26] : memref<1x512xf32, #tpu.memory_space<vmem>>, vector<1x512xf32>
    tpu.vector_store %arg10[%c0_25, %c0_26], %40 {strides = array<i32>} : memref<1x512xf32, #tpu.memory_space<vmem>>, vector<1x512xf32>,
    return
  }
  func.func @transform_0(%arg0: i32) -> (i32, i32) {
    %c0_i32 = arith.constant 0 : i32
    %c0_i32_0 = arith.constant 0 : i32
    return %c0_i32, %arg0 : i32, i32
  }
  func.func @transform_1(%arg0: i32) -> (i32, i32) {
    %c0_i32 = arith.constant 0 : i32
    %c0_i32_0 = arith.constant 0 : i32
    %c0_i32_1 = arith.constant 0 : i32
    return %c0_i32, %c0_i32_0 : i32, i32
  }
  func.func @transform_2(%arg0: i32) -> (i32, i32) {
    %c0_i32 = arith.constant 0 : i32
    %c0_i32_0 = arith.constant 0 : i32
    %c0_i32_1 = arith.constant 0 : i32
    return %c0_i32, %c0_i32_0 : i32, i32
  }
  func.func @transform_3(%arg0: i32) -> (i32, i32) {
    %c0_i32 = arith.constant 0 : i32
    %c0_i32_0 = arith.constant 0 : i32
    %c0_i32_1 = arith.constant 0 : i32
    return %c0_i32, %c0_i32_0 : i32, i32
  }
  func.func @transform_4(%arg0: i32) -> (i32, i32) {
    %c0_i32 = arith.constant 0 : i32
    %c0_i32_0 = arith.constant 0 : i32
    %c0_i32_1 = arith.constant 0 : i32
    return %c0_i32, %c0_i32_0 : i32, i32
  }
  func.func @transform_5(%arg0: i32) -> (i32, i32) {
    %c0_i32 = arith.constant 0 : i32
    %c0_i32_0 = arith.constant 0 : i32
    %c0_i32_1 = arith.constant 0 : i32
    return %c0_i32, %c0_i32_0 : i32, i32
  }
  func.func @transform_6(%arg0: i32) -> (i32, i32) {
    %c0_i32 = arith.constant 0 : i32
    %c0_i32_0 = arith.constant 0 : i32
    %c0_i32_1 = arith.constant 0 : i32
    return %c0_i32, %c0_i32_0 : i32, i32
  }
  func.func @transform_7(%arg0: i32) -> (i32, i32) {
    %c0_i32 = arith.constant 0 : i32
    %c0_i32_0 = arith.constant 0 : i32
    %c0_i32_1 = arith.constant 0 : i32
    return %c0_i32, %c0_i32_0 : i32, i32
  }
  func.func @transform_8(%arg0: i32) -> (i32, i32) {
    %c0_i32 = arith.constant 0 : i32
    %c0_i32_0 = arith.constant 0 : i32
    %c0_i32_1 = arith.constant 0 : i32
    return %c0_i32, %c0_i32_0 : i32, i32
  }
  func.func @transform_9(%arg0: i32) -> (i32, i32) {
    %c0_i32 = arith.constant 0 : i32
    %c0_i32_0 = arith.constant 0 : i32
    return %c0_i32, %arg0 : i32, i32
  }
}

</mosaic_0001>

<bundles_post_ra>
// kernel: regression_forward.1
= control target key start
LH: loop header
LB: loop body
LE: loop exit
PB: predicated region body
PF: predicated region fallthrough
CT: control target
= control target key end

     0   :  { %v2832_v0 = vmov 0   ;;  %v227_v59 = vlaneseq  ;;  %s4630_s2 = inlined_call_operand.vmem [shape: f32[256,1], index: 2, kind: input, shape index: {}]   ;;  %s4631_s1 = inlined_call_operand.vmem [shape: f32[256,1], index: 1, kind: input, shape index: {}]   ;;  %s4632_s0 = inlined_call_operand.vmem [shape: f32[1,512], index: 0, kind: input, shape index: {}]   ;;  %s4633_s4 = inlined_call_operand.vmem [shape: f32[128,1], index: 4, kind: input, shape index: {}]   ;;  %s4634_s6 = inlined_call_operand.vmem [shape: f32[128,1], index: 6, kind: input, shape index: {}]   ;;  %s4635_s7 = inlined_call_operand.vmem [shape: f32[128,1], index: 7, kind: input, shape index: {}]   ;;  %s4636_s3 = inlined_call_operand.vmem [shape: f32[128,256], index: 3, kind: input, shape index: {}]   ;;  %s4637_s5 = inlined_call_operand.vmem [shape: f32[128,128], index: 5, kind: input, shape index: {}]   ;;  %s4638_s8 = inlined_call_operand.<no memory space> [shape: f32[1,1], index: 8, kind: input, shape index: {}]   ;;  %s4639_s9 = inlined_call_operand.vmem [shape: f32[1,512], index: 9, kind: output, shape index: {}]  }
   0x1   :  { %2831 = vset.pattern.permute.xlu1 %v2832_v0  ;;  %2830 = vset.pattern.permute.xlu0 %v2832_v0  ;;  %v375_v1 = vld [vmem:[%s4630_s2] sm:$0xff]  ;;  %v376_v3 = vld [vmem:[%s4630_s2 + $0x8] sm:$0xff]  ;;  %v37_v5 = vld [vmem:[%s4631_s1 + $0x18] sm:$0xff] }
   0x2   :  { %v34_v2 = vld [vmem:[%s4631_s1] sm:$0xff]  ;;  %409 = vperm.xlu1 %2831, %v375_v1   ;;  %v35_v4 = vld [vmem:[%s4631_s1 + $0x8] sm:$0xff]  ;;  %v36_v6 = vld [vmem:[%s4631_s1 + $0x10] sm:$0xff]  ;;  %v3066_v62 = vshrl.u32 %v227_v59, 7 }
   0x3   :  { %68 = vperm.xlu0 %2830, %v34_v2   ;;  %v378_v7 = vld [vmem:[%s4630_s2 + $0x18] sm:$0xff]  ;;  %v377_v8 = vld [vmem:[%s4630_s2 + $0x10] sm:$0xff]  ;;  %v39_v9 = vld [vmem:[%s4631_s1 + $0x28] sm:$0xff] }
   0x4   :  { %v38_v10 = vld [vmem:[%s4631_s1 + $0x20] sm:$0xff]  ;;  %v380_v11 = vld [vmem:[%s4630_s2 + $0x28] sm:$0xff]  ;;  %v41_v13 = vld [vmem:[%s4631_s1 + $0x38] sm:$0xff]  ;;  %v229_v1 = vsub.s32 0, %v3066_v62  ;;  %v237_v2 = vsub.s32 2, %v3066_v62 }
   0x5   :  { %v379_v12 = vld [vmem:[%s4630_s2 + $0x20] sm:$0xff]  ;;  %v40_v14 = vld [vmem:[%s4631_s1 + $0x30] sm:$0xff]  ;;  %v382_v15 = vld [vmem:[%s4630_s2 + $0x38] sm:$0xff] }
   0x6   :  { %414 = vperm.xlu1 %2831, %v376_v3   ;;  %v381_v16 = vld [vmem:[%s4630_s2 + $0x30] sm:$0xff]  ;;  %v43_v17 = vld [vmem:[%s4631_s1 + $0x48] sm:$0xff]  ;;  %v42_v18 = vld [vmem:[%s4631_s1 + $0x40] sm:$0xff]  ;;  %v233_v3 = vsub.s32 1, %v3066_v62 }
   0x7   :  { %73 = vperm.xlu0 %2830, %v35_v4   ;;  %v384_v19 = vld [vmem:[%s4630_s2 + $0x48] sm:$0xff]  ;;  %v383_v20 = vld [vmem:[%s4630_s2 + $0x40] sm:$0xff]  ;;  %v45_v21 = vld [vmem:[%s4631_s1 + $0x58] sm:$0xff] }
   0x8   :  { %v44_v22 = vld [vmem:[%s4631_s1 + $0x50] sm:$0xff]  ;;  %v386_v23 = vld [vmem:[%s4630_s2 + $0x58] sm:$0xff]  ;;  %v47_v25 = vld [vmem:[%s4631_s1 + $0x68] sm:$0xff] }
   0x9   :  { %v385_v24 = vld [vmem:[%s4630_s2 + $0x50] sm:$0xff]  ;;  %v46_v26 = vld [vmem:[%s4631_s1 + $0x60] sm:$0xff]  ;;  %v388_v27 = vld [vmem:[%s4630_s2 + $0x68] sm:$0xff] }
   0xa   :  { %83 = vperm.xlu1 %2831, %v37_v5   ;;  %v387_v28 = vld [vmem:[%s4630_s2 + $0x60] sm:$0xff]  ;;  %v49_v29 = vld [vmem:[%s4631_s1 + $0x78] sm:$0xff]  ;;  %v48_v30 = vld [vmem:[%s4631_s1 + $0x70] sm:$0xff] }
   0xb   :  { %78 = vperm.xlu0 %2830, %v36_v6   ;;  %v390_v31 = vld [vmem:[%s4630_s2 + $0x78] sm:$0xff]  ;;  %v389_v32 = vld [vmem:[%s4630_s2 + $0x70] sm:$0xff]  ;;  %v51_v33 = vld [vmem:[%s4631_s1 + $0x88] sm:$0xff] }
   0xc   :  { %v50_v34 = vld [vmem:[%s4631_s1 + $0x80] sm:$0xff]  ;;  %v392_v35 = vld [vmem:[%s4630_s2 + $0x88] sm:$0xff]  ;;  %v53_v37 = vld [vmem:[%s4631_s1 + $0x98] sm:$0xff] }
   0xd   :  { %v391_v36 = vld [vmem:[%s4630_s2 + $0x80] sm:$0xff]  ;;  %v52_v38 = vld [vmem:[%s4631_s1 + $0x90] sm:$0xff]  ;;  %v394_v39 = vld [vmem:[%s4630_s2 + $0x98] sm:$0xff] }
   0xe   :  { %424 = vperm.xlu1 %2831, %v378_v7   ;;  %v393_v40 = vld [vmem:[%s4630_s2 + $0x90] sm:$0xff]  ;;  %v55_v41 = vld [vmem:[%s4631_s1 + $0xa8] sm:$0xff]  ;;  %v54_v42 = vld [vmem:[%s4631_s1 + $0xa0] sm:$0xff]  ;;  %v241_v7 = vsub.s32 3, %v3066_v62 }
   0xf   :  { %419 = vperm.xlu0 %2830, %v377_v8   ;;  %v396_v43 = vld [vmem:[%s4630_s2 + $0xa8] sm:$0xff]  ;;  %v395_v44 = vld [vmem:[%s4630_s2 + $0xa0] sm:$0xff]  ;;  %v57_v45 = vld [vmem:[%s4631_s1 + $0xb8] sm:$0xff] }
  0x10   :  { %v56_v46 = vld [vmem:[%s4631_s1 + $0xb0] sm:$0xff]  ;;  %v398_v47 = vld [vmem:[%s4630_s2 + $0xb8] sm:$0xff]  ;;  %v59_v49 = vld [vmem:[%s4631_s1 + $0xc8] sm:$0xff] }
  0x11   :  { %v397_v48 = vld [vmem:[%s4630_s2 + $0xb0] sm:$0xff]  ;;  %v58_v50 = vld [vmem:[%s4631_s1 + $0xc0] sm:$0xff]  ;;  %v400_v51 = vld [vmem:[%s4630_s2 + $0xc8] sm:$0xff] }
  0x12   :  { %93 = vperm.xlu1 %2831, %v39_v9   ;;  %v399_v52 = vld [vmem:[%s4630_s2 + $0xc0] sm:$0xff]  ;;  %v61_v53 = vld [vmem:[%s4631_s1 + $0xd8] sm:$0xff]  ;;  %v60_v54 = vld [vmem:[%s4631_s1 + $0xd0] sm:$0xff] }
  0x13   :  { %88 = vperm.xlu0 %2830, %v38_v10   ;;  %v402_v55 = vld [vmem:[%s4630_s2 + $0xd8] sm:$0xff]  ;;  %v401_v56 = vld [vmem:[%s4630_s2 + $0xd0] sm:$0xff]  ;;  %v63_v57 = vld [vmem:[%s4631_s1 + $0xe8] sm:$0xff] }
  0x14   :  { %v62_v58 = vld [vmem:[%s4631_s1 + $0xe0] sm:$0xff]  ;;  %v404_v60 = vld [vmem:[%s4630_s2 + $0xe8] sm:$0xff]  ;;  %v65_v63 = vld [vmem:[%s4631_s1 + $0xf8] sm:$0xff] }
  0x15   :  { %v403_v61 = vld [vmem:[%s4630_s2 + $0xe0] sm:$0xff]  ;;  %v64_v0 = vld [vmem:[%s4631_s1 + $0xf0] sm:$0xff]  ;;  %v406_v4 = vld [vmem:[%s4630_s2 + $0xf8] sm:$0xff] }
  0x16   :  { %434 = vperm.xlu1 %2831, %v380_v11   ;;  %v405_v5 = vld [vmem:[%s4630_s2 + $0xf0] sm:$0xff]  ;;  %v33_v6 = vld [vmem:[%s4632_s0] sm:$0xf]  ;;  %v1112_v11 = vld [vmem:[%s4633_s4 + $0x8] sm:$0xff] }
  0x17   :  { %429 = vperm.xlu0 %2830, %v379_v12   ;;  %v3087_v8 = vrot.slane %v33_v6, %v229_v1  ;;  %v3089_v9 = vrot.slane %v33_v6, %v237_v2  ;;  %v3091_v10 = vrot.slane %v33_v6, %v233_v3  ;;  %v1111_v12 = vld [vmem:[%s4633_s4] sm:$0xff] }
  0x1a   :  { %103 = vperm.xlu1 %2831, %v41_v13   ;;  %v3099_v13 = vrot.slane %v33_v6, %v241_v7  ;;  %v1120_v7 = vld [vmem:[%s4633_s4 + $0x48] sm:$0xff] }
  0x1b   :  { %98 = vperm.xlu0 %2830, %v40_v14  }
  0x1e   :  { %444 = vperm.xlu1 %2831, %v382_v15  }
  0x1f   :  { %439 = vperm.xlu0 %2830, %v381_v16  }
  0x22   :  { %113 = vperm.xlu1 %2831, %v43_v17  }
  0x23   :  { %108 = vperm.xlu0 %2830, %v42_v18  }
  0x26   :  { %454 = vperm.xlu1 %2831, %v384_v19   ;;  %v1114_v19 = vld [vmem:[%s4633_s4 + $0x18] sm:$0xff] }
  0x27   :  { %449 = vperm.xlu0 %2830, %v383_v20   ;;  %v1113_v20 = vld [vmem:[%s4633_s4 + $0x10] sm:$0xff] }
  0x2a   :  { %123 = vperm.xlu1 %2831, %v45_v21  }
  0x2b   :  { %118 = vperm.xlu0 %2830, %v44_v22  }
  0x2e   :  { %464 = vperm.xlu1 %2831, %v386_v23  }
  0x2f   :  { %459 = vperm.xlu0 %2830, %v385_v24  }
  0x32   :  { %133 = vperm.xlu1 %2831, %v47_v25  }
  0x33   :  { %128 = vperm.xlu0 %2830, %v46_v26  }
  0x36   :  { %474 = vperm.xlu1 %2831, %v388_v27  }
  0x37   :  { %469 = vperm.xlu0 %2830, %v387_v28  }
  0x3a   :  { %143 = vperm.xlu1 %2831, %v49_v29  }
  0x3b   :  { %138 = vperm.xlu0 %2830, %v48_v30  }
  0x3e   :  { %484 = vperm.xlu1 %2831, %v390_v31   ;;  %v1116_v31 = vld [vmem:[%s4633_s4 + $0x28] sm:$0xff] }
  0x3f   :  { %479 = vperm.xlu0 %2830, %v389_v32  }
  0x42   :  { %153 = vperm.xlu1 %2831, %v51_v33  }
  0x43   :  { %148 = vperm.xlu0 %2830, %v50_v34  }
  0x46   :  { %494 = vperm.xlu1 %2831, %v392_v35   ;;  %v1115_v35 = vld [vmem:[%s4633_s4 + $0x20] sm:$0xff] }
  0x47   :  { %489 = vperm.xlu0 %2830, %v391_v36  }
  0x4a   :  { %163 = vperm.xlu1 %2831, %v53_v37  }
  0x4b   :  { %158 = vperm.xlu0 %2830, %v52_v38  }
  0x4e   :  { %504 = vperm.xlu1 %2831, %v394_v39  }
  0x4f   :  { %499 = vperm.xlu0 %2830, %v393_v40  }
  0x52   :  { %173 = vperm.xlu1 %2831, %v55_v41  }
  0x53   :  { %168 = vperm.xlu0 %2830, %v54_v42  }
  0x56   :  { %514 = vperm.xlu1 %2831, %v396_v43  }
  0x57   :  { %509 = vperm.xlu0 %2830, %v395_v44  }
  0x5a   :  { %183 = vperm.xlu1 %2831, %v57_v45  }
  0x5b   :  { %178 = vperm.xlu0 %2830, %v56_v46  }
  0x5e   :  { %524 = vperm.xlu1 %2831, %v398_v47  }
  0x5f   :  { %519 = vperm.xlu0 %2830, %v397_v48  }
  0x62   :  { %193 = vperm.xlu1 %2831, %v59_v49  }
  0x63   :  { %188 = vperm.xlu0 %2830, %v58_v50  }
  0x66   :  { %534 = vperm.xlu1 %2831, %v400_v51  }
  0x67   :  { %529 = vperm.xlu0 %2830, %v399_v52  }
  0x6a   :  { %203 = vperm.xlu1 %2831, %v61_v53   ;;  %v1118_v53 = vld [vmem:[%s4633_s4 + $0x38] sm:$0xff] }
  0x6b   :  { %198 = vperm.xlu0 %2830, %v60_v54   ;;  %v1117_v54 = vld [vmem:[%s4633_s4 + $0x30] sm:$0xff] }
  0x6e   :  { %544 = vperm.xlu1 %2831, %v402_v55  }
  0x6f   :  { %539 = vperm.xlu0 %2830, %v401_v56  }
  0x72   :  { %213 = vperm.xlu1 %2831, %v63_v57  }
  0x73   :  { %208 = vperm.xlu0 %2830, %v62_v58  }
  0x76   :  { %554 = vperm.xlu1 %2831, %v404_v60  }
  0x77   :  { %549 = vperm.xlu0 %2830, %v403_v61  }
  0x7a   :  { %223 = vperm.xlu1 %2831, %v65_v63  }
  0x7b   :  { %218 = vperm.xlu0 %2830, %v64_v0  }
  0x7e   :  { %564 = vperm.xlu1 %2831, %v406_v4  }
  0x7f   :  { %559 = vperm.xlu0 %2830, %v405_v5  }
  0x81   :  { %v410_v14 = vpop.permute.xlu1 %409 }
  0x82   :  { %v69_v15 = vpop.permute.xlu0 %68  ;;  %1134 = vperm.xlu1 %2831, %v1112_v11  }
  0x83   :  { %v247_v16 = vmul.f32 %v3087_v8, %v69_v15  ;;  %v249_v17 = vmul.f32 %v3089_v9, %v69_v15  ;;  %1129 = vperm.xlu0 %2830, %v1111_v12   ;;  %v248_v18 = vmul.f32 %v3091_v10, %v69_v15  ;;  %v250_v21 = vmul.f32 %v3099_v13, %v69_v15 }
  0x85   :  { %v568_v22 = vadd.f32 %v410_v14, %v248_v18  ;;  %v567_v23 = vadd.f32 %v410_v14, %v247_v16  ;;  %v415_v24 = vpop.permute.xlu1 %414  ;;  %v570_v26 = vadd.f32 %v410_v14, %v250_v21  ;;  %v3111_v27 = vadd.f32 %v410_v14, %v249_v17 }
  0x86   :  { %v74_v25 = vpop.permute.xlu0 %73  ;;  %1144 = vperm.xlu1 %2831, %v1114_v19  }
  0x87   :  { %v251_v28 = vmul.f32 %v3087_v8, %v74_v25  ;;  %v253_v29 = vmul.f32 %v3089_v9, %v74_v25  ;;  %1139 = vperm.xlu0 %2830, %v1113_v20   ;;  %v252_v30 = vmul.f32 %v3091_v10, %v74_v25  ;;  %vm696_vm0 = vcmp.gt.f32.partialorder %v568_v22, 0.0 }
  0x88   :  { %v824_v32 = vmul.f32 0.01, %v568_v22  ;;  %v254_v33 = vmul.f32 %v3099_v13, %v74_v25  ;;  %vm698_vm1 = vcmp.gt.f32.partialorder %v570_v26, 0.0  ;;  %v826_v34 = vmul.f32 0.01, %v570_v26  ;;  %v1119_v25 = vld [vmem:[%s4633_s4 + $0x40] sm:$0xff] }
  0x89   :  { %v572_v36 = vadd.f32 %v415_v24, %v252_v30  ;;  %v571_v37 = vadd.f32 %v415_v24, %v251_v28  ;;  %vm695_vm2 = vcmp.gt.f32.partialorder %v567_v23, 0.0  ;;  %v823_v38 = vmul.f32 0.01, %v567_v23  ;;  %v84_v39 = vpop.permute.xlu1 %83  ;;  %v1122_v30 = vld [vmem:[%s4633_s4 + $0x58] sm:$0xff] }
  0x8a   :  { %v79_v40 = vpop.permute.xlu0 %78  ;;  %v952_v41 = vsel %vm696_vm0, %v568_v22, %v824_v32  ;;  %v574_v42 = vadd.f32 %v415_v24, %v254_v33  ;;  %v954_v43 = vsel %vm698_vm1, %v570_v26, %v826_v34  ;;  %v573_v44 = vadd.f32 %v415_v24, %v253_v29  ;;  %1154 = vperm.xlu1 %2831, %v1116_v31  }
  0x8b   :  { %v259_v45 = vmul.f32 %v3087_v8, %v84_v39  ;;  %v260_v46 = vmul.f32 %v3091_v10, %v84_v39  ;;  %v261_v47 = vmul.f32 %v3089_v9, %v84_v39  ;;  %v262_v48 = vmul.f32 %v3099_v13, %v84_v39  ;;  %1149 = vperm.xlu0 %2830, %v1115_v35  }
  0x8c   :  { %v255_v49 = vmul.f32 %v3087_v8, %v79_v40  ;;  %v256_v50 = vmul.f32 %v3091_v10, %v79_v40  ;;  %v257_v51 = vmul.f32 %v3089_v9, %v79_v40  ;;  %v258_v52 = vmul.f32 %v3099_v13, %v79_v40 }
  0x8d   :  { %vm700_vm3 = vcmp.gt.f32.partialorder %v572_v36, 0.0  ;;  %v828_v55 = vmul.f32 0.01, %v572_v36  ;;  %vm702_vm4 = vcmp.gt.f32.partialorder %v574_v42, 0.0  ;;  %v830_v56 = vmul.f32 0.01, %v574_v42  ;;  %v425_v57 = vpop.permute.xlu1 %424 }
  0x8e   :  { %v420_v58 = vpop.permute.xlu0 %419  ;;  %vm699_vm5 = vcmp.gt.f32.partialorder %v571_v37, 0.0  ;;  %v827_v60 = vmul.f32 0.01, %v571_v37  ;;  %v951_v61 = vsel %vm695_vm2, %v567_v23, %v823_v38  ;;  %vm697_vm6 = vcmp.gt.f32.partialorder %v3111_v27, 0.0  ;;  %1164 = vperm.xlu1 %2831, %v1118_v53  }
  0x8f   :  { %v3139_v63 = vadd.f32 %v425_v57, %v259_v45  ;;  %v580_v0 = vadd.f32 %v425_v57, %v260_v46  ;;  %v3141_v1 = vadd.f32 %v425_v57, %v261_v47  ;;  %v3143_v2 = vadd.f32 %v425_v57, %v262_v48  ;;  %1159 = vperm.xlu0 %2830, %v1117_v54   ;;  %v1124_v48 = vld [vmem:[%s4633_s4 + $0x68] sm:$0xff] }
  0x90   :  { %v3145_v3 = vadd.f32 %v420_v58, %v255_v49  ;;  %v576_v4 = vadd.f32 %v420_v58, %v256_v50  ;;  %v3147_v5 = vadd.f32 %v420_v58, %v257_v51  ;;  %v3149_v6 = vadd.f32 %v420_v58, %v258_v52 }
  0x91   :  { %v956_v11 = vsel %vm700_vm3, %v572_v36, %v828_v55  ;;  %v958_v12 = vsel %vm702_vm4, %v574_v42, %v830_v56  ;;  %v955_v14 = vsel %vm699_vm5, %v571_v37, %v827_v60  ;;  %vm701_vm7 = vcmp.gt.f32.partialorder %v573_v44, 0.0  ;;  %v94_v19 = vpop.permute.xlu1 %93  ;;  %v1123_v56 = vld [vmem:[%s4633_s4 + $0x60] sm:$0xff] }
  0x92   :  { %v2635_v15 = vpack.c.bf16 %v956_v11, %v952_v41  ;;  %v2699_v16 = vpack.c.bf16 %v958_v12, %v954_v43  ;;  %v2637_v17 = vpack.c.bf16 %v955_v14, %v951_v61  ;;  %v825_v18 = vmul.f32 0.01, %v3111_v27  ;;  %v89_v20 = vpop.permute.xlu0 %88  ;;  %1174 = vperm.xlu1 %2831, %v1120_v7   ;;  %v1121_v43 = vld [vmem:[%s4633_s4 + $0x50] sm:$0xff] }
  0x93   :  { %v829_v21 = vmul.f32 0.01, %v573_v44  ;;  %v267_v22 = vmul.f32 %v3087_v8, %v94_v19  ;;  %v268_v23 = vmul.f32 %v3091_v10, %v94_v19  ;;  %v269_v24 = vmul.f32 %v3089_v9, %v94_v19  ;;  %1169 = vperm.xlu0 %2830, %v1119_v25  }
  0x94   :  { %2636 = vmatprep.subr.bf16.mxu0 %v2635_v15  ;;  %2700 = vmatprep.subr.bf16.mxu1 %v2699_v16  ;;  %v953_v26 = vsel %vm697_vm6, %v3111_v27, %v825_v18  ;;  %v270_v28 = vmul.f32 %v3099_v13, %v94_v19  ;;  %v263_v29 = vmul.f32 %v3087_v8, %v89_v20  ;;  %vm704_vm8 = vcmp.gt.f32.partialorder %v576_v4, 0.0  ;;  %v1126_v18 = vld [vmem:[%s4633_s4 + $0x78] sm:$0xff] }
  0x95   :  { %2638 = vmatpush1.bf16.msra.mxu0 %v2637_v17  ;;  %v957_v31 = vsel %vm701_vm7, %v573_v44, %v829_v21  ;;  %v264_v32 = vmul.f32 %v3091_v10, %v89_v20  ;;  %v265_v33 = vmul.f32 %v3089_v9, %v89_v20  ;;  %v266_v34 = vmul.f32 %v3099_v13, %v89_v20  ;;  %v435_v27 = vpop.permute.xlu1 %434  ;;  %v1125_v20 = vld [vmem:[%s4633_s4 + $0x70] sm:$0xff] }
  0x96   :  { %v2701_v35 = vpack.c.bf16 %v957_v31, %v953_v26  ;;  %v430_v36 = vpop.permute.xlu0 %429  ;;  %vm708_vm9 = vcmp.gt.f32.partialorder %v580_v0, 0.0  ;;  %v832_v37 = vmul.f32 0.01, %v576_v4  ;;  %v836_v38 = vmul.f32 0.01, %v580_v0  ;;  %1184 = vperm.xlu1 %2831, %v1122_v30  }
  0x97   :  { %v3176_v39 = vadd.f32 %v435_v27, %v267_v22  ;;  %v3178_v40 = vadd.f32 %v435_v27, %v268_v23  ;;  %v3180_v41 = vadd.f32 %v435_v27, %v269_v24  ;;  %v3182_v42 = vadd.f32 %v435_v27, %v270_v28  ;;  %1179 = vperm.xlu0 %2830, %v1121_v43  }
  0x98   :  { %2702 = vmatpush1.bf16.msra.mxu1 %v2701_v35  ;;  %v3187_v44 = vadd.f32 %v430_v36, %v263_v29  ;;  %v3189_v45 = vadd.f32 %v430_v36, %v264_v32  ;;  %v3191_v46 = vadd.f32 %v430_v36, %v265_v33  ;;  %v3193_v47 = vadd.f32 %v430_v36, %v266_v34  ;;  %v1738_v33 = vld [vmem:[%s4634_s6 + $0x8] sm:$0xff] }
  0x99   :  { %v960_v49 = vsel %vm704_vm8, %v576_v4, %v832_v37  ;;  %v964_v50 = vsel %vm708_vm9, %v580_v0, %v836_v38  ;;  %vm706_vm10 = vcmp.gt.f32.partialorder %v3149_v6, 0.0  ;;  %vm710_vm11 = vcmp.gt.f32.partialorder %v3143_v2, 0.0  ;;  %v104_v54 = vpop.permute.xlu1 %103  ;;  %v1737_v37 = vld [vmem:[%s4634_s6] sm:$0xff] }
  0x9a   :  { %v2639_v51 = vpack.c.bf16 %v964_v50, %v960_v49  ;;  %v834_v52 = vmul.f32 0.01, %v3149_v6  ;;  %v838_v53 = vmul.f32 0.01, %v3143_v2  ;;  %vm703_vm12 = vcmp.gt.f32.partialorder %v3145_v3, 0.0  ;;  %v99_v55 = vpop.permute.xlu0 %98  ;;  %1194 = vperm.xlu1 %2831, %v1124_v48  }
  0x9b   :  { %vm707_vm13 = vcmp.gt.f32.partialorder %v3139_v63, 0.0  ;;  %v831_v57 = vmul.f32 0.01, %v3145_v3  ;;  %v835_v58 = vmul.f32 0.01, %v3139_v63  ;;  %vm705_vm14 = vcmp.gt.f32.partialorder %v3147_v5, 0.0  ;;  %1189 = vperm.xlu0 %2830, %v1123_v56  }
  0x9c   :  { %2640 = vmatprep.subr.bf16.mxu0 %v2639_v51  ;;  %v962_v60 = vsel %vm706_vm10, %v3149_v6, %v834_v52  ;;  %v966_v61 = vsel %vm710_vm11, %v3143_v2, %v838_v53  ;;  %vm709_vm15 = vcmp.gt.f32.partialorder %v3141_v1, 0.0  ;;  %v833_v0 = vmul.f32 0.01, %v3147_v5 }
  0x9d   :  { %v2703_v4 = vpack.c.bf16 %v966_v61, %v962_v60  ;;  %v959_v7 = vsel %vm703_vm12, %v3145_v3, %v831_v57  ;;  %v963_v11 = vsel %vm707_vm13, %v3139_v63, %v835_v58  ;;  %v837_v12 = vmul.f32 0.01, %v3141_v1  ;;  %v445_v6 = vpop.permute.xlu1 %444  ;;  %v1739_v60 = vld [vmem:[%s4634_s6 + $0x10] sm:$0xff] }
  0x9e   :  { %v2641_v14 = vpack.c.bf16 %v963_v11, %v959_v7  ;;  %v961_v15 = vsel %vm705_vm14, %v3147_v5, %v833_v0  ;;  %v275_v16 = vmul.f32 %v3087_v8, %v104_v54  ;;  %v276_v2 = vmul.f32 %v3091_v10, %v104_v54  ;;  %v440_v17 = vpop.permute.xlu0 %439  ;;  %1204 = vperm.xlu1 %2831, %v1126_v18  }
  0x9f   :  { %2704 = vmatprep.subr.bf16.mxu1 %v2703_v4  ;;  %v965_v3 = vsel %vm709_vm15, %v3141_v1, %v837_v12  ;;  %v277_v63 = vmul.f32 %v3089_v9, %v104_v54  ;;  %v278_v19 = vmul.f32 %v3099_v13, %v104_v54  ;;  %v271_v5 = vmul.f32 %v3087_v8, %v99_v55 }
  0xa0   :  { %2642 = vmatpush1.bf16.msra.mxu0 %v2641_v14  ;;  %v2705_v21 = vpack.c.bf16 %v965_v3, %v961_v15  ;;  %v3236_v22 = vadd.f32 %v445_v6, %v275_v16  ;;  %v3238_v23 = vadd.f32 %v445_v6, %v276_v2  ;;  %v272_v24 = vmul.f32 %v3091_v10, %v99_v55 }
  0xa1   :  { %v3241_v25 = vadd.f32 %v445_v6, %v277_v63  ;;  %v3243_v1 = vadd.f32 %v445_v6, %v278_v19  ;;  %v273_v26 = vmul.f32 %v3089_v9, %v99_v55  ;;  %v274_v28 = vmul.f32 %v3099_v13, %v99_v55  ;;  %1199 = vperm.xlu0 %2830, %v1125_v20   ;;  %v114_v31 = vpop.permute.xlu1 %113  ;;  %v2347_v19 = vld [vmem:[%s4635_s7] sm:$0xff] }
  0xa2   :  { %2706 = vmatpush1.bf16.msra.mxu1 %v2705_v21  ;;  %v3247_v29 = vadd.f32 %v440_v17, %v271_v5  ;;  %v3249_v30 = vadd.f32 %v440_v17, %v272_v24  ;;  %vm712_vm0 = vcmp.gt.f32.partialorder %v3189_v45, 0.0  ;;  %vm716_vm1 = vcmp.gt.f32.partialorder %v3178_v40, 0.0  ;;  %v109_v32 = vpop.permute.xlu0 %108  ;;  %1760 = vperm.xlu1 %2831, %v1738_v33  }
  0xa3   :  { %v3256_v34 = vadd.f32 %v440_v17, %v273_v26  ;;  %v3258_v35 = vadd.f32 %v440_v17, %v274_v28  ;;  %v840_v27 = vmul.f32 0.01, %v3189_v45  ;;  %v844_v36 = vmul.f32 0.01, %v3178_v40  ;;  %v2349_v26 = vld [vmem:[%s4635_s7 + $0x10] sm:$0xff] }
  0xa4   :  { %vm714_vm2 = vcmp.gt.f32.partialorder %v3193_v47, 0.0  ;;  %vm718_vm3 = vcmp.gt.f32.partialorder %v3182_v42, 0.0  ;;  %v842_v38 = vmul.f32 0.01, %v3193_v47  ;;  %v846_v43 = vmul.f32 0.01, %v3182_v42 }
  0xa5   :  { %v968_v48 = vsel %vm712_vm0, %v3189_v45, %v840_v27  ;;  %v972_v49 = vsel %vm716_vm1, %v3178_v40, %v844_v36  ;;  %vm711_vm4 = vcmp.gt.f32.partialorder %v3187_v44, 0.0  ;;  %vm715_vm5 = vcmp.gt.f32.partialorder %v3176_v39, 0.0  ;;  %1755 = vperm.xlu0 %2830, %v1737_v37   ;;  %v455_v54 = vpop.permute.xlu1 %454  ;;  %v1740_v40 = vld [vmem:[%s4634_s6 + $0x18] sm:$0xff] }
  0xa6   :  { %v2643_v50 = vpack.c.bf16 %v972_v49, %v968_v48  ;;  %v970_v51 = vsel %vm714_vm2, %v3193_v47, %v842_v38  ;;  %v974_v52 = vsel %vm718_vm3, %v3182_v42, %v846_v43  ;;  %v839_v53 = vmul.f32 0.01, %v3187_v44  ;;  %v450_v55 = vpop.permute.xlu0 %449  ;;  %1770 = vperm.xlu1 %2831, %v1740_v40   ;;  %v1741_v43 = vld [vmem:[%s4634_s6 + $0x20] sm:$0xff] }
  0xa7   :  { %v2707_v56 = vpack.c.bf16 %v974_v52, %v970_v51  ;;  %v843_v45 = vmul.f32 0.01, %v3176_v39  ;;  %vm713_vm6 = vcmp.gt.f32.partialorder %v3191_v46, 0.0  ;;  %vm717_vm7 = vcmp.gt.f32.partialorder %v3180_v41, 0.0 }
  0xa8   :  { %2644 = vmatprep.subr.bf16.mxu0 %v2643_v50  ;;  %v967_v42 = vsel %vm711_vm4, %v3187_v44, %v839_v53  ;;  %v841_v47 = vmul.f32 0.01, %v3191_v46  ;;  %v845_v57 = vmul.f32 0.01, %v3180_v41  ;;  %v283_v58 = vmul.f32 %v3087_v8, %v114_v31 }
  0xa9   :  { %2708 = vmatprep.subr.bf16.mxu1 %v2707_v56  ;;  %v971_v61 = vsel %vm715_vm5, %v3176_v39, %v843_v45  ;;  %v284_v0 = vmul.f32 %v3091_v10, %v114_v31  ;;  %v285_v4 = vmul.f32 %v3089_v9, %v114_v31  ;;  %v286_v44 = vmul.f32 %v3099_v13, %v114_v31  ;;  %v124_v15 = vpop.permute.xlu1 %123  ;;  %v2350_v56 = vld [vmem:[%s4635_s7 + $0x18] sm:$0xff] }
  0xaa   :  { %v2645_v7 = vpack.c.bf16 %v971_v61, %v967_v42  ;;  %v969_v11 = vsel %vm713_vm6, %v3191_v46, %v841_v47  ;;  %v973_v12 = vsel %vm717_vm7, %v3180_v41, %v845_v57  ;;  %v279_v14 = vmul.f32 %v3087_v8, %v109_v32  ;;  %v3304_v39 = vpop.permute.xlu0 %118  ;;  %1765 = vperm.xlu0 %2830, %v1739_v60   ;;  %v2348_v46 = vld [vmem:[%s4635_s7 + $0x8] sm:$0xff] }
  0xab   :  { %v2709_v6 = vpack.c.bf16 %v973_v12, %v969_v11  ;;  %v280_v16 = vmul.f32 %v3091_v10, %v109_v32  ;;  %v281_v2 = vmul.f32 %v3089_v9, %v109_v32  ;;  %v282_v17 = vmul.f32 %v3099_v13, %v109_v32  ;;  %2370 = vperm.xlu1 %2831, %v2348_v46  }
  0xac   :  { %2646 = vmatpush1.bf16.msra.mxu0 %v2645_v7  ;;  %v3312_v41 = vadd.f32 %v455_v54, %v283_v58  ;;  %v3314_v18 = vadd.f32 %v455_v54, %v284_v0  ;;  %v3316_v3 = vadd.f32 %v455_v54, %v285_v4  ;;  %v3318_v63 = vadd.f32 %v455_v54, %v286_v44 }
  0xad   :  { %2710 = vmatpush1.bf16.msra.mxu1 %v2709_v6  ;;  %v3323_v5 = vadd.f32 %v450_v55, %v279_v14  ;;  %v3325_v20 = vadd.f32 %v450_v55, %v280_v16  ;;  %v3327_v21 = vadd.f32 %v450_v55, %v281_v2  ;;  %v3329_v24 = vadd.f32 %v450_v55, %v282_v17  ;;  %v465_v32 = vpop.permute.xlu1 %464  ;;  %v1743_v17 = vld [vmem:[%s4634_s6 + $0x30] sm:$0xff] }
  0xae   :  { %vm720_vm8 = vcmp.gt.f32.partialorder %v3249_v30, 0.0  ;;  %vm724_vm9 = vcmp.gt.f32.partialorder %v3238_v23, 0.0  ;;  %v848_v28 = vmul.f32 0.01, %v3249_v30  ;;  %v852_v31 = vmul.f32 0.01, %v3238_v23  ;;  %v460_v33 = vpop.permute.xlu0 %459  ;;  %2365 = vperm.xlu0 %2830, %v2347_v19  }
  0xaf   :  { %vm722_vm10 = vcmp.gt.f32.partialorder %v3258_v35, 0.0  ;;  %vm726_vm11 = vcmp.gt.f32.partialorder %v3243_v1, 0.0  ;;  %v850_v27 = vmul.f32 0.01, %v3258_v35  ;;  %v854_v36 = vmul.f32 0.01, %v3243_v1  ;;  %2375 = vperm.xlu1 %2831, %v2349_v26  }
  0xb0   :  { %v976_v37 = vsel %vm720_vm8, %v3249_v30, %v848_v28  ;;  %v980_v38 = vsel %vm724_vm9, %v3238_v23, %v852_v31  ;;  %vm719_vm12 = vcmp.gt.f32.partialorder %v3247_v29, 0.0  ;;  %vm723_vm13 = vcmp.gt.f32.partialorder %v3236_v22, 0.0 }
  0xb1   :  { %v2647_v48 = vpack.c.bf16 %v980_v38, %v976_v37  ;;  %v978_v49 = vsel %vm722_vm10, %v3258_v35, %v850_v27  ;;  %v982_v50 = vsel %vm726_vm11, %v3243_v1, %v854_v36  ;;  %v847_v51 = vmul.f32 0.01, %v3247_v29  ;;  %v3355_v23 = vpop.permute.xlu1 %133  ;;  %v1080_v27 = vld [vmem:[%s4636_s3 + $0x8] sm:$0xff] }
  0xb2   :  { %v2711_v52 = vpack.c.bf16 %v982_v50, %v978_v49  ;;  %v851_v30 = vmul.f32 0.01, %v3236_v22  ;;  %vm721_vm14 = vcmp.gt.f32.partialorder %v3256_v34, 0.0  ;;  %vm725_vm15 = vcmp.gt.f32.partialorder %v3241_v25, 0.0  ;;  %v3357_v53 = vpop.permute.xlu0 %128  ;;  %1775 = vperm.xlu0 %2830, %v1741_v43   ;;  %1271 = vmatprep.mubr.f32.mxu0 %v1080_v27 }
  0xb3   :  { %2648 = vmatprep.subr.bf16.mxu0 %v2647_v48  ;;  %v975_v54 = vsel %vm719_vm12, %v3247_v29, %v847_v51  ;;  %v849_v35 = vmul.f32 0.01, %v3256_v34  ;;  %v853_v1 = vmul.f32 0.01, %v3241_v25  ;;  %v291_v55 = vmul.f32 %v3087_v8, %v124_v15  ;;  %2380 = vperm.xlu1 %2831, %v2350_v56  }
  0xb4   :  { %2712 = vmatprep.subr.bf16.mxu1 %v2711_v52  ;;  %v979_v45 = vsel %vm723_vm13, %v3236_v22, %v851_v30  ;;  %v292_v40 = vmul.f32 %v3091_v10, %v124_v15  ;;  %v293_v29 = vmul.f32 %v3089_v9, %v124_v15  ;;  %v294_v42 = vmul.f32 %v3099_v13, %v124_v15  ;;  %v2351_v15 = vld [vmem:[%s4635_s7 + $0x20] sm:$0xff]  ;;  %v1744_v52 = vld [vmem:[%s4634_s6 + $0x38] sm:$0xff] }
  0xb5   :  { %v2649_v47 = vpack.c.bf16 %v979_v45, %v975_v54  ;;  %v977_v57 = vsel %vm721_vm14, %v3256_v34, %v849_v35  ;;  %v981_v58 = vsel %vm725_vm15, %v3241_v25, %v853_v1  ;;  %v287_v60 = vmul.f32 %v3087_v8, %v3304_v39  ;;  %v1742_v34 = vld [vmem:[%s4634_s6 + $0x28] sm:$0xff]  ;;  %v3389_v44 = vpop.permute.xlu1 %474  ;;  %1432 = vmatprep.mubr.f32.mxu1 %v1080_v27 }
  0xb6   :  { %v2713_v61 = vpack.c.bf16 %v981_v58, %v977_v57  ;;  %v288_v22 = vmul.f32 %v3091_v10, %v3304_v39  ;;  %v289_v0 = vmul.f32 %v3089_v9, %v3304_v39  ;;  %v290_v4 = vmul.f32 %v3099_v13, %v3304_v39  ;;  %v3399_v14 = vpop.permute.xlu0 %469  ;;  %1780 = vperm.xlu0 %2830, %v1742_v34   ;;  %v2354_v34 = vld [vmem:[%s4635_s7 + $0x38] sm:$0xff] }
  0xb7   :  { %2650 = vmatpush1.bf16.msra.mxu0 %v2649_v47  ;;  %v3391_v25 = vadd.f32 %v465_v32, %v291_v55  ;;  %v3393_v7 = vadd.f32 %v465_v32, %v292_v40  ;;  %v3395_v11 = vadd.f32 %v465_v32, %v293_v29  ;;  %v3397_v12 = vadd.f32 %v465_v32, %v294_v42 }
  0xb8   :  { %2714 = vmatpush1.bf16.msra.mxu1 %v2713_v61  ;;  %v3404_v39 = vadd.f32 %v460_v33, %v287_v60  ;;  %v3406_v6 = vadd.f32 %v460_v33, %v288_v22  ;;  %v3408_v16 = vadd.f32 %v460_v33, %v289_v0  ;;  %v3410_v2 = vadd.f32 %v460_v33, %v290_v4  ;;  %v2352_v33 = vld [vmem:[%s4635_s7 + $0x28] sm:$0xff] }
  0xb9   :  { %vm728_vm0 = vcmp.gt.f32.partialorder %v3325_v20, 0.0  ;;  %vm732_vm1 = vcmp.gt.f32.partialorder %v3314_v18, 0.0  ;;  %v856_v46 = vmul.f32 0.01, %v3325_v20  ;;  %v860_v19 = vmul.f32 0.01, %v3314_v18  ;;  %2385 = vperm.xlu1 %2831, %v2351_v15  }
  0xba   :  { %vm730_vm2 = vcmp.gt.f32.partialorder %v3329_v24, 0.0  ;;  %vm734_vm3 = vcmp.gt.f32.partialorder %v3318_v63, 0.0  ;;  %v858_v26 = vmul.f32 0.01, %v3329_v24  ;;  %v862_v28 = vmul.f32 0.01, %v3318_v63  ;;  %1785 = vperm.xlu0 %2830, %v1743_v17   ;;  %v3441_v49 = vpop.permute.xlu0 %138 }
  0xbb   :  { %v984_v31 = vsel %vm728_vm0, %v3325_v20, %v856_v46  ;;  %v988_v32 = vsel %vm732_vm1, %v3314_v18, %v860_v19  ;;  %vm727_vm4 = vcmp.gt.f32.partialorder %v3323_v5, 0.0  ;;  %vm731_vm5 = vcmp.gt.f32.partialorder %v3312_v41, 0.0  ;;  %v3436_v18 = vpop.permute.xlu1 %143 }
  0xbc   :  { %v2651_v36 = vpack.c.bf16 %v988_v32, %v984_v31  ;;  %v986_v37 = vsel %vm730_vm2, %v3329_v24, %v858_v26  ;;  %v990_v38 = vsel %vm734_vm3, %v3318_v63, %v862_v28  ;;  %v855_v20 = vmul.f32 0.01, %v3323_v5  ;;  %v1746_v26 = vld [vmem:[%s4634_s6 + $0x48] sm:$0xff] }
  0xbd   :  { %v2715_v43 = vpack.c.bf16 %v990_v38, %v986_v37  ;;  %v859_v48 = vmul.f32 0.01, %v3312_v41  ;;  %vm729_vm6 = vcmp.gt.f32.partialorder %v3327_v21, 0.0  ;;  %vm733_vm7 = vcmp.gt.f32.partialorder %v3316_v3, 0.0  ;;  %2390 = vperm.xlu1 %2831, %v2352_v33  }
  0xbe   :  { %2652 = vmatprep.subr.bf16.mxu0 %v2651_v36  ;;  %v983_v63 = vsel %vm727_vm4, %v3323_v5, %v855_v20  ;;  %v857_v24 = vmul.f32 0.01, %v3327_v21  ;;  %v861_v50 = vmul.f32 0.01, %v3316_v3  ;;  %v299_v51 = vmul.f32 %v3087_v8, %v3355_v23  ;;  %1790 = vperm.xlu0 %2830, %v1744_v52   ;;  %v480_v4 = vpop.permute.xlu0 %479  ;;  %v2355_v20 = vld [vmem:[%s4635_s7 + $0x40] sm:$0xff] }
  0xbf   :  { %2716 = vmatprep.subr.bf16.mxu1 %v2715_v43  ;;  %v987_v30 = vsel %vm731_vm5, %v3312_v41, %v859_v48  ;;  %v300_v5 = vmul.f32 %v3091_v10, %v3355_v23  ;;  %v301_v54 = vmul.f32 %v3089_v9, %v3355_v23  ;;  %v302_v35 = vmul.f32 %v3099_v13, %v3355_v23  ;;  %v485_v58 = vpop.permute.xlu1 %484 }
  0xc0   :  { %v2653_v1 = vpack.c.bf16 %v987_v30, %v983_v63  ;;  %v985_v55 = vsel %vm729_vm6, %v3327_v21, %v857_v24  ;;  %v989_v56 = vsel %vm733_vm7, %v3316_v3, %v861_v50  ;;  %v295_v41 = vmul.f32 %v3087_v8, %v3357_v53  ;;  %v2353_v21 = vld [vmem:[%s4635_s7 + $0x30] sm:$0xff] }
  0xc1   :  { %v2717_v45 = vpack.c.bf16 %v989_v56, %v985_v55  ;;  %v296_v40 = vmul.f32 %v3091_v10, %v3357_v53  ;;  %v297_v29 = vmul.f32 %v3089_v9, %v3357_v53  ;;  %v298_v23 = vmul.f32 %v3099_v13, %v3357_v53  ;;  %v1745_v53 = vld [vmem:[%s4634_s6 + $0x40] sm:$0xff]  ;;  %2395 = vperm.xlu1 %2831, %v2353_v21   ;;  %v2356_v55 = vld [vmem:[%s4635_s7 + $0x48] sm:$0xff] }
  0xc2   :  { %2654 = vmatpush1.bf16.msra.mxu0 %v2653_v1  ;;  %v3480_v3 = vadd.f32 %v3389_v44, %v299_v51  ;;  %v3483_v42 = vadd.f32 %v3389_v44, %v300_v5  ;;  %v3486_v47 = vadd.f32 %v3389_v44, %v301_v54  ;;  %v3489_v57 = vadd.f32 %v3389_v44, %v302_v35  ;;  %v3537_v38 = vpop.permute.xlu0 %148 }
  0xc3   :  { %2718 = vmatpush1.bf16.msra.mxu1 %v2717_v45  ;;  %v3495_v60 = vadd.f32 %v3399_v14, %v295_v41  ;;  %v3498_v61 = vadd.f32 %v3399_v14, %v296_v40  ;;  %v3501_v22 = vadd.f32 %v3399_v14, %v297_v29  ;;  %v3504_v0 = vadd.f32 %v3399_v14, %v298_v23  ;;  %v1748_v29 = vld [vmem:[%s4634_s6 + $0x58] sm:$0xff] }
  0xc4   :  { %vm736_vm8 = vcmp.gt.f32.partialorder %v3406_v6, 0.0  ;;  %vm740_vm9 = vcmp.gt.f32.partialorder %v3393_v7, 0.0  ;;  %v864_v44 = vmul.f32 0.01, %v3406_v6  ;;  %v868_v15 = vmul.f32 0.01, %v3393_v7  ;;  %1795 = vperm.xlu0 %2830, %v1745_v53  }
  0xc5   :  { %vm738_vm10 = vcmp.gt.f32.partialorder %v3410_v2, 0.0  ;;  %vm742_vm11 = vcmp.gt.f32.partialorder %v3397_v12, 0.0  ;;  %v866_v14 = vmul.f32 0.01, %v3410_v2  ;;  %v870_v17 = vmul.f32 0.01, %v3397_v12  ;;  %2400 = vperm.xlu1 %2831, %v2354_v34  }
  0xc6   :  { %v992_v46 = vsel %vm736_vm8, %v3406_v6, %v864_v44  ;;  %v996_v19 = vsel %vm740_vm9, %v3393_v7, %v868_v15  ;;  %vm735_vm12 = vcmp.gt.f32.partialorder %v3404_v39, 0.0  ;;  %vm739_vm13 = vcmp.gt.f32.partialorder %v3391_v25, 0.0  ;;  %v3530_v7 = vpop.permute.xlu1 %153  ;;  %v2357_v15 = vld [vmem:[%s4635_s7 + $0x50] sm:$0xff] }
  0xc7   :  { %v2655_v28 = vpack.c.bf16 %v996_v19, %v992_v46  ;;  %v994_v31 = vsel %vm738_vm10, %v3410_v2, %v866_v14  ;;  %v998_v32 = vsel %vm742_vm11, %v3397_v12, %v870_v17  ;;  %v863_v33 = vmul.f32 0.01, %v3404_v39 }
  0xc8   :  { %v2719_v27 = vpack.c.bf16 %v998_v32, %v994_v31  ;;  %v867_v6 = vmul.f32 0.01, %v3391_v25  ;;  %vm737_vm14 = vcmp.gt.f32.partialorder %v3408_v16, 0.0  ;;  %vm741_vm15 = vcmp.gt.f32.partialorder %v3395_v11, 0.0  ;;  %1800 = vperm.xlu0 %2830, %v1746_v26   ;;  %v1749_v32 = vld [vmem:[%s4634_s6 + $0x60] sm:$0xff] }
  0xc9   :  { %2656 = vmatprep.subr.bf16.mxu0 %v2655_v28  ;;  %v991_v36 = vsel %vm735_vm12, %v3404_v39, %v863_v33  ;;  %v865_v37 = vmul.f32 0.01, %v3408_v16  ;;  %v869_v2 = vmul.f32 0.01, %v3395_v11  ;;  %v307_v12 = vmul.f32 %v3087_v8, %v3436_v18  ;;  %2405 = vperm.xlu1 %2831, %v2355_v20  }
  0xca   :  { %2720 = vmatprep.subr.bf16.mxu1 %v2719_v27  ;;  %v995_v43 = vsel %vm739_vm13, %v3391_v25, %v867_v6  ;;  %v308_v39 = vmul.f32 %v3091_v10, %v3436_v18  ;;  %v309_v48 = vmul.f32 %v3089_v9, %v3436_v18  ;;  %v310_v63 = vmul.f32 %v3099_v13, %v3436_v18  ;;  %v495_v40 = vpop.permute.xlu1 %494 }
  0xcb   :  { %v2657_v24 = vpack.c.bf16 %v995_v43, %v991_v36  ;;  %v993_v50 = vsel %vm737_vm14, %v3408_v16, %v865_v37  ;;  %v997_v51 = vsel %vm741_vm15, %v3395_v11, %v869_v2  ;;  %v303_v25 = vmul.f32 %v3087_v8, %v3441_v49  ;;  %v1747_v16 = vld [vmem:[%s4634_s6 + $0x50] sm:$0xff] }
  0xcc   :  { %v2721_v52 = vpack.c.bf16 %v997_v51, %v993_v50  ;;  %v304_v30 = vmul.f32 %v3091_v10, %v3441_v49  ;;  %v305_v5 = vmul.f32 %v3089_v9, %v3441_v49  ;;  %v306_v18 = vmul.f32 %v3099_v13, %v3441_v49  ;;  %1805 = vperm.xlu0 %2830, %v1747_v16   ;;  %v1750_v50 = vld [vmem:[%s4634_s6 + $0x68] sm:$0xff] }
  0xcd   :  { %2658 = vmatpush1.bf16.msra.mxu0 %v2657_v24  ;;  %v3568_v11 = vadd.f32 %v485_v58, %v307_v12  ;;  %v3570_v54 = vadd.f32 %v485_v58, %v308_v39  ;;  %v3572_v35 = vadd.f32 %v485_v58, %v309_v48  ;;  %v3574_v1 = vadd.f32 %v485_v58, %v310_v63  ;;  %v490_v58 = vpop.permute.xlu0 %489 }
  0xce   :  { %2722 = vmatpush1.bf16.msra.mxu1 %v2721_v52  ;;  %v3579_v49 = vadd.f32 %v480_v4, %v303_v25  ;;  %v3581_v56 = vadd.f32 %v480_v4, %v304_v30  ;;  %v3583_v41 = vadd.f32 %v480_v4, %v305_v5  ;;  %v3585_v45 = vadd.f32 %v480_v4, %v306_v18  ;;  %v2359_v30 = vld [vmem:[%s4635_s7 + $0x60] sm:$0xff] }
  0xcf   :  { %vm744_vm0 = vcmp.gt.f32.partialorder %v3498_v61, 0.0  ;;  %vm748_vm1 = vcmp.gt.f32.partialorder %v3483_v42, 0.0  ;;  %v872_v23 = vmul.f32 0.01, %v3498_v61  ;;  %v876_v21 = vmul.f32 0.01, %v3483_v42  ;;  %2410 = vperm.xlu1 %2831, %v2356_v55  }
  0xd0   :  { %vm746_vm2 = vcmp.gt.f32.partialorder %v3504_v0, 0.0  ;;  %vm750_vm3 = vcmp.gt.f32.partialorder %v3489_v57, 0.0  ;;  %v874_v53 = vmul.f32 0.01, %v3504_v0  ;;  %v878_v4 = vmul.f32 0.01, %v3489_v57  ;;  %1810 = vperm.xlu0 %2830, %v1748_v29  }
  0xd1   :  { %v1000_v34 = vsel %vm744_vm0, %v3498_v61, %v872_v23  ;;  %v1004_v44 = vsel %vm748_vm1, %v3483_v42, %v876_v21  ;;  %vm743_vm4 = vcmp.gt.f32.partialorder %v3495_v60, 0.0  ;;  %vm747_vm5 = vcmp.gt.f32.partialorder %v3480_v3, 0.0  ;;  %v3630_v36 = vpop.permute.xlu0 %158 }
  0xd2   :  { %v2659_v14 = vpack.c.bf16 %v1004_v44, %v1000_v34  ;;  %v1002_v17 = vsel %vm746_vm2, %v3504_v0, %v874_v53  ;;  %v1006_v46 = vsel %vm750_vm3, %v3489_v57, %v878_v4  ;;  %v871_v19 = vmul.f32 0.01, %v3495_v60  ;;  %v3616_v0 = vpop.permute.xlu1 %163 }
  0xd3   :  { %v2723_v26 = vpack.c.bf16 %v1006_v46, %v1002_v17  ;;  %v875_v61 = vmul.f32 0.01, %v3480_v3  ;;  %vm745_vm6 = vcmp.gt.f32.partialorder %v3501_v22, 0.0  ;;  %vm749_vm7 = vcmp.gt.f32.partialorder %v3486_v47, 0.0  ;;  %2415 = vperm.xlu1 %2831, %v2357_v15  }
  0xd4   :  { %2660 = vmatprep.subr.bf16.mxu0 %v2659_v14  ;;  %v999_v42 = vsel %vm743_vm4, %v3495_v60, %v871_v19  ;;  %v873_v28 = vmul.f32 0.01, %v3501_v22  ;;  %v877_v31 = vmul.f32 0.01, %v3486_v47  ;;  %v315_v57 = vmul.f32 %v3087_v8, %v3530_v7  ;;  %1815 = vperm.xlu0 %2830, %v1749_v32  }
  0xd5   :  { %2724 = vmatprep.subr.bf16.mxu1 %v2723_v26  ;;  %v1003_v33 = vsel %vm747_vm5, %v3480_v3, %v875_v61  ;;  %v316_v60 = vmul.f32 %v3091_v10, %v3530_v7  ;;  %v317_v27 = vmul.f32 %v3089_v9, %v3530_v7  ;;  %v318_v6 = vmul.f32 %v3099_v13, %v3530_v7  ;;  %v500_v29 = vpop.permute.xlu0 %499 }
  0xd6   :  { %v2661_v37 = vpack.c.bf16 %v1003_v33, %v999_v42  ;;  %v1001_v2 = vsel %vm745_vm6, %v3501_v22, %v873_v28  ;;  %v1005_v3 = vsel %vm749_vm7, %v3486_v47, %v877_v31  ;;  %v311_v12 = vmul.f32 %v3087_v8, %v3537_v38  ;;  %v2358_v22 = vld [vmem:[%s4635_s7 + $0x58] sm:$0xff]  ;;  %v505_v16 = vpop.permute.xlu1 %504 }
  0xd7   :  { %v2725_v20 = vpack.c.bf16 %v1005_v3, %v1001_v2  ;;  %v312_v43 = vmul.f32 %v3091_v10, %v3537_v38  ;;  %v313_v7 = vmul.f32 %v3089_v9, %v3537_v38  ;;  %v314_v39 = vmul.f32 %v3099_v13, %v3537_v38  ;;  %2420 = vperm.xlu1 %2831, %v2358_v22   ;;  %v2362_v2 = vld [vmem:[%s4635_s7 + $0x78] sm:$0xff] }
  0xd8   :  { %2662 = vmatpush1.bf16.msra.mxu0 %v2661_v37  ;;  %v3649_v47 = vadd.f32 %v495_v40, %v315_v57  ;;  %v3651_v48 = vadd.f32 %v495_v40, %v316_v60  ;;  %v3653_v63 = vadd.f32 %v495_v40, %v317_v27  ;;  %v3655_v24 = vadd.f32 %v495_v40, %v318_v6 }
  0xd9   :  { %2726 = vmatpush1.bf16.msra.mxu1 %v2725_v20  ;;  %v3660_v38 = vadd.f32 %v490_v58, %v311_v12  ;;  %v3662_v51 = vadd.f32 %v490_v58, %v312_v43  ;;  %v3664_v25 = vadd.f32 %v490_v58, %v313_v7  ;;  %v3666_v52 = vadd.f32 %v490_v58, %v314_v39  ;;  %v1751_v58 = vld [vmem:[%s4634_s6 + $0x70] sm:$0xff]  ;;  %v169_v57 = vpop.permute.xlu0 %168 }
  0xda   :  { %vm752_vm8 = vcmp.gt.f32.partialorder %v3581_v56, 0.0  ;;  %vm756_vm9 = vcmp.gt.f32.partialorder %v3570_v54, 0.0  ;;  %v880_v5 = vmul.f32 0.01, %v3581_v56  ;;  %v884_v18 = vmul.f32 0.01, %v3570_v54  ;;  %1820 = vperm.xlu0 %2830, %v1750_v50   ;;  %v174_v61 = vpop.permute.xlu1 %173 }
  0xdb   :  { %vm754_vm10 = vcmp.gt.f32.partialorder %v3585_v45, 0.0  ;;  %vm758_vm11 = vcmp.gt.f32.partialorder %v3574_v1, 0.0  ;;  %v882_v55 = vmul.f32 0.01, %v3585_v45  ;;  %v886_v40 = vmul.f32 0.01, %v3574_v1  ;;  %2425 = vperm.xlu1 %2831, %v2359_v30  }
  0xdc   :  { %v1008_v23 = vsel %vm752_vm8, %v3581_v56, %v880_v5  ;;  %v1012_v21 = vsel %vm756_vm9, %v3570_v54, %v884_v18  ;;  %vm751_vm12 = vcmp.gt.f32.partialorder %v3579_v49, 0.0  ;;  %vm755_vm13 = vcmp.gt.f32.partialorder %v3568_v11, 0.0  ;;  %v2361_v43 = vld [vmem:[%s4635_s7 + $0x70] sm:$0xff] }
  0xdd   :  { %v2663_v53 = vpack.c.bf16 %v1012_v21, %v1008_v23  ;;  %v1010_v4 = vsel %vm754_vm10, %v3585_v45, %v882_v55  ;;  %v1014_v34 = vsel %vm758_vm11, %v3574_v1, %v886_v40  ;;  %v879_v44 = vmul.f32 0.01, %v3579_v49  ;;  %v2360_v45 = vld [vmem:[%s4635_s7 + $0x68] sm:$0xff] }
  0xde   :  { %v2727_v15 = vpack.c.bf16 %v1014_v34, %v1010_v4  ;;  %v883_v56 = vmul.f32 0.01, %v3568_v11  ;;  %vm753_vm14 = vcmp.gt.f32.partialorder %v3583_v41, 0.0  ;;  %vm757_vm15 = vcmp.gt.f32.partialorder %v3572_v35, 0.0  ;;  %1825 = vperm.xlu0 %2830, %v1751_v58   ;;  %v515_v30 = vpop.permute.xlu1 %514 }
  0xdf   :  { %2664 = vmatprep.subr.bf16.mxu0 %v2663_v53  ;;  %v1007_v54 = vsel %vm751_vm12, %v3579_v49, %v879_v44  ;;  %v881_v14 = vmul.f32 0.01, %v3583_v41  ;;  %v885_v17 = vmul.f32 0.01, %v3572_v35  ;;  %v323_v1 = vmul.f32 %v3087_v8, %v3616_v0  ;;  %2430 = vperm.xlu1 %2831, %v2360_v45  }
  0xe0   :  { %2728 = vmatprep.subr.bf16.mxu1 %v2727_v15  ;;  %v1011_v46 = vsel %vm755_vm13, %v3568_v11, %v883_v56  ;;  %v324_v49 = vmul.f32 %v3091_v10, %v3616_v0  ;;  %v325_v19 = vmul.f32 %v3089_v9, %v3616_v0  ;;  %v326_v26 = vmul.f32 %v3099_v13, %v3616_v0 }
  0xe1   :  { %v2665_v42 = vpack.c.bf16 %v1011_v46, %v1007_v54  ;;  %v1009_v28 = vsel %vm753_vm14, %v3583_v41, %v881_v14  ;;  %v1013_v31 = vsel %vm757_vm15, %v3572_v35, %v885_v17  ;;  %v319_v11 = vmul.f32 %v3087_v8, %v3630_v36  ;;  %v1752_v41 = vld [vmem:[%s4634_s6 + $0x78] sm:$0xff] }
  0xe2   :  { %v2729_v32 = vpack.c.bf16 %v1013_v31, %v1009_v28  ;;  %v320_v33 = vmul.f32 %v3091_v10, %v3630_v36  ;;  %v321_v0 = vmul.f32 %v3089_v9, %v3630_v36  ;;  %v322_v60 = vmul.f32 %v3099_v13, %v3630_v36  ;;  %1830 = vperm.xlu0 %2830, %v1752_v41   ;;  %v184_v14 = vpop.permute.xlu1 %183 }
  0xe3   :  { %2666 = vmatpush1.bf16.msra.mxu0 %v2665_v42  ;;  %v3726_v35 = vadd.f32 %v505_v16, %v323_v1  ;;  %v3728_v27 = vadd.f32 %v505_v16, %v324_v49  ;;  %v3730_v6 = vadd.f32 %v505_v16, %v325_v19  ;;  %v3732_v37 = vadd.f32 %v505_v16, %v326_v26  ;;  %v510_v16 = vpop.permute.xlu0 %509 }
  0xe4   :  { %2730 = vmatpush1.bf16.msra.mxu1 %v2729_v32  ;;  %v3737_v36 = vadd.f32 %v500_v29, %v319_v11  ;;  %v3739_v3 = vadd.f32 %v500_v29, %v320_v33  ;;  %v3741_v12 = vadd.f32 %v500_v29, %v321_v0  ;;  %v3743_v20 = vadd.f32 %v500_v29, %v322_v60 }
  0xe5   :  { %vm760_vm0 = vcmp.gt.f32.partialorder %v3662_v51, 0.0  ;;  %vm764_vm1 = vcmp.gt.f32.partialorder %v3651_v48, 0.0  ;;  %v888_v7 = vmul.f32 0.01, %v3662_v51  ;;  %v892_v39 = vmul.f32 0.01, %v3651_v48  ;;  %2440 = vperm.xlu1 %2831, %v2362_v2  }
  0xe6   :  { %vm762_vm2 = vcmp.gt.f32.partialorder %v3666_v52, 0.0  ;;  %vm766_vm3 = vcmp.gt.f32.partialorder %v3655_v24, 0.0  ;;  %v890_v22 = vmul.f32 0.01, %v3666_v52  ;;  %v894_v50 = vmul.f32 0.01, %v3655_v24  ;;  %2435 = vperm.xlu0 %2830, %v2361_v43   ;;  %v525_v60 = vpop.permute.xlu1 %524 }
  0xe7   :  { %v1016_v5 = vsel %vm760_vm0, %v3662_v51, %v888_v7  ;;  %v1020_v18 = vsel %vm764_vm1, %v3651_v48, %v892_v39  ;;  %vm759_vm4 = vcmp.gt.f32.partialorder %v3660_v38, 0.0  ;;  %vm763_vm5 = vcmp.gt.f32.partialorder %v3649_v47, 0.0  ;;  %v179_v46 = vpop.permute.xlu0 %178 }
  0xe8   :  { %v2667_v55 = vpack.c.bf16 %v1020_v18, %v1016_v5  ;;  %v1018_v40 = vsel %vm762_vm2, %v3666_v52, %v890_v22  ;;  %v1022_v29 = vsel %vm766_vm3, %v3655_v24, %v894_v50  ;;  %v887_v23 = vmul.f32 0.01, %v3660_v38 }
  0xe9   :  { %v2731_v21 = vpack.c.bf16 %v1022_v29, %v1018_v40  ;;  %v891_v58 = vmul.f32 0.01, %v3649_v47  ;;  %vm761_vm6 = vcmp.gt.f32.partialorder %v3664_v25, 0.0  ;;  %vm765_vm7 = vcmp.gt.f32.partialorder %v3653_v63, 0.0 }
  0xea   :  { %2668 = vmatprep.subr.bf16.mxu0 %v2667_v55  ;;  %v1015_v48 = vsel %vm759_vm4, %v3660_v38, %v887_v23  ;;  %v889_v51 = vmul.f32 0.01, %v3664_v25  ;;  %v893_v53 = vmul.f32 0.01, %v3653_v63  ;;  %v331_v52 = vmul.f32 %v3087_v8, %v174_v61 }
  0xeb   :  { %2732 = vmatprep.subr.bf16.mxu1 %v2731_v21  ;;  %v1019_v24 = vsel %vm763_vm5, %v3649_v47, %v891_v58  ;;  %v332_v4 = vmul.f32 %v3091_v10, %v174_v61  ;;  %v333_v34 = vmul.f32 %v3089_v9, %v174_v61  ;;  %v334_v44 = vmul.f32 %v3099_v13, %v174_v61  ;;  %v520_v39 = vpop.permute.xlu0 %519 }
  0xec   :  { %v2669_v15 = vpack.c.bf16 %v1019_v24, %v1015_v48  ;;  %v1017_v38 = vsel %vm761_vm6, %v3664_v25, %v889_v51  ;;  %v1021_v56 = vsel %vm765_vm7, %v3653_v63, %v893_v53  ;;  %v327_v54 = vmul.f32 %v3087_v8, %v169_v57  ;;  %v194_v48 = vpop.permute.xlu1 %193 }
  0xed   :  { %v2733_v17 = vpack.c.bf16 %v1021_v56, %v1017_v38  ;;  %v328_v1 = vmul.f32 %v3091_v10, %v169_v57  ;;  %v329_v45 = vmul.f32 %v3089_v9, %v169_v57  ;;  %v330_v47 = vmul.f32 %v3099_v13, %v169_v57 }
  0xee   :  { %2670 = vmatpush1.bf16.msra.mxu0 %v2669_v15  ;;  %v3782_v49 = vadd.f32 %v515_v30, %v331_v52  ;;  %v3784_v19 = vadd.f32 %v515_v30, %v332_v4  ;;  %v3786_v26 = vadd.f32 %v515_v30, %v333_v34  ;;  %v3788_v25 = vadd.f32 %v515_v30, %v334_v44 }
  0xef   :  { %2734 = vmatpush1.bf16.msra.mxu1 %v2733_v17  ;;  %v3790_v63 = vadd.f32 %v510_v16, %v327_v54  ;;  %v3792_v61 = vadd.f32 %v510_v16, %v328_v1  ;;  %v3794_v42 = vadd.f32 %v510_v16, %v329_v45  ;;  %v3796_v28 = vadd.f32 %v510_v16, %v330_v47 }
  0xf0   :  { %vm768_vm8 = vcmp.gt.f32.partialorder %v3739_v3, 0.0  ;;  %vm772_vm9 = vcmp.gt.f32.partialorder %v3728_v27, 0.0  ;;  %v896_v31 = vmul.f32 0.01, %v3739_v3  ;;  %v900_v11 = vmul.f32 0.01, %v3728_v27 }
  0xf1   :  { %vm770_vm10 = vcmp.gt.f32.partialorder %v3743_v20, 0.0  ;;  %vm774_vm11 = vcmp.gt.f32.partialorder %v3732_v37, 0.0  ;;  %v898_v57 = vmul.f32 0.01, %v3743_v20  ;;  %v902_v32 = vmul.f32 0.01, %v3732_v37 }
  0xf2   :  { %v1024_v33 = vsel %vm768_vm8, %v3739_v3, %v896_v31  ;;  %v1028_v0 = vsel %vm772_vm9, %v3728_v27, %v900_v11  ;;  %vm767_vm12 = vcmp.gt.f32.partialorder %v3737_v36, 0.0  ;;  %vm771_vm13 = vcmp.gt.f32.partialorder %v3726_v35, 0.0  ;;  %v535_v31 = vpop.permute.xlu1 %534 }
  0xf3   :  { %v2671_v41 = vpack.c.bf16 %v1028_v0, %v1024_v33  ;;  %v1026_v2 = vsel %vm770_vm10, %v3743_v20, %v898_v57  ;;  %v1030_v43 = vsel %vm774_vm11, %v3732_v37, %v902_v32  ;;  %v895_v7 = vmul.f32 0.01, %v3737_v36 }
  0xf4   :  { %v2735_v22 = vpack.c.bf16 %v1030_v43, %v1026_v2  ;;  %v899_v50 = vmul.f32 0.01, %v3726_v35  ;;  %vm769_vm14 = vcmp.gt.f32.partialorder %v3741_v12, 0.0  ;;  %vm773_vm15 = vcmp.gt.f32.partialorder %v3730_v6, 0.0 }
  0xf5   :  { %2672 = vmatprep.subr.bf16.mxu0 %v2671_v41  ;;  %v1023_v27 = vsel %vm767_vm12, %v3737_v36, %v895_v7  ;;  %v897_v3 = vmul.f32 0.01, %v3741_v12  ;;  %v901_v30 = vmul.f32 0.01, %v3730_v6  ;;  %v339_v20 = vmul.f32 %v3087_v8, %v184_v14 }
  0xf6   :  { %2736 = vmatprep.subr.bf16.mxu1 %v2735_v22  ;;  %v1027_v37 = vsel %vm771_vm13, %v3726_v35, %v899_v50  ;;  %v340_v5 = vmul.f32 %v3091_v10, %v184_v14  ;;  %v341_v18 = vmul.f32 %v3089_v9, %v184_v14  ;;  %v342_v16 = vmul.f32 %v3099_v13, %v184_v14 }
  0xf7   :  { %v2673_v55 = vpack.c.bf16 %v1027_v37, %v1023_v27  ;;  %v1025_v36 = vsel %vm769_vm14, %v3741_v12, %v897_v3  ;;  %v1029_v40 = vsel %vm773_vm15, %v3730_v6, %v901_v30  ;;  %v335_v29 = vmul.f32 %v3087_v8, %v179_v46  ;;  %v189_v6 = vpop.permute.xlu0 %188 }
  0xf8   :  { %v2737_v23 = vpack.c.bf16 %v1029_v40, %v1025_v36  ;;  %v336_v21 = vmul.f32 %v3091_v10, %v179_v46  ;;  %v337_v58 = vmul.f32 %v3089_v9, %v179_v46  ;;  %v338_v35 = vmul.f32 %v3099_v13, %v179_v46 }
  0xf9   :  { %2674 = vmatpush1.bf16.msra.mxu0 %v2673_v55  ;;  %v3832_v51 = vadd.f32 %v525_v60, %v339_v20  ;;  %v3834_v53 = vadd.f32 %v525_v60, %v340_v5  ;;  %v3836_v52 = vadd.f32 %v525_v60, %v341_v18  ;;  %v3838_v12 = vadd.f32 %v525_v60, %v342_v16 }
  0xfa   :  { %2738 = vmatpush1.bf16.msra.mxu1 %v2737_v23  ;;  %v3840_v24 = vadd.f32 %v520_v39, %v335_v29  ;;  %v3842_v4 = vadd.f32 %v520_v39, %v336_v21  ;;  %v3844_v34 = vadd.f32 %v520_v39, %v337_v58  ;;  %v3846_v44 = vadd.f32 %v520_v39, %v338_v35 }
  0xfb   :  { %vm776_vm0 = vcmp.gt.f32.partialorder %v3792_v61, 0.0  ;;  %vm780_vm1 = vcmp.gt.f32.partialorder %v3784_v19, 0.0  ;;  %v904_v15 = vmul.f32 0.01, %v3792_v61  ;;  %v908_v38 = vmul.f32 0.01, %v3784_v19 }
  0xfc   :  { %vm778_vm2 = vcmp.gt.f32.partialorder %v3796_v28, 0.0  ;;  %vm782_vm3 = vcmp.gt.f32.partialorder %v3788_v25, 0.0  ;;  %v906_v56 = vmul.f32 0.01, %v3796_v28  ;;  %v910_v54 = vmul.f32 0.01, %v3788_v25 }
  0xfd   :  { %v1032_v14 = vsel %vm776_vm0, %v3792_v61, %v904_v15  ;;  %v1036_v17 = vsel %vm780_vm1, %v3784_v19, %v908_v38  ;;  %vm775_vm4 = vcmp.gt.f32.partialorder %v3790_v63, 0.0  ;;  %vm779_vm5 = vcmp.gt.f32.partialorder %v3782_v49, 0.0  ;;  %v530_v19 = vpop.permute.xlu0 %529 }
  0xfe   :  { %v2675_v1 = vpack.c.bf16 %v1036_v17, %v1032_v14  ;;  %v1034_v45 = vsel %vm778_vm2, %v3796_v28, %v906_v56  ;;  %v1038_v47 = vsel %vm782_vm3, %v3788_v25, %v910_v54  ;;  %v903_v46 = vmul.f32 0.01, %v3790_v63 }
  0xff   :  { %v2739_v11 = vpack.c.bf16 %v1038_v47, %v1034_v45  ;;  %v907_v57 = vmul.f32 0.01, %v3782_v49  ;;  %vm777_vm6 = vcmp.gt.f32.partialorder %v3794_v42, 0.0  ;;  %vm781_vm7 = vcmp.gt.f32.partialorder %v3786_v26, 0.0 }
 0x100   :  { %2676 = vmatprep.subr.bf16.mxu0 %v2675_v1  ;;  %v1031_v61 = vsel %vm775_vm4, %v3790_v63, %v903_v46  ;;  %v905_v32 = vmul.f32 0.01, %v3794_v42  ;;  %v909_v28 = vmul.f32 0.01, %v3786_v26  ;;  %v347_v25 = vmul.f32 %v3087_v8, %v194_v48 }
 0x101   :  { %2740 = vmatprep.subr.bf16.mxu1 %v2739_v11  ;;  %v1035_v33 = vsel %vm779_vm5, %v3782_v49, %v907_v57  ;;  %v348_v0 = vmul.f32 %v3091_v10, %v194_v48  ;;  %v349_v60 = vmul.f32 %v3089_v9, %v194_v48  ;;  %v350_v41 = vmul.f32 %v3099_v13, %v194_v48  ;;  %v199_v16 = vpop.permute.xlu0 %198 }
 0x102   :  { %v2677_v2 = vpack.c.bf16 %v1035_v33, %v1031_v61  ;;  %v1033_v63 = vsel %vm777_vm6, %v3794_v42, %v905_v32  ;;  %v1037_v43 = vsel %vm781_vm7, %v3786_v26, %v909_v28  ;;  %v343_v7 = vmul.f32 %v3087_v8, %v189_v6  ;;  %v204_v42 = vpop.permute.xlu1 %203 }
 0x103   :  { %v2741_v39 = vpack.c.bf16 %v1037_v43, %v1033_v63  ;;  %v344_v22 = vmul.f32 %v3091_v10, %v189_v6  ;;  %v345_v50 = vmul.f32 %v3089_v9, %v189_v6  ;;  %v346_v49 = vmul.f32 %v3099_v13, %v189_v6 }
 0x104   :  { %2678 = vmatpush1.bf16.msra.mxu0 %v2677_v2  ;;  %v3882_v27 = vadd.f32 %v535_v31, %v347_v25  ;;  %v3884_v3 = vadd.f32 %v535_v31, %v348_v0  ;;  %v3886_v30 = vadd.f32 %v535_v31, %v349_v60  ;;  %v3888_v20 = vadd.f32 %v535_v31, %v350_v41 }
 0x105   :  { %2742 = vmatpush1.bf16.msra.mxu1 %v2741_v39  ;;  %v3890_v26 = vadd.f32 %v530_v19, %v343_v7  ;;  %v3892_v37 = vadd.f32 %v530_v19, %v344_v22  ;;  %v3894_v5 = vadd.f32 %v530_v19, %v345_v50  ;;  %v3896_v18 = vadd.f32 %v530_v19, %v346_v49 }
 0x106   :  { %vm784_vm8 = vcmp.gt.f32.partialorder %v3842_v4, 0.0  ;;  %vm788_vm9 = vcmp.gt.f32.partialorder %v3834_v53, 0.0  ;;  %v912_v55 = vmul.f32 0.01, %v3842_v4  ;;  %v916_v36 = vmul.f32 0.01, %v3834_v53 }
 0x107   :  { %vm786_vm10 = vcmp.gt.f32.partialorder %v3846_v44, 0.0  ;;  %vm790_vm11 = vcmp.gt.f32.partialorder %v3838_v12, 0.0  ;;  %v914_v40 = vmul.f32 0.01, %v3846_v44  ;;  %v918_v29 = vmul.f32 0.01, %v3838_v12 }
 0x108   :  { %v1040_v23 = vsel %vm784_vm8, %v3842_v4, %v912_v55  ;;  %v1044_v21 = vsel %vm788_vm9, %v3834_v53, %v916_v36  ;;  %vm783_vm12 = vcmp.gt.f32.partialorder %v3840_v24, 0.0  ;;  %vm787_vm13 = vcmp.gt.f32.partialorder %v3832_v51, 0.0  ;;  %v545_v4 = vpop.permute.xlu1 %544 }
 0x109   :  { %v2679_v58 = vpack.c.bf16 %v1044_v21, %v1040_v23  ;;  %v1042_v35 = vsel %vm786_vm10, %v3846_v44, %v914_v40  ;;  %v1046_v48 = vsel %vm790_vm11, %v3838_v12, %v918_v29  ;;  %v911_v6 = vmul.f32 0.01, %v3840_v24  ;;  %v540_v12 = vpop.permute.xlu0 %539 }
 0x10a   :  { %v2743_v15 = vpack.c.bf16 %v1046_v48, %v1042_v35  ;;  %v915_v38 = vmul.f32 0.01, %v3832_v51  ;;  %vm785_vm14 = vcmp.gt.f32.partialorder %v3844_v34, 0.0  ;;  %vm789_vm15 = vcmp.gt.f32.partialorder %v3836_v52, 0.0 }
 0x10b   :  { %2680 = vmatprep.subr.bf16.mxu0 %v2679_v58  ;;  %v1039_v53 = vsel %vm783_vm12, %v3840_v24, %v911_v6  ;;  %v913_v56 = vmul.f32 0.01, %v3844_v34  ;;  %v917_v54 = vmul.f32 0.01, %v3836_v52  ;;  %v355_v44 = vmul.f32 %v3087_v8, %v204_v42 }
 0x10c   :  { %2744 = vmatprep.subr.bf16.mxu1 %v2743_v15  ;;  %v1043_v14 = vsel %vm787_vm13, %v3832_v51, %v915_v38  ;;  %v356_v17 = vmul.f32 %v3091_v10, %v204_v42  ;;  %v357_v1 = vmul.f32 %v3089_v9, %v204_v42  ;;  %v358_v45 = vmul.f32 %v3099_v13, %v204_v42  ;;  %v214_v60 = vpop.permute.xlu1 %213 }
 0x10d   :  { %v2681_v47 = vpack.c.bf16 %v1043_v14, %v1039_v53  ;;  %v1041_v24 = vsel %vm785_vm14, %v3844_v34, %v913_v56  ;;  %v1045_v46 = vsel %vm789_vm15, %v3836_v52, %v917_v54  ;;  %v351_v31 = vmul.f32 %v3087_v8, %v199_v16  ;;  %v209_v63 = vpop.permute.xlu0 %208 }
 0x10e   :  { %v2745_v11 = vpack.c.bf16 %v1045_v46, %v1041_v24  ;;  %v352_v57 = vmul.f32 %v3091_v10, %v199_v16  ;;  %v353_v19 = vmul.f32 %v3089_v9, %v199_v16  ;;  %v354_v51 = vmul.f32 %v3099_v13, %v199_v16 }
 0x10f   :  { %2682 = vmatpush1.bf16.msra.mxu0 %v2681_v47  ;;  %v3932_v61 = vadd.f32 %v545_v4, %v355_v44  ;;  %v3934_v32 = vadd.f32 %v545_v4, %v356_v17  ;;  %v3936_v28 = vadd.f32 %v545_v4, %v357_v1  ;;  %v3938_v25 = vadd.f32 %v545_v4, %v358_v45 }
 0x110   :  { %2746 = vmatpush1.bf16.msra.mxu1 %v2745_v11  ;;  %v3940_v52 = vadd.f32 %v540_v12, %v351_v31  ;;  %v3942_v34 = vadd.f32 %v540_v12, %v352_v57  ;;  %v3944_v33 = vadd.f32 %v540_v12, %v353_v19  ;;  %v3946_v0 = vadd.f32 %v540_v12, %v354_v51  ;;  %v555_v29 = vpop.permute.xlu1 %554 }
 0x111   :  { %vm792_vm0 = vcmp.gt.f32.partialorder %v3892_v37, 0.0  ;;  %vm796_vm1 = vcmp.gt.f32.partialorder %v3884_v3, 0.0  ;;  %v920_v41 = vmul.f32 0.01, %v3892_v37  ;;  %v924_v2 = vmul.f32 0.01, %v3884_v3  ;;  %v550_v35 = vpop.permute.xlu0 %549 }
 0x112   :  { %vm794_vm2 = vcmp.gt.f32.partialorder %v3896_v18, 0.0  ;;  %vm798_vm3 = vcmp.gt.f32.partialorder %v3888_v20, 0.0  ;;  %v922_v43 = vmul.f32 0.01, %v3896_v18  ;;  %v926_v7 = vmul.f32 0.01, %v3888_v20 }
 0x113   :  { %v1048_v39 = vsel %vm792_vm0, %v3892_v37, %v920_v41  ;;  %v1052_v22 = vsel %vm796_vm1, %v3884_v3, %v924_v2  ;;  %vm791_vm4 = vcmp.gt.f32.partialorder %v3890_v26, 0.0  ;;  %vm795_vm5 = vcmp.gt.f32.partialorder %v3882_v27, 0.0 }
 0x114   :  { %v2683_v50 = vpack.c.bf16 %v1052_v22, %v1048_v39  ;;  %v1050_v49 = vsel %vm794_vm2, %v3896_v18, %v922_v43  ;;  %v1054_v42 = vsel %vm798_vm3, %v3888_v20, %v926_v7  ;;  %v919_v16 = vmul.f32 0.01, %v3890_v26  ;;  %v224_v47 = vpop.permute.xlu1 %223 }
 0x115   :  { %v2747_v55 = vpack.c.bf16 %v1054_v42, %v1050_v49  ;;  %v923_v36 = vmul.f32 0.01, %v3882_v27  ;;  %vm793_vm6 = vcmp.gt.f32.partialorder %v3894_v5, 0.0  ;;  %vm797_vm7 = vcmp.gt.f32.partialorder %v3886_v30, 0.0  ;;  %v219_v31 = vpop.permute.xlu0 %218 }
 0x116   :  { %2684 = vmatprep.subr.bf16.mxu0 %v2683_v50  ;;  %v1047_v3 = vsel %vm791_vm4, %v3890_v26, %v919_v16  ;;  %v921_v37 = vmul.f32 0.01, %v3894_v5  ;;  %v925_v40 = vmul.f32 0.01, %v3886_v30  ;;  %v363_v18 = vmul.f32 %v3087_v8, %v214_v60 }
 0x117   :  { %2748 = vmatprep.subr.bf16.mxu1 %v2747_v55  ;;  %v1051_v20 = vsel %vm795_vm5, %v3882_v27, %v923_v36  ;;  %v364_v23 = vmul.f32 %v3091_v10, %v214_v60  ;;  %v365_v21 = vmul.f32 %v3089_v9, %v214_v60  ;;  %v366_v58 = vmul.f32 %v3099_v13, %v214_v60 }
 0x118   :  { %v2685_v26 = vpack.c.bf16 %v1051_v20, %v1047_v3  ;;  %v1049_v48 = vsel %vm793_vm6, %v3894_v5, %v921_v37  ;;  %v1053_v6 = vsel %vm797_vm7, %v3886_v30, %v925_v40  ;;  %v359_v15 = vmul.f32 %v3087_v8, %v209_v63  ;;  %v565_v50 = vpop.permute.xlu1 %564 }
 0x119   :  { %v2749_v38 = vpack.c.bf16 %v1053_v6, %v1049_v48  ;;  %v360_v4 = vmul.f32 %v3091_v10, %v209_v63  ;;  %v361_v53 = vmul.f32 %v3089_v9, %v209_v63  ;;  %v362_v27 = vmul.f32 %v3099_v13, %v209_v63  ;;  %v560_v55 = vpop.permute.xlu0 %559 }
 0x11a   :  { %2686 = vmatpush1.bf16.msra.mxu0 %v2685_v26  ;;  %v3982_v56 = vadd.f32 %v555_v29, %v363_v18  ;;  %v3984_v54 = vadd.f32 %v555_v29, %v364_v23  ;;  %v3986_v44 = vadd.f32 %v555_v29, %v365_v21  ;;  %v3988_v12 = vadd.f32 %v555_v29, %v366_v58 }
 0x11b   :  { %2750 = vmatpush1.bf16.msra.mxu1 %v2749_v38  ;;  %v3990_v30 = vadd.f32 %v550_v35, %v359_v15  ;;  %v3992_v5 = vadd.f32 %v550_v35, %v360_v4  ;;  %v3994_v14 = vadd.f32 %v550_v35, %v361_v53  ;;  %v3996_v17 = vadd.f32 %v550_v35, %v362_v27 }
 0x11c   :  { %vm800_vm8 = vcmp.gt.f32.partialorder %v3942_v34, 0.0  ;;  %vm804_vm9 = vcmp.gt.f32.partialorder %v3934_v32, 0.0  ;;  %v928_v1 = vmul.f32 0.01, %v3942_v34  ;;  %v932_v45 = vmul.f32 0.01, %v3934_v32 }
 0x11d   :  { %vm802_vm10 = vcmp.gt.f32.partialorder %v3946_v0, 0.0  ;;  %vm806_vm11 = vcmp.gt.f32.partialorder %v3938_v25, 0.0  ;;  %v930_v24 = vmul.f32 0.01, %v3946_v0  ;;  %v934_v46 = vmul.f32 0.01, %v3938_v25 }
 0x11e   :  { %v1056_v11 = vsel %vm800_vm8, %v3942_v34, %v928_v1  ;;  %v1060_v57 = vsel %vm804_vm9, %v3934_v32, %v932_v45  ;;  %vm799_vm12 = vcmp.gt.f32.partialorder %v3940_v52, 0.0  ;;  %vm803_vm13 = vcmp.gt.f32.partialorder %v3932_v61, 0.0 }
 0x11f   :  { %v2687_v19 = vpack.c.bf16 %v1060_v57, %v1056_v11  ;;  %v1058_v51 = vsel %vm802_vm10, %v3946_v0, %v930_v24  ;;  %v1062_v60 = vsel %vm806_vm11, %v3938_v25, %v934_v46  ;;  %v927_v41 = vmul.f32 0.01, %v3940_v52 }
 0x120   :  { %v2751_v2 = vpack.c.bf16 %v1062_v60, %v1058_v51  ;;  %v931_v63 = vmul.f32 0.01, %v3932_v61  ;;  %vm801_vm14 = vcmp.gt.f32.partialorder %v3944_v33, 0.0  ;;  %vm805_vm15 = vcmp.gt.f32.partialorder %v3936_v28, 0.0 }
 0x121   :  { %2688 = vmatprep.subr.bf16.mxu0 %v2687_v19  ;;  %v1055_v32 = vsel %vm799_vm12, %v3940_v52, %v927_v41  ;;  %v929_v34 = vmul.f32 0.01, %v3944_v33  ;;  %v933_v43 = vmul.f32 0.01, %v3936_v28  ;;  %v371_v0 = vmul.f32 %v3087_v8, %v224_v47 }
 0x122   :  { %2752 = vmatprep.subr.bf16.mxu1 %v2751_v2  ;;  %v1059_v25 = vsel %vm803_vm13, %v3932_v61, %v931_v63  ;;  %v372_v7 = vmul.f32 %v3091_v10, %v224_v47  ;;  %v373_v39 = vmul.f32 %v3089_v9, %v224_v47  ;;  %v374_v22 = vmul.f32 %v3099_v13, %v224_v47 }
 0x123   :  { %v2689_v49 = vpack.c.bf16 %v1059_v25, %v1055_v32  ;;  %v1057_v42 = vsel %vm801_vm14, %v3944_v33, %v929_v34  ;;  %v1061_v52 = vsel %vm805_vm15, %v3936_v28, %v933_v43  ;;  %v367_v16 = vmul.f32 %v3087_v8, %v219_v31  ;;  %v1079_v25 = vld [vmem:[%s4636_s3] sm:$0xff] }
 0x124   :  { %v2753_v36 = vpack.c.bf16 %v1061_v52, %v1057_v42  ;;  %v368_v3 = vmul.f32 %v3091_v10, %v219_v31  ;;  %v369_v61 = vmul.f32 %v3089_v9, %v219_v31  ;;  %v370_v37 = vmul.f32 %v3099_v13, %v219_v31  ;;  %v1085_v42 = vld [vmem:[%s4636_s3 + $0x30] sm:$0xff]  ;;  %v1088_v52 = vld [vmem:[%s4636_s3 + $0x48] sm:$0xff] }
 0x125   :  { %2690 = vmatpush1.bf16.msra.mxu0 %v2689_v49  ;;  %v4030_v40 = vadd.f32 %v565_v50, %v371_v0  ;;  %v692_v18 = vadd.f32 %v565_v50, %v372_v7  ;;  %v4032_v29 = vadd.f32 %v565_v50, %v373_v39  ;;  %v694_v20 = vadd.f32 %v565_v50, %v374_v22  ;;  %v1082_v7 = vld [vmem:[%s4636_s3 + $0x18] sm:$0xff]  ;;  %v1081_v39 = vld [vmem:[%s4636_s3 + $0x10] sm:$0xff]  ;;  %v1084_v22 = vld [vmem:[%s4636_s3 + $0x28] sm:$0xff] }
 0x126   :  { %2754 = vmatpush1.bf16.msra.mxu1 %v2753_v36  ;;  %v687_v33 = vadd.f32 %v560_v55, %v367_v16  ;;  %v688_v28 = vadd.f32 %v560_v55, %v368_v3  ;;  %v689_v23 = vadd.f32 %v560_v55, %v369_v61  ;;  %v690_v8 = vadd.f32 %v560_v55, %v370_v37  ;;  %v1083_v50 = vld [vmem:[%s4636_s3 + $0x20] sm:$0xff]  ;;  %v1086_v49 = vld [vmem:[%s4636_s3 + $0x38] sm:$0xff]  ;;  %v1089_v36 = vld [vmem:[%s4636_s3 + $0x50] sm:$0xff] }
 0x127   :  { %vm808_vm0 = vcmp.gt.f32.partialorder %v3992_v5, 0.0  ;;  %vm812_vm1 = vcmp.gt.f32.partialorder %v3984_v54, 0.0  ;;  %v936_v9 = vmul.f32 0.01, %v3992_v5  ;;  %v940_v10 = vmul.f32 0.01, %v3984_v54 }
 0x128   :  { %vm810_vm2 = vcmp.gt.f32.partialorder %v3996_v17, 0.0  ;;  %vm814_vm3 = vcmp.gt.f32.partialorder %v3988_v12, 0.0  ;;  %v938_v13 = vmul.f32 0.01, %v3996_v17  ;;  %v942_v21 = vmul.f32 0.01, %v3988_v12 }
 0x129   :  { %v1064_v58 = vsel %vm808_vm0, %v3992_v5, %v936_v9  ;;  %v1068_v35 = vsel %vm812_vm1, %v3984_v54, %v940_v10  ;;  %vm807_vm4 = vcmp.gt.f32.partialorder %v3990_v30, 0.0  ;;  %vm811_vm5 = vcmp.gt.f32.partialorder %v3982_v56, 0.0  ;;  %v1087_v16 = vld [vmem:[%s4636_s3 + $0x40] sm:$0xff]  ;;  %v1090_v55 = vld [vmem:[%s4636_s3 + $0x58] sm:$0xff]  ;;  %v1092_v3 = vld [vmem:[%s4636_s3 + $0x68] sm:$0xff] }
 0x12a   :  { %v2691_v26 = vpack.c.bf16 %v1068_v35, %v1064_v58  ;;  %v1066_v48 = vsel %vm810_vm2, %v3996_v17, %v938_v13  ;;  %v1070_v6 = vsel %vm814_vm3, %v3988_v12, %v942_v21  ;;  %v935_v15 = vmul.f32 0.01, %v3990_v30  ;;  %v1091_v61 = vld [vmem:[%s4636_s3 + $0x60] sm:$0xff]  ;;  %v1094_v37 = vld [vmem:[%s4636_s3 + $0x78] sm:$0xff]  ;;  %v1101_v9 = vld [vmem:[%s4636_s3 + $0xb0] sm:$0xff] }
 0x12b   :  { %v2755_v38 = vpack.c.bf16 %v1070_v6, %v1066_v48  ;;  %v939_v4 = vmul.f32 0.01, %v3982_v56  ;;  %vm809_vm6 = vcmp.gt.f32.partialorder %v3994_v14, 0.0  ;;  %vm813_vm7 = vcmp.gt.f32.partialorder %v3986_v44, 0.0  ;;  %v1104_v10 = vld [vmem:[%s4636_s3 + $0xc8] sm:$0xff]  ;;  %v1103_v13 = vld [vmem:[%s4636_s3 + $0xc0] sm:$0xff] }
 0x12c   :  { %2692 = vmatprep.subr.bf16.mxu0 %v2691_v26  ;;  %v1063_v53 = vsel %vm807_vm4, %v3990_v30, %v935_v15  ;;  %v937_v27 = vmul.f32 0.01, %v3994_v14  ;;  %v941_v54 = vmul.f32 0.01, %v3986_v44  ;;  %vm816_vm8 = vcmp.gt.f32.partialorder %v688_v28, 0.0  ;;  %v1106_v21 = vld [vmem:[%s4636_s3 + $0xd8] sm:$0xff] }
 0x12d   :  { %2756 = vmatprep.subr.bf16.mxu1 %v2755_v38  ;;  %v1067_v12 = vsel %vm811_vm5, %v3982_v56, %v939_v4  ;;  %vm820_vm9 = vcmp.gt.f32.partialorder %v692_v18, 0.0  ;;  %v944_v5 = vmul.f32 0.01, %v688_v28  ;;  %v948_v17 = vmul.f32 0.01, %v692_v18  ;;  %v1105_v58 = vld [vmem:[%s4636_s3 + $0xd0] sm:$0xff]  ;;  %v1130_v38 = vpop.permute.xlu0 %1129 }
 0x12e   :  { %v2693_v1 = vpack.c.bf16 %v1067_v12, %v1063_v53  ;;  %v1065_v45 = vsel %vm809_vm6, %v3994_v14, %v937_v27  ;;  %v1069_v47 = vsel %vm813_vm7, %v3986_v44, %v941_v54  ;;  %vm818_vm10 = vcmp.gt.f32.partialorder %v690_v8, 0.0  ;;  %v1108_v35 = vld [vmem:[%s4636_s3 + $0xe8] sm:$0xff]  ;;  %v1107_v26 = vld [vmem:[%s4636_s3 + $0xe0] sm:$0xff]  ;;  %v1110_v48 = vld [vmem:[%s4636_s3 + $0xf8] sm:$0xff] }
 0x12f   :  { %v2757_v24 = vpack.c.bf16 %v1069_v47, %v1065_v45  ;;  %v1072_v46 = vsel %vm816_vm8, %v688_v28, %v944_v5  ;;  %v1076_v30 = vsel %vm820_vm9, %v692_v18, %v948_v17  ;;  %vm822_vm11 = vcmp.gt.f32.partialorder %v694_v20, 0.0  ;;  %v1096_v18 = vld [vmem:[%s4636_s3 + $0x88] sm:$0xff]  ;;  %v1109_v6 = vld [vmem:[%s4636_s3 + $0xf0] sm:$0xff]  ;;  %v1135_v45 = vpop.permute.xlu1 %1134 }
 0x130   :  { %2694 = vmatpush1.bf16.msra.mxu0 %v2693_v1  ;;  %v2695_v31 = vpack.c.bf16 %v1076_v30, %v1072_v46  ;;  %v946_v11 = vmul.f32 0.01, %v690_v8  ;;  %v950_v57 = vmul.f32 0.01, %v694_v20  ;;  %vm815_vm12 = vcmp.gt.f32.partialorder %v687_v33, 0.0  ;;  %v1100_v28 = vld [vmem:[%s4636_s3 + $0xa8] sm:$0xff] }
 0x131   :  { %2758 = vmatpush1.bf16.msra.mxu1 %v2757_v24  ;;  %vm819_vm13 = vcmp.gt.f32.partialorder %v4030_v40, 0.0  ;;  %v943_v56 = vmul.f32 0.01, %v687_v33  ;;  %v947_v19 = vmul.f32 0.01, %v4030_v40  ;;  %vm817_vm14 = vcmp.gt.f32.partialorder %v689_v23, 0.0 }
 0x132   :  { %2696 = vmatprep.subr.bf16.mxu0 %v2695_v31  ;;  %v1074_v44 = vsel %vm818_vm10, %v690_v8, %v946_v11  ;;  %v1078_v14 = vsel %vm822_vm11, %v694_v20, %v950_v57  ;;  %vm821_vm15 = vcmp.gt.f32.partialorder %v4032_v29, 0.0  ;;  %v945_v51 = vmul.f32 0.01, %v689_v23  ;;  %v1098_v20 = vld [vmem:[%s4636_s3 + $0x98] sm:$0xff] }
 0x133   :  { %v2759_v60 = vpack.c.bf16 %v1078_v14, %v1074_v44  ;;  %v1071_v41 = vsel %vm815_vm12, %v687_v33, %v943_v56  ;;  %v1075_v2 = vsel %vm819_vm13, %v4030_v40, %v947_v19  ;;  %v949_v63 = vmul.f32 0.01, %v4032_v29  ;;  %v1093_v40 = vld [vmem:[%s4636_s3 + $0x70] sm:$0xff]  ;;  %v1102_v8 = vld [vmem:[%s4636_s3 + $0xb8] sm:$0xff] }
 0x134   :  { %v2697_v32 = vpack.c.bf16 %v1075_v2, %v1071_v41  ;;  %v1073_v34 = vsel %vm817_vm14, %v689_v23, %v945_v51  ;;  %v1097_v33 = vld [vmem:[%s4636_s3 + $0x90] sm:$0xff]  ;;  %v1099_v23 = vld [vmem:[%s4636_s3 + $0xa0] sm:$0xff]  ;;  %v2833_v15 = vmov 0.0  }
 0x135   :  { %2760 = vmatprep.subr.bf16.mxu1 %v2759_v60  ;;  %v1077_v43 = vsel %vm821_vm15, %v4032_v29, %v949_v63  ;;  %v1095_v29 = vld [vmem:[%s4636_s3 + $0x80] sm:$0xff]  ;;  %v1140_v60 = vpop.permute.xlu0 %1139 }
 0x136   :  { %2698 = vmatpush1.bf16.msra.mxu0 %v2697_v32  ;;  %v2761_v0 = vpack.c.bf16 %v1077_v43, %v1073_v34 }
 0x138   :  { %2762 = vmatpush1.bf16.msra.mxu1 %v2761_v0 }
 0x139   :  { %1272 = vmatmul.mubr.f32.vlgmr.msra.gmra.mrb[0].mxu0 %v1079_v25 }
 0x13a   :  { %1277 = vmatprep.mubr.f32.mxu0 %v1082_v7 }
 0x13b   :  { %1433 = vmatmul.mubr.f32.vlgmr.msra.gmra.mrb[0].mxu1 %v1079_v25 }
 0x13c   :  { %1438 = vmatprep.mubr.f32.mxu1 %v1082_v7 }
 0x13d   :  { %1278 = vmatmul.mubr.f32.gmra.mrb[2].mxu0 %v1081_v39 }
 0x13e   :  { %1283 = vmatprep.mubr.f32.mxu0 %v1084_v22 }
 0x13f   :  { %1439 = vmatmul.mubr.f32.gmra.mrb[2].mxu1 %v1081_v39 }
 0x140   :  { %1444 = vmatprep.mubr.f32.mxu1 %v1084_v22 }
 0x141   :  { %1284 = vmatmul.mubr.f32.gmra.mrb[4].mxu0 %v1083_v50 }
 0x142   :  { %1289 = vmatprep.mubr.f32.mxu0 %v1086_v49 }
 0x143   :  { %1445 = vmatmul.mubr.f32.gmra.mrb[4].mxu1 %v1083_v50 }
 0x144   :  { %1450 = vmatprep.mubr.f32.mxu1 %v1086_v49 }
 0x145   :  { %1290 = vmatmul.mubr.f32.gmra.mrb[6].mxu0 %v1085_v42 }
 0x146   :  { %1295 = vmatprep.mubr.f32.mxu0 %v1088_v52 }
 0x147   :  { %1451 = vmatmul.mubr.f32.gmra.mrb[6].mxu1 %v1085_v42 }
 0x148   :  { %1456 = vmatprep.mubr.f32.mxu1 %v1088_v52 }
 0x149   :  { %1296 = vmatmul.mubr.f32.gmra.mrb[8].mxu0 %v1087_v16 }
 0x14a   :  { %1301 = vmatprep.mubr.f32.mxu0 %v1090_v55 }
 0x14b   :  { %1457 = vmatmul.mubr.f32.gmra.mrb[8].mxu1 %v1087_v16 }
 0x14c   :  { %1462 = vmatprep.mubr.f32.mxu1 %v1090_v55  ;;  %v1145_v55 = vpop.permute.xlu1 %1144 }
 0x14d   :  { %1302 = vmatmul.mubr.f32.gmra.mrb[10].mxu0 %v1089_v36 }
 0x14e   :  { %1307 = vmatprep.mubr.f32.mxu0 %v1092_v3 }
 0x14f   :  { %1463 = vmatmul.mubr.f32.gmra.mrb[10].mxu1 %v1089_v36 }
 0x150   :  { %1468 = vmatprep.mubr.f32.mxu1 %v1092_v3 }
 0x151   :  { %1308 = vmatmul.mubr.f32.gmra.mrb[12].mxu0 %v1091_v61 }
 0x152   :  { %1313 = vmatprep.mubr.f32.mxu0 %v1094_v37 }
 0x153   :  { %1469 = vmatmul.mubr.f32.gmra.mrb[12].mxu1 %v1091_v61 }
 0x154   :  { %1474 = vmatprep.mubr.f32.mxu1 %v1094_v37 }
 0x155   :  { %1314 = vmatmul.mubr.f32.gmra.mrb[14].mxu0 %v1093_v40 }
 0x156   :  { %1319 = vmatprep.mubr.f32.mxu0 %v1096_v18 }
 0x157   :  { %1475 = vmatmul.mubr.f32.gmra.mrb[14].mxu1 %v1093_v40 }
 0x158   :  { %1480 = vmatprep.mubr.f32.mxu1 %v1096_v18 }
 0x159   :  { %1320 = vmatmul.mubr.f32.gmra.mrb[16].mxu0 %v1095_v29 }
 0x15a   :  { %1325 = vmatprep.mubr.f32.mxu0 %v1098_v20 }
 0x15b   :  { %1481 = vmatmul.mubr.f32.gmra.mrb[16].mxu1 %v1095_v29 }
 0x15c   :  { %1486 = vmatprep.mubr.f32.mxu1 %v1098_v20 }
 0x15d   :  { %1326 = vmatmul.mubr.f32.gmra.mrb[18].mxu0 %v1097_v33 }
 0x15e   :  { %1331 = vmatprep.mubr.f32.mxu0 %v1100_v28 }
 0x15f   :  { %1487 = vmatmul.mubr.f32.gmra.mrb[18].mxu1 %v1097_v33 }
 0x160   :  { %1492 = vmatprep.mubr.f32.mxu1 %v1100_v28 }
 0x161   :  { %1332 = vmatmul.mubr.f32.gmra.mrb[20].mxu0 %v1099_v23 }
 0x162   :  { %1337 = vmatprep.mubr.f32.mxu0 %v1102_v8 }
 0x163   :  { %1493 = vmatmul.mubr.f32.gmra.mrb[20].mxu1 %v1099_v23 }
 0x164   :  { %1498 = vmatprep.mubr.f32.mxu1 %v1102_v8 }
 0x165   :  { %1338 = vmatmul.mubr.f32.gmra.mrb[22].mxu0 %v1101_v9 }
 0x166   :  { %1343 = vmatprep.mubr.f32.mxu0 %v1104_v10 }
 0x167   :  { %1499 = vmatmul.mubr.f32.gmra.mrb[22].mxu1 %v1101_v9 }
 0x168   :  { %1504 = vmatprep.mubr.f32.mxu1 %v1104_v10 }
 0x169   :  { %1344 = vmatmul.mubr.f32.gmra.mrb[24].mxu0 %v1103_v13 }
 0x16a   :  { %1349 = vmatprep.mubr.f32.mxu0 %v1106_v21 }
 0x16b   :  { %1505 = vmatmul.mubr.f32.gmra.mrb[24].mxu1 %v1103_v13 }
 0x16c   :  { %1510 = vmatprep.mubr.f32.mxu1 %v1106_v21 }
 0x16d   :  { %1350 = vmatmul.mubr.f32.gmra.mrb[26].mxu0 %v1105_v58 }
 0x16e   :  { %1355 = vmatprep.mubr.f32.mxu0 %v1108_v35 }
 0x16f   :  { %1511 = vmatmul.mubr.f32.gmra.mrb[26].mxu1 %v1105_v58 }
 0x170   :  { %1516 = vmatprep.mubr.f32.mxu1 %v1108_v35 }
 0x171   :  { %1356 = vmatmul.mubr.f32.gmra.mrb[28].mxu0 %v1107_v26 }
 0x172   :  { %1361 = vmatprep.mubr.f32.mxu0 %v1110_v48 }
 0x173   :  { %1517 = vmatmul.mubr.f32.gmra.mrb[28].mxu1 %v1107_v26 }
 0x174   :  { %1522 = vmatprep.mubr.f32.mxu1 %v1110_v48 }
 0x175   :  { %1362 = vmatmul.mubr.f32.gmra.mrb[30].mxu0 %v1109_v6 }
 0x176   :  { %1897 = vmatprep.mubr.f32.mxu0 %v2833_v15 }
 0x177   :  { %1523 = vmatmul.mubr.f32.gmra.mrb[30].mxu1 %v1109_v6 }
 0x178   :  { %2058 = vmatprep.mubr.f32.mxu1 %v2833_v15 }
 0x20c   :  { %v1273_v4 = vpop.f32.mrb[0].mxu0 }
 0x20d   :  { %v1274_v53 = vadd.f32 %v1273_v4, %v1130_v38  ;;  %v1275_v27 = vpop.f32.mrb[1].mxu0 }
 0x20e   :  { %v1434_v54 = vpop.f32.mrb[0].mxu1  ;;  %v1276_v12 = vadd.f32 %v1275_v27, %v1130_v38  ;;  %v1150_v27 = vpop.permute.xlu0 %1149 }
 0x20f   :  { %v1593_v5 = vmul.f32 0.01, %v1274_v53  ;;  %v1435_v17 = vadd.f32 %v1434_v54, %v1130_v38  ;;  %v1436_v1 = vpop.f32.mrb[1].mxu1  ;;  %vm1529_vm0 = vcmp.gt.f32.partialorder %v1274_v53, 0.0 }
 0x210   :  { %v1437_v47 = vadd.f32 %v1436_v1, %v1130_v38  ;;  %v1279_v24 = vpop.f32.mrb[2].mxu0  ;;  %vm1530_vm2 = vcmp.gt.f32.partialorder %v1276_v12, 0.0  ;;  %v1594_v11 = vmul.f32 0.01, %v1276_v12 }
 0x211   :  { %vm1531_vm1 = vcmp.gt.f32.partialorder %v1435_v17, 0.0  ;;  %v1595_v46 = vmul.f32 0.01, %v1435_v17  ;;  %v1280_v30 = vadd.f32 %v1279_v24, %v1135_v45  ;;  %v1281_v31 = vpop.f32.mrb[3].mxu0  ;;  %v4160_v19 = vsel %vm1529_vm0, %v1274_v53, %v1593_v5 }
 0x212   :  { %v1440_v57 = vpop.f32.mrb[2].mxu1  ;;  %v1282_v56 = vadd.f32 %v1281_v31, %v1135_v45  ;;  %vm1532_vm4 = vcmp.gt.f32.partialorder %v1437_v47, 0.0  ;;  %v1596_v2 = vmul.f32 0.01, %v1437_v47  ;;  %v1658_v61 = vsel %vm1530_vm2, %v1276_v12, %v1594_v11 }
 0x213   :  { %vm1533_vm3 = vcmp.gt.f32.partialorder %v1280_v30, 0.0  ;;  %v1597_v44 = vmul.f32 0.01, %v1280_v30  ;;  %v1441_v14 = vadd.f32 %v1440_v57, %v1135_v45  ;;  %v1442_v51 = vpop.f32.mrb[3].mxu1  ;;  %v4162_v41 = vsel %vm1531_vm1, %v1435_v17, %v1595_v46 }
 0x214   :  { %v1443_v63 = vadd.f32 %v1442_v51, %v1135_v45  ;;  %v1285_v32 = vpop.f32.mrb[4].mxu0  ;;  %vm1534_vm6 = vcmp.gt.f32.partialorder %v1282_v56, 0.0  ;;  %v1598_v39 = vmul.f32 0.01, %v1282_v56  ;;  %v1660_v37 = vsel %vm1532_vm4, %v1437_v47, %v1596_v2 }
 0x215   :  { %v1661_v34 = vsel %vm1533_vm3, %v1280_v30, %v1597_v44  ;;  %vm1535_vm5 = vcmp.gt.f32.partialorder %v1441_v14, 0.0  ;;  %v1599_v43 = vmul.f32 0.01, %v1441_v14  ;;  %v1286_v0 = vadd.f32 %v1285_v32, %v1140_v60  ;;  %v1287_v25 = vpop.f32.mrb[5].mxu0  ;;  %v1155_v44 = vpop.permute.xlu1 %1154 }
 0x216   :  { %v2765_v7 = vpack.c.bf16 %v1661_v34, %v4160_v19  ;;  %v1446_v22 = vpop.f32.mrb[4].mxu1  ;;  %v4165_v50 = vadd.f32 %v1287_v25, %v1140_v60  ;;  %vm1536_vm8 = vcmp.gt.f32.partialorder %v1443_v63, 0.0  ;;  %v1600_v40 = vmul.f32 0.01, %v1443_v63 }
 0x217   :  { %v1663_v49 = vsel %vm1535_vm5, %v1441_v14, %v1599_v43  ;;  %vm1537_vm7 = vcmp.gt.f32.partialorder %v1286_v0, 0.0  ;;  %v1601_v42 = vmul.f32 0.01, %v1286_v0  ;;  %v1447_v52 = vadd.f32 %v1446_v22, %v1140_v60  ;;  %v1448_v16 = vpop.f32.mrb[5].mxu1 }
 0x218   :  { %v2797_v36 = vpack.c.bf16 %v1663_v49, %v4162_v41  ;;  %v1291_v3 = vpop.f32.mrb[6].mxu0  ;;  %vm1538_vm9 = vcmp.gt.f32.partialorder %v4165_v50, 0.0  ;;  %v1449_v18 = vadd.f32 %v1448_v16, %v1140_v60  ;;  %v1662_v8 = vsel %vm1534_vm6, %v1282_v56, %v1598_v39 }
 0x219   :  { %v1292_v29 = vadd.f32 %v1291_v3, %v1145_v55  ;;  %v1293_v20 = vpop.f32.mrb[7].mxu0  ;;  %v4171_v33 = vsel %vm1537_vm7, %v1286_v0, %v1601_v42  ;;  %vm1539_vm10 = vcmp.gt.f32.partialorder %v1447_v52, 0.0  ;;  %v1603_v9 = vmul.f32 0.01, %v1447_v52 }
 0x21a   :  { %v1452_v28 = vpop.f32.mrb[6].mxu1  ;;  %v1294_v23 = vadd.f32 %v1293_v20, %v1145_v55  ;;  %v2763_v26 = vpack.c.bf16 %v1662_v8, %v1658_v61  ;;  %v1664_v4 = vsel %vm1536_vm8, %v1443_v63, %v1600_v40  ;;  %v1602_v54 = vmul.f32 0.01, %v4165_v50 }
 0x21b   :  { %vm1541_vm11 = vcmp.gt.f32.partialorder %v1292_v29, 0.0  ;;  %v1605_v10 = vmul.f32 0.01, %v1292_v29  ;;  %v1453_v13 = vadd.f32 %v1452_v28, %v1145_v55  ;;  %v1454_v21 = vpop.f32.mrb[7].mxu1  ;;  %v1604_v12 = vmul.f32 0.01, %v1449_v18 }
 0x21c   :  { %vm1542_vm12 = vcmp.gt.f32.partialorder %v1294_v23, 0.0  ;;  %v1606_v58 = vmul.f32 0.01, %v1294_v23  ;;  %v1455_v35 = vadd.f32 %v1454_v21, %v1145_v55  ;;  %v1297_v48 = vpop.f32.mrb[8].mxu0  ;;  %2764 = vmatprep.subr.bf16.mxu0 %v2763_v26  ;;  %v2795_v17 = vpack.c.bf16 %v1664_v4, %v1660_v37 }
 0x21d   :  { %v1669_v6 = vsel %vm1541_vm11, %v1292_v29, %v1605_v10  ;;  %vm1543_vm13 = vcmp.gt.f32.partialorder %v1453_v13, 0.0  ;;  %v1607_v38 = vmul.f32 0.01, %v1453_v13  ;;  %v1299_v53 = vpop.f32.mrb[9].mxu0  ;;  %v1667_v45 = vsel %vm1539_vm10, %v1447_v52, %v1603_v9  ;;  %2766 = vmatpush1.bf16.msra.mxu0 %v2765_v7  ;;  %v1160_v52 = vpop.permute.xlu0 %1159 }
 0x21e   :  { %v2769_v5 = vpack.c.bf16 %v1669_v6, %v4171_v33  ;;  %v1458_v1 = vpop.f32.mrb[8].mxu1  ;;  %v1298_v24 = vadd.f32 %v1297_v48, %v1150_v27  ;;  %v1608_v11 = vmul.f32 0.01, %v1455_v35  ;;  %2796 = vmatprep.subr.bf16.mxu1 %v2795_v17  ;;  %v4178_v57 = vadd.f32 %v1299_v53, %v1150_v27 }
 0x21f   :  { %v1671_v47 = vsel %vm1543_vm13, %v1453_v13, %v1607_v38  ;;  %v1459_v46 = vadd.f32 %v1458_v1, %v1150_v27  ;;  %v1460_v30 = vpop.f32.mrb[9].mxu1  ;;  %v1670_v19 = vsel %vm1542_vm12, %v1294_v23, %v1606_v58  ;;  %vm1540_vm14 = vcmp.gt.f32.partialorder %v1449_v18, 0.0  ;;  %2798 = vmatpush1.bf16.msra.mxu1 %v2797_v36  ;;  %v1165_v58 = vpop.permute.xlu1 %1164 }
 0x220   :  { %v2801_v31 = vpack.c.bf16 %v1671_v47, %v1667_v45  ;;  %v1303_v56 = vpop.f32.mrb[10].mxu0  ;;  %vm1544_vm15 = vcmp.gt.f32.partialorder %v1455_v35, 0.0  ;;  %vm1545_vm0 = vcmp.gt.f32.partialorder %v1298_v24, 0.0  ;;  %v1609_v14 = vmul.f32 0.01, %v1298_v24 }
 0x221   :  { %v4181_v51 = vadd.f32 %v1460_v30, %v1150_v27  ;;  %v1666_v60 = vsel %vm1538_vm9, %v4165_v50, %v1602_v54  ;;  %vm1547_vm1 = vcmp.gt.f32.partialorder %v1459_v46, 0.0  ;;  %v1611_v41 = vmul.f32 0.01, %v1459_v46  ;;  %v1305_v32 = vpop.f32.mrb[11].mxu0 }
 0x222   :  { %v1304_v2 = vadd.f32 %v1303_v56, %v1155_v44  ;;  %v1464_v63 = vpop.f32.mrb[10].mxu1  ;;  %v2767_v34 = vpack.c.bf16 %v1670_v19, %v1666_v60  ;;  %vm1546_vm2 = vcmp.gt.f32.partialorder %v4178_v57, 0.0  ;;  %v1668_v25 = vsel %vm1540_vm14, %v1449_v18, %v1604_v12 }
 0x223   :  { %v1465_v43 = vadd.f32 %v1464_v63, %v1155_v44  ;;  %v1466_v0 = vpop.f32.mrb[11].mxu1  ;;  %v1672_v7 = vsel %vm1544_vm15, %v1455_v35, %v1608_v11  ;;  %v1306_v49 = vadd.f32 %v1305_v32, %v1155_v44  ;;  %v4190_v16 = vsel %vm1545_vm0, %v1298_v24, %v1609_v14 }
 0x224   :  { %v1309_v39 = vpop.f32.mrb[12].mxu0  ;;  %vm1549_vm3 = vcmp.gt.f32.partialorder %v1304_v2, 0.0  ;;  %v1613_v22 = vmul.f32 0.01, %v1304_v2  ;;  %2768 = vmatprep.subr.bf16.mxu0 %v2767_v34  ;;  %v2799_v50 = vpack.c.bf16 %v1672_v7, %v1668_v25  ;;  %v1610_v55 = vmul.f32 0.01, %v4178_v57  ;;  %v1175_v34 = vpop.permute.xlu1 %1174 }
 0x225   :  { %v1311_v42 = vpop.f32.mrb[13].mxu0  ;;  %vm1551_vm4 = vcmp.gt.f32.partialorder %v1465_v43, 0.0  ;;  %v1615_v36 = vmul.f32 0.01, %v1465_v43  ;;  %2770 = vmatpush1.bf16.msra.mxu0 %v2769_v5  ;;  %v4194_v3 = vsel %vm1547_vm1, %v1459_v46, %v1611_v41  ;;  %v1467_v37 = vadd.f32 %v1466_v0, %v1155_v44 }
 0x226   :  { %v4196_v61 = vsel %vm1549_vm3, %v1304_v2, %v1613_v22  ;;  %2800 = vmatprep.subr.bf16.mxu1 %v2799_v50  ;;  %v1310_v40 = vadd.f32 %v1309_v39, %v1160_v52  ;;  %v1470_v18 = vpop.f32.mrb[12].mxu1  ;;  %v4202_v28 = vadd.f32 %v1311_v42, %v1160_v52  ;;  %vm1548_vm5 = vcmp.gt.f32.partialorder %v4181_v51, 0.0 }
 0x227   :  { %v2773_v29 = vpack.c.bf16 %v4196_v61, %v4190_v16  ;;  %v4200_v20 = vsel %vm1551_vm4, %v1465_v43, %v1615_v36  ;;  %2802 = vmatpush1.bf16.msra.mxu1 %v2801_v31  ;;  %v1471_v33 = vadd.f32 %v1470_v18, %v1160_v52  ;;  %v1472_v23 = vpop.f32.mrb[13].mxu1  ;;  %v1614_v10 = vmul.f32 0.01, %v1306_v49  ;;  %v1170_v31 = vpop.permute.xlu0 %1169 }
 0x228   :  { %v1315_v8 = vpop.f32.mrb[14].mxu0  ;;  %v2805_v9 = vpack.c.bf16 %v4200_v20, %v4194_v3  ;;  %v1617_v13 = vmul.f32 0.01, %v1310_v40  ;;  %vm1550_vm6 = vcmp.gt.f32.partialorder %v1306_v49, 0.0  ;;  %vm1553_vm7 = vcmp.gt.f32.partialorder %v1310_v40, 0.0 }
 0x229   :  { %v1317_v21 = vpop.f32.mrb[15].mxu0  ;;  %v1619_v35 = vmul.f32 0.01, %v1471_v33  ;;  %v4207_v26 = vadd.f32 %v1472_v23, %v1160_v52  ;;  %v1612_v48 = vmul.f32 0.01, %v4181_v51  ;;  %vm1552_vm8 = vcmp.gt.f32.partialorder %v1467_v37, 0.0 }
 0x22a   :  { %vm1555_vm9 = vcmp.gt.f32.partialorder %v1471_v33, 0.0  ;;  %v1316_v6 = vadd.f32 %v1315_v8, %v1165_v58  ;;  %v1476_v38 = vpop.f32.mrb[14].mxu1  ;;  %v1616_v4 = vmul.f32 0.01, %v1467_v37  ;;  %v4211_v53 = vmul.f32 0.01, %v4202_v28 }
 0x22b   :  { %v1477_v27 = vadd.f32 %v1476_v38, %v1165_v58  ;;  %v4213_v54 = vadd.f32 %v1317_v21, %v1165_v58  ;;  %v1478_v12 = vpop.f32.mrb[15].mxu1  ;;  %v4215_v17 = vsel %vm1553_vm7, %v1310_v40, %v1617_v13  ;;  %vm1554_vm10 = vcmp.gt.f32.partialorder %v4202_v28, 0.0 }
 0x22c   :  { %v1321_v5 = vpop.f32.mrb[16].mxu0  ;;  %vm1557_vm11 = vcmp.gt.f32.partialorder %v1316_v6, 0.0  ;;  %v1621_v1 = vmul.f32 0.01, %v1316_v6  ;;  %v1678_v45 = vsel %vm1550_vm6, %v1306_v49, %v1614_v10  ;;  %v4219_v24 = vsel %vm1555_vm9, %v1471_v33, %v1619_v35 }
 0x22d   :  { %v1323_v47 = vpop.f32.mrb[17].mxu0  ;;  %vm1556_vm12 = vcmp.gt.f32.partialorder %v4207_v26, 0.0  ;;  %vm1559_vm13 = vcmp.gt.f32.partialorder %v1477_v27, 0.0  ;;  %v1623_v46 = vmul.f32 0.01, %v1477_v27  ;;  %v1674_v30 = vsel %vm1546_vm2, %v4178_v57, %v1610_v55 }
 0x22e   :  { %v4225_v11 = vsel %vm1557_vm11, %v1316_v6, %v1621_v1  ;;  %v1622_v56 = vmul.f32 0.01, %v4213_v54  ;;  %v1479_v19 = vadd.f32 %v1478_v12, %v1165_v58  ;;  %v2771_v44 = vpack.c.bf16 %v1678_v45, %v1674_v30  ;;  %v1482_v14 = vpop.f32.mrb[16].mxu1  ;;  %v1180_v58 = vpop.permute.xlu0 %1179 }
 0x22f   :  { %v2777_v60 = vpack.c.bf16 %v4225_v11, %v4215_v17  ;;  %v4230_v41 = vsel %vm1559_vm13, %v1477_v27, %v1623_v46  ;;  %v1676_v2 = vsel %vm1548_vm5, %v4181_v51, %v1612_v48  ;;  %v1680_v63 = vsel %vm1552_vm8, %v1467_v37, %v1616_v4  ;;  %v1484_v57 = vpop.f32.mrb[17].mxu1 }
 0x230   :  { %v1327_v32 = vpop.f32.mrb[18].mxu0  ;;  %v2809_v43 = vpack.c.bf16 %v4230_v41, %v4219_v24  ;;  %2772 = vmatprep.subr.bf16.mxu0 %v2771_v44  ;;  %v2803_v0 = vpack.c.bf16 %v1680_v63, %v1676_v2  ;;  %v1322_v25 = vadd.f32 %v1321_v5, %v1170_v31  ;;  %v1483_v7 = vadd.f32 %v1482_v14, %v1170_v31 }
 0x231   :  { %v1329_v39 = vpop.f32.mrb[19].mxu0  ;;  %2774 = vmatpush1.bf16.msra.mxu0 %v2773_v29  ;;  %v4238_v22 = vadd.f32 %v1323_v47, %v1170_v31  ;;  %v4240_v49 = vadd.f32 %v1484_v57, %v1170_v31  ;;  %v1328_v50 = vadd.f32 %v1327_v32, %v1175_v34  ;;  %v1620_v55 = vmul.f32 0.01, %v4207_v26 }
 0x232   :  { %v1488_v51 = vpop.f32.mrb[18].mxu1  ;;  %v4242_v42 = vadd.f32 %v1329_v39, %v1175_v34  ;;  %2804 = vmatprep.subr.bf16.mxu1 %v2803_v0  ;;  %vm1561_vm14 = vcmp.gt.f32.partialorder %v1322_v25, 0.0  ;;  %v1625_v52 = vmul.f32 0.01, %v1322_v25  ;;  %vm1563_vm15 = vcmp.gt.f32.partialorder %v1483_v7, 0.0 }
 0x233   :  { %v1627_v16 = vmul.f32 0.01, %v1483_v7  ;;  %vm1558_vm0 = vcmp.gt.f32.partialorder %v4213_v54, 0.0  ;;  %vm1560_vm1 = vcmp.gt.f32.partialorder %v1479_v19, 0.0  ;;  %v1624_v36 = vmul.f32 0.01, %v1479_v19  ;;  %2806 = vmatpush1.bf16.msra.mxu1 %v2805_v9 }
 0x234   :  { %vm1562_vm2 = vcmp.gt.f32.partialorder %v4238_v22, 0.0  ;;  %vm1565_vm3 = vcmp.gt.f32.partialorder %v1328_v50, 0.0  ;;  %v1629_v61 = vmul.f32 0.01, %v1328_v50  ;;  %v1490_v37 = vpop.f32.mrb[19].mxu1  ;;  %v1333_v40 = vpop.f32.mrb[20].mxu0  ;;  %v4250_v18 = vsel %vm1561_vm14, %v1322_v25, %v1625_v52 }
 0x235   :  { %v4252_v29 = vsel %vm1563_vm15, %v1483_v7, %v1627_v16  ;;  %v1626_v33 = vmul.f32 0.01, %v4238_v22  ;;  %v1489_v23 = vadd.f32 %v1488_v51, %v1175_v34  ;;  %v1335_v10 = vpop.f32.mrb[21].mxu0  ;;  %vm1564_vm4 = vcmp.gt.f32.partialorder %v4240_v49, 0.0  ;;  %v1190_v51 = vpop.permute.xlu0 %1189 }
 0x236   :  { %v1494_v8 = vpop.f32.mrb[20].mxu1  ;;  %v4256_v13 = vsel %vm1565_vm3, %v1328_v50, %v1629_v61  ;;  %v1630_v3 = vmul.f32 0.01, %v4242_v42  ;;  %v4259_v20 = vadd.f32 %v1490_v37, %v1175_v34  ;;  %v1686_v9 = vsel %vm1558_vm0, %v4213_v54, %v1622_v56  ;;  %v1185_v56 = vpop.permute.xlu1 %1184 }
 0x237   :  { %v1496_v21 = vpop.f32.mrb[21].mxu1  ;;  %v2781_v35 = vpack.c.bf16 %v4256_v13, %v4250_v18  ;;  %vm1567_vm5 = vcmp.gt.f32.partialorder %v1489_v23, 0.0  ;;  %v1631_v48 = vmul.f32 0.01, %v1489_v23  ;;  %v1682_v6 = vsel %vm1554_vm10, %v4202_v28, %v4211_v53 }
 0x238   :  { %v1339_v38 = vpop.f32.mrb[22].mxu0  ;;  %v2775_v4 = vpack.c.bf16 %v1686_v9, %v1682_v6  ;;  %v1684_v27 = vsel %vm1556_vm12, %v4207_v26, %v1620_v55  ;;  %v1688_v54 = vsel %vm1560_vm1, %v1479_v19, %v1624_v36  ;;  %v1334_v12 = vadd.f32 %v1333_v40, %v1180_v58 }
 0x239   :  { %v1341_v5 = vpop.f32.mrb[23].mxu0  ;;  %v4274_v1 = vsel %vm1567_vm5, %v1489_v23, %v1631_v48  ;;  %v2807_v45 = vpack.c.bf16 %v1688_v54, %v1684_v27  ;;  %v1495_v47 = vadd.f32 %v1494_v8, %v1180_v58  ;;  %v4276_v46 = vadd.f32 %v1335_v10, %v1180_v58 }
 0x23a   :  { %v1500_v30 = vpop.f32.mrb[22].mxu1  ;;  %v2813_v28 = vpack.c.bf16 %v4274_v1, %v4252_v29  ;;  %2776 = vmatprep.subr.bf16.mxu0 %v2775_v4  ;;  %vm1569_vm6 = vcmp.gt.f32.partialorder %v1334_v12, 0.0  ;;  %v1633_v53 = vmul.f32 0.01, %v1334_v12  ;;  %v4280_v31 = vadd.f32 %v1496_v21, %v1180_v58  ;;  %v1195_v8 = vpop.permute.xlu1 %1194 }
 0x23b   :  { %v1502_v26 = vpop.f32.mrb[23].mxu1  ;;  %v1628_v19 = vmul.f32 0.01, %v4240_v49  ;;  %vm1566_vm7 = vcmp.gt.f32.partialorder %v4242_v42, 0.0  ;;  %vm1568_vm8 = vcmp.gt.f32.partialorder %v4259_v20, 0.0  ;;  %2808 = vmatprep.subr.bf16.mxu1 %v2807_v45  ;;  %2778 = vmatpush1.bf16.msra.mxu0 %v2777_v60  ;;  %vm1571_vm9 = vcmp.gt.f32.partialorder %v1495_v47, 0.0 }
 0x23c   :  { %v1635_v44 = vmul.f32 0.01, %v1495_v47  ;;  %v1632_v14 = vmul.f32 0.01, %v4259_v20  ;;  %2810 = vmatpush1.bf16.msra.mxu1 %v2809_v43  ;;  %v4293_v2 = vmul.f32 0.01, %v4276_v46  ;;  %v1340_v63 = vadd.f32 %v1339_v38, %v1185_v56 }
 0x23d   :  { %v1345_v57 = vpop.f32.mrb[24].mxu0  ;;  %v4296_v32 = vsel %vm1569_vm6, %v1334_v12, %v1633_v53  ;;  %vm1570_vm10 = vcmp.gt.f32.partialorder %v4276_v46, 0.0  ;;  %v1501_v17 = vadd.f32 %v1500_v30, %v1185_v56  ;;  %v4299_v11 = vadd.f32 %v1341_v5, %v1185_v56 }
 0x23e   :  { %v4301_v60 = vadd.f32 %v1502_v26, %v1185_v56  ;;  %v1506_v34 = vpop.f32.mrb[24].mxu1  ;;  %v1347_v0 = vpop.f32.mrb[25].mxu0  ;;  %vm1572_vm11 = vcmp.gt.f32.partialorder %v4280_v31, 0.0  ;;  %v4305_v24 = vmul.f32 0.01, %v4280_v31  ;;  %vm1573_vm12 = vcmp.gt.f32.partialorder %v1340_v63, 0.0 }
 0x23f   :  { %v1637_v41 = vmul.f32 0.01, %v1340_v63  ;;  %v1694_v43 = vsel %vm1566_vm7, %v4242_v42, %v1630_v3  ;;  %v1508_v25 = vpop.f32.mrb[25].mxu1  ;;  %v4311_v7 = vsel %vm1571_vm9, %v1495_v47, %v1635_v44  ;;  %vm1575_vm13 = vcmp.gt.f32.partialorder %v1501_v17, 0.0 }
 0x240   :  { %v1639_v39 = vmul.f32 0.01, %v1501_v17  ;;  %v1690_v50 = vsel %vm1562_vm2, %v4238_v22, %v1626_v33  ;;  %v1638_v16 = vmul.f32 0.01, %v4299_v11  ;;  %v4320_v55 = vmul.f32 0.01, %v4301_v60 }
 0x241   :  { %v4316_v52 = vsel %vm1573_vm12, %v1340_v63, %v1637_v41  ;;  %v2779_v36 = vpack.c.bf16 %v1694_v43, %v1690_v50  ;;  %v1351_v42 = vpop.f32.mrb[26].mxu0  ;;  %v1692_v40 = vsel %vm1564_vm4, %v4240_v49, %v1628_v19  ;;  %v1696_v22 = vsel %vm1568_vm8, %v4259_v20, %v1632_v14  ;;  %v1205_v41 = vpop.permute.xlu1 %1204 }
 0x242   :  { %v2785_v61 = vpack.c.bf16 %v4316_v52, %v4296_v32  ;;  %v4324_v37 = vsel %vm1575_vm13, %v1501_v17, %v1639_v39  ;;  %v1512_v33 = vpop.f32.mrb[26].mxu1  ;;  %v1353_v23 = vpop.f32.mrb[27].mxu0  ;;  %v2811_v3 = vpack.c.bf16 %v1696_v22, %v1692_v40  ;;  %v1346_v9 = vadd.f32 %v1345_v57, %v1190_v51 }
 0x243   :  { %v2817_v10 = vpack.c.bf16 %v4324_v37, %v4311_v7  ;;  %2780 = vmatprep.subr.bf16.mxu0 %v2779_v36  ;;  %v1507_v21 = vadd.f32 %v1506_v34, %v1190_v51  ;;  %v1514_v58 = vpop.f32.mrb[27].mxu1  ;;  %v4337_v49 = vadd.f32 %v1347_v0, %v1190_v51  ;;  %v4339_v48 = vadd.f32 %v1508_v25, %v1190_v51 }
 0x244   :  { %2782 = vmatpush1.bf16.msra.mxu0 %v2781_v35  ;;  %v1352_v20 = vadd.f32 %v1351_v42, %v1195_v8  ;;  %v1513_v6 = vadd.f32 %v1512_v33, %v1195_v8  ;;  %v1357_v38 = vpop.f32.mrb[28].mxu0  ;;  %vm1574_vm14 = vcmp.gt.f32.partialorder %v4299_v11, 0.0  ;;  %2812 = vmatprep.subr.bf16.mxu1 %v2811_v3  ;;  %vm1577_vm15 = vcmp.gt.f32.partialorder %v1346_v9, 0.0 }
 0x245   :  { %v1641_v4 = vmul.f32 0.01, %v1346_v9  ;;  %v1643_v27 = vmul.f32 0.01, %v1507_v21  ;;  %vm1576_vm0 = vcmp.gt.f32.partialorder %v4301_v60, 0.0  ;;  %2814 = vmatpush1.bf16.msra.mxu1 %v2813_v28  ;;  %vm1579_vm1 = vcmp.gt.f32.partialorder %v1507_v21, 0.0 }
 0x246   :  { %v4347_v18 = vmul.f32 0.01, %v4337_v49  ;;  %v4350_v13 = vmul.f32 0.01, %v4339_v48  ;;  %vm1578_vm2 = vcmp.gt.f32.partialorder %v4337_v49, 0.0  ;;  %vm1581_vm3 = vcmp.gt.f32.partialorder %v1352_v20, 0.0 }
 0x247   :  { %v4352_v35 = vsel %vm1577_vm15, %v1346_v9, %v1641_v4  ;;  %v1645_v54 = vmul.f32 0.01, %v1352_v20  ;;  %v1518_v12 = vpop.f32.mrb[28].mxu1  ;;  %v1359_v5 = vpop.f32.mrb[29].mxu0  ;;  %vm1583_vm4 = vcmp.gt.f32.partialorder %v1513_v6, 0.0  ;;  %v1354_v47 = vadd.f32 %v1353_v23, %v1195_v8 }
 0x248   :  { %v1647_v45 = vmul.f32 0.01, %v1513_v6  ;;  %v4355_v29 = vadd.f32 %v1514_v58, %v1195_v8  ;;  %v1520_v1 = vpop.f32.mrb[29].mxu1  ;;  %v1363_v30 = vpop.f32.mrb[30].mxu0  ;;  %v4357_v28 = vsel %vm1579_vm1, %v1507_v21, %v1643_v27  ;;  %v1698_v26 = vsel %vm1570_vm10, %v4276_v46, %v4293_v2 }
 0x249   :  { %v4359_v53 = vsel %vm1581_vm3, %v1352_v20, %v1645_v54  ;;  %v1702_v56 = vsel %vm1574_vm14, %v4299_v11, %v1638_v16  ;;  %v1365_v19 = vpop.f32.mrb[31].mxu0  ;;  %vm1580_vm5 = vcmp.gt.f32.partialorder %v4339_v48, 0.0  ;;  %vm1582_vm6 = vcmp.gt.f32.partialorder %v1354_v47, 0.0  ;;  %v1200_v46 = vpop.permute.xlu0 %1199 }
 0x24a   :  { %v2789_v44 = vpack.c.bf16 %v4359_v53, %v4352_v35  ;;  %v4371_v14 = vsel %vm1583_vm4, %v1513_v6, %v1647_v45  ;;  %v1700_v63 = vsel %vm1572_vm11, %v4280_v31, %v4305_v24  ;;  %v1524_v57 = vpop.f32.mrb[30].mxu1  ;;  %v1646_v17 = vmul.f32 0.01, %v1354_v47  ;;  %v1725_v45 = vld [vmem:[%s4637_s5 + $0x20] sm:$0xff]  ;;  %v1731_v53 = vld [vmem:[%s4637_s5 + $0x50] sm:$0xff] }
 0x24b   :  { %v2821_v2 = vpack.c.bf16 %v4371_v14, %v4357_v28  ;;  %v1648_v11 = vmul.f32 0.01, %v4355_v29  ;;  %v2783_v34 = vpack.c.bf16 %v1702_v56, %v1698_v26  ;;  %v1526_v0 = vpop.f32.mrb[31].mxu1  ;;  %v1704_v43 = vsel %vm1576_vm0, %v4301_v60, %v4320_v55  ;;  %v1730_v28 = vld [vmem:[%s4637_s5 + $0x48] sm:$0xff]  ;;  %v1732_v26 = vld [vmem:[%s4637_s5 + $0x58] sm:$0xff]  ;;  %v1733_v56 = vld [vmem:[%s4637_s5 + $0x60] sm:$0xff] }
 0x24c   :  { %v1358_v25 = vadd.f32 %v1357_v38, %v1200_v46  ;;  %v1519_v39 = vadd.f32 %v1518_v12, %v1200_v46  ;;  %v1360_v50 = vadd.f32 %v1359_v5, %v1200_v46  ;;  %v2815_v31 = vpack.c.bf16 %v1704_v43, %v1700_v63  ;;  %v1723_v12 = vld [vmem:[%s4637_s5 + $0x10] sm:$0xff]  ;;  %v1724_v5 = vld [vmem:[%s4637_s5 + $0x18] sm:$0xff] }
 0x24d   :  { %2784 = vmatprep.subr.bf16.mxu0 %v2783_v34  ;;  %v1521_v24 = vadd.f32 %v1520_v1, %v1200_v46  ;;  %v1364_v51 = vadd.f32 %v1363_v30, %v1205_v41  ;;  %v1525_v16 = vadd.f32 %v1524_v57, %v1205_v41  ;;  %vm1584_vm7 = vcmp.gt.f32.partialorder %v4355_v29, 0.0  ;;  %v1728_v1 = vld [vmem:[%s4637_s5 + $0x38] sm:$0xff]  ;;  %v1729_v30 = vld [vmem:[%s4637_s5 + $0x40] sm:$0xff]  ;;  %v1756_v63 = vpop.permute.xlu0 %1755  ;;  %v1761_v57 = vpop.permute.xlu1 %1760 }
 0x24e   :  { %2786 = vmatpush1.bf16.msra.mxu0 %v2785_v61  ;;  %vm1585_vm8 = vcmp.gt.f32.partialorder %v1358_v25, 0.0  ;;  %v1649_v36 = vmul.f32 0.01, %v1358_v25  ;;  %v1651_v42 = vmul.f32 0.01, %v1519_v39  ;;  %2816 = vmatprep.subr.bf16.mxu1 %v2815_v31  ;;  %vm1587_vm9 = vcmp.gt.f32.partialorder %v1519_v39, 0.0 }
 0x24f   :  { %vm1586_vm10 = vcmp.gt.f32.partialorder %v1360_v50, 0.0  ;;  %v1650_v60 = vmul.f32 0.01, %v1360_v50  ;;  %vm1588_vm11 = vcmp.gt.f32.partialorder %v1521_v24, 0.0  ;;  %2818 = vmatpush1.bf16.msra.mxu1 %v2817_v10  ;;  %v1652_v40 = vmul.f32 0.01, %v1521_v24 }
 0x250   :  { %v1713_v55 = vsel %vm1585_vm8, %v1358_v25, %v1649_v36  ;;  %vm1589_vm12 = vcmp.gt.f32.partialorder %v1364_v51, 0.0  ;;  %v1653_v22 = vmul.f32 0.01, %v1364_v51  ;;  %vm1591_vm13 = vcmp.gt.f32.partialorder %v1525_v16, 0.0  ;;  %v1736_v14 = vld [vmem:[%s4637_s5 + $0x78] sm:$0xff] }
 0x251   :  { %v1655_v33 = vmul.f32 0.01, %v1525_v16  ;;  %v1366_v32 = vadd.f32 %v1365_v19, %v1205_v41  ;;  %v1527_v52 = vadd.f32 %v1526_v0, %v1205_v41  ;;  %v1715_v61 = vsel %vm1587_vm9, %v1519_v39, %v1651_v42  ;;  %v1734_v19 = vld [vmem:[%s4637_s5 + $0x68] sm:$0xff]  ;;  %v4483_v46 = vpop.permute.xlu0 %1765  ;;  %v4485_v34 = vpop.permute.xlu1 %1770 }
 0x252   :  { %v1717_v23 = vsel %vm1589_vm12, %v1364_v51, %v1653_v22  ;;  %v1706_v8 = vsel %vm1578_vm2, %v4337_v49, %v4347_v18  ;;  %v1710_v3 = vsel %vm1582_vm6, %v1354_v47, %v1646_v17  ;;  %v1708_v20 = vsel %vm1580_vm5, %v4339_v48, %v4350_v13  ;;  %v1721_v48 = vld [vmem:[%s4637_s5] sm:$0xff]  ;;  %v1722_v13 = vld [vmem:[%s4637_s5 + $0x8] sm:$0xff] }
 0x253   :  { %v2793_v9 = vpack.c.bf16 %v1717_v23, %v1713_v55  ;;  %v1719_v7 = vsel %vm1591_vm13, %v1525_v16, %v1655_v33  ;;  %vm1590_vm14 = vcmp.gt.f32.partialorder %v1366_v32, 0.0  ;;  %v1654_v37 = vmul.f32 0.01, %v1366_v32  ;;  %v1726_v47 = vld [vmem:[%s4637_s5 + $0x28] sm:$0xff] }
 0x254   :  { %v2825_v10 = vpack.c.bf16 %v1719_v7, %v1715_v61  ;;  %vm1592_vm15 = vcmp.gt.f32.partialorder %v1527_v52, 0.0  ;;  %v1656_v21 = vmul.f32 0.01, %v1527_v52  ;;  %v2787_v58 = vpack.c.bf16 %v1710_v3, %v1706_v8 }
 0x255   :  { %v1712_v6 = vsel %vm1584_vm7, %v4355_v29, %v1648_v11  ;;  %v1714_v49 = vsel %vm1586_vm10, %v1360_v50, %v1650_v60  ;;  %v1718_v38 = vsel %vm1590_vm14, %v1366_v32, %v1654_v37  ;;  %v1716_v18 = vsel %vm1588_vm11, %v1521_v24, %v1652_v40  ;;  %v1727_v29 = vld [vmem:[%s4637_s5 + $0x30] sm:$0xff]  ;;  %v2366_v24 = vpop.permute.xlu0 %2365  ;;  %v2371_v23 = vpop.permute.xlu1 %2370 }
 0x256   :  { %2788 = vmatprep.subr.bf16.mxu0 %v2787_v58  ;;  %v2819_v4 = vpack.c.bf16 %v1712_v6, %v1708_v20  ;;  %v2791_v27 = vpack.c.bf16 %v1718_v38, %v1714_v49  ;;  %v1720_v35 = vsel %vm1592_vm15, %v1527_v52, %v1656_v21 }
 0x257   :  { %2790 = vmatpush1.bf16.msra.mxu0 %v2789_v44  ;;  %v2823_v54 = vpack.c.bf16 %v1720_v35, %v1716_v18  ;;  %v1735_v44 = vld [vmem:[%s4637_s5 + $0x70] sm:$0xff] }
 0x258   :  { %2820 = vmatprep.subr.bf16.mxu1 %v2819_v4  ;;  %2792 = vmatprep.subr.bf16.mxu0 %v2791_v27 }
 0x259   :  { %2822 = vmatpush1.bf16.msra.mxu1 %v2821_v2 }
 0x25a   :  { %2824 = vmatprep.subr.bf16.mxu1 %v2823_v54 }
 0x25b   :  { %2794 = vmatpush1.bf16.msra.mxu0 %v2793_v9 }
 0x25d   :  { %2826 = vmatpush1.bf16.msra.mxu1 %v2825_v10 }
 0x25e   :  { %1898 = vmatmul.mubr.f32.vlgmr.msra.gmra.mrb[32].mxu0 %v1721_v48 }
 0x25f   :  { %1903 = vmatprep.mubr.f32.mxu0 %v2833_v15 }
 0x260   :  { %2059 = vmatmul.mubr.f32.vlgmr.msra.gmra.mrb[32].mxu1 %v1721_v48 }
 0x261   :  { %2064 = vmatprep.mubr.f32.mxu1 %v2833_v15 }
 0x262   :  { %1904 = vmatmul.mubr.f32.gmra.mrb[34].mxu0 %v1722_v13 }
 0x263   :  { %1909 = vmatprep.mubr.f32.mxu0 %v2833_v15 }
 0x264   :  { %2065 = vmatmul.mubr.f32.gmra.mrb[34].mxu1 %v1722_v13 }
 0x265   :  { %2070 = vmatprep.mubr.f32.mxu1 %v2833_v15 }
 0x266   :  { %1910 = vmatmul.mubr.f32.gmra.mrb[36].mxu0 %v1723_v12 }
 0x267   :  { %1915 = vmatprep.mubr.f32.mxu0 %v2833_v15 }
 0x268   :  { %2071 = vmatmul.mubr.f32.gmra.mrb[36].mxu1 %v1723_v12 }
 0x269   :  { %2076 = vmatprep.mubr.f32.mxu1 %v2833_v15 }
 0x26a   :  { %1916 = vmatmul.mubr.f32.gmra.mrb[38].mxu0 %v1724_v5 }
 0x26b   :  { %1921 = vmatprep.mubr.f32.mxu0 %v2833_v15 }
 0x26c   :  { %2077 = vmatmul.mubr.f32.gmra.mrb[38].mxu1 %v1724_v5 }
 0x26d   :  { %2082 = vmatprep.mubr.f32.mxu1 %v2833_v15 }
 0x26e   :  { %1922 = vmatmul.mubr.f32.gmra.mrb[40].mxu0 %v1725_v45 }
 0x26f   :  { %1927 = vmatprep.mubr.f32.mxu0 %v2833_v15 }
 0x270   :  { %2083 = vmatmul.mubr.f32.gmra.mrb[40].mxu1 %v1725_v45 }
 0x271   :  { %2088 = vmatprep.mubr.f32.mxu1 %v2833_v15 }
 0x272   :  { %1928 = vmatmul.mubr.f32.gmra.mrb[42].mxu0 %v1726_v47 }
 0x273   :  { %1933 = vmatprep.mubr.f32.mxu0 %v2833_v15 }
 0x274   :  { %2089 = vmatmul.mubr.f32.gmra.mrb[42].mxu1 %v1726_v47 }
 0x275   :  { %2094 = vmatprep.mubr.f32.mxu1 %v2833_v15 }
 0x276   :  { %1934 = vmatmul.mubr.f32.gmra.mrb[44].mxu0 %v1727_v29 }
 0x277   :  { %1939 = vmatprep.mubr.f32.mxu0 %v2833_v15 }
 0x278   :  { %2095 = vmatmul.mubr.f32.gmra.mrb[44].mxu1 %v1727_v29 }
 0x279   :  { %2100 = vmatprep.mubr.f32.mxu1 %v2833_v15 }
 0x27a   :  { %1940 = vmatmul.mubr.f32.gmra.mrb[46].mxu0 %v1728_v1 }
 0x27b   :  { %1945 = vmatprep.mubr.f32.mxu0 %v2833_v15 }
 0x27c   :  { %2101 = vmatmul.mubr.f32.gmra.mrb[46].mxu1 %v1728_v1 }
 0x27d   :  { %2106 = vmatprep.mubr.f32.mxu1 %v2833_v15 }
 0x27e   :  { %1946 = vmatmul.mubr.f32.gmra.mrb[48].mxu0 %v1729_v30 }
 0x27f   :  { %1951 = vmatprep.mubr.f32.mxu0 %v2833_v15 }
 0x280   :  { %2107 = vmatmul.mubr.f32.gmra.mrb[48].mxu1 %v1729_v30 }
 0x281   :  { %2112 = vmatprep.mubr.f32.mxu1 %v2833_v15 }
 0x282   :  { %1952 = vmatmul.mubr.f32.gmra.mrb[50].mxu0 %v1730_v28 }
 0x283   :  { %1957 = vmatprep.mubr.f32.mxu0 %v2833_v15 }
 0x284   :  { %2113 = vmatmul.mubr.f32.gmra.mrb[50].mxu1 %v1730_v28  ;;  %v2376_v28 = vpop.permute.xlu1 %2375 }
 0x285   :  { %2118 = vmatprep.mubr.f32.mxu1 %v2833_v15 }
 0x286   :  { %1958 = vmatmul.mubr.f32.gmra.mrb[52].mxu0 %v1731_v53 }
 0x287   :  { %1963 = vmatprep.mubr.f32.mxu0 %v2833_v15 }
 0x288   :  { %2119 = vmatmul.mubr.f32.gmra.mrb[52].mxu1 %v1731_v53 }
 0x289   :  { %2124 = vmatprep.mubr.f32.mxu1 %v2833_v15 }
 0x28a   :  { %1964 = vmatmul.mubr.f32.gmra.mrb[54].mxu0 %v1732_v26 }
 0x28b   :  { %1969 = vmatprep.mubr.f32.mxu0 %v2833_v15 }
 0x28c   :  { %2125 = vmatmul.mubr.f32.gmra.mrb[54].mxu1 %v1732_v26 }
 0x28d   :  { %2130 = vmatprep.mubr.f32.mxu1 %v2833_v15 }
 0x28e   :  { %1970 = vmatmul.mubr.f32.gmra.mrb[56].mxu0 %v1733_v56 }
 0x28f   :  { %1975 = vmatprep.mubr.f32.mxu0 %v2833_v15 }
 0x290   :  { %2131 = vmatmul.mubr.f32.gmra.mrb[56].mxu1 %v1733_v56 }
 0x291   :  { %2136 = vmatprep.mubr.f32.mxu1 %v2833_v15 }
 0x292   :  { %1976 = vmatmul.mubr.f32.gmra.mrb[58].mxu0 %v1734_v19 }
 0x293   :  { %1981 = vmatprep.mubr.f32.mxu0 %v2833_v15 }
 0x294   :  { %2137 = vmatmul.mubr.f32.gmra.mrb[58].mxu1 %v1734_v19 }
 0x295   :  { %2142 = vmatprep.mubr.f32.mxu1 %v2833_v15 }
 0x296   :  { %1982 = vmatmul.mubr.f32.gmra.mrb[60].mxu0 %v1735_v44 }
 0x297   :  { %1987 = vmatprep.mubr.f32.mxu0 %v2833_v15 }
 0x298   :  { %2143 = vmatmul.mubr.f32.gmra.mrb[60].mxu1 %v1735_v44 }
 0x299   :  { %2148 = vmatprep.mubr.f32.mxu1 %v2833_v15 }
 0x29a   :  { %1988 = vmatmul.mubr.f32.gmra.mrb[62].mxu0 %v1736_v14 }
 0x29c   :  { %2149 = vmatmul.mubr.f32.gmra.mrb[62].mxu1 %v1736_v14 }
 0x331   :  { %v1899_v2 = vpop.f32.mrb[32].mxu0 }
 0x332   :  { %v1900_v17 = vadd.f32 %v1899_v2, %v1756_v63  ;;  %v1901_v11 = vpop.f32.mrb[33].mxu0  ;;  %v4490_v2 = vpop.permute.xlu0 %1775 }
 0x333   :  { %v2060_v0 = vpop.f32.mrb[32].mxu1  ;;  %v1902_v41 = vadd.f32 %v1901_v11, %v1756_v63 }
 0x334   :  { %vm2155_vm0 = vcmp.gt.f32.partialorder %v1900_v17, 0.0  ;;  %v2219_v43 = vmul.f32 0.01, %v1900_v17  ;;  %v2061_v25 = vadd.f32 %v2060_v0, %v1756_v63  ;;  %v2062_v39 = vpop.f32.mrb[33].mxu1 }
 0x335   :  { %vm2156_vm1 = vcmp.gt.f32.partialorder %v1902_v41, 0.0  ;;  %v2220_v50 = vmul.f32 0.01, %v1902_v41  ;;  %v2063_v15 = vadd.f32 %v2062_v39, %v1756_v63  ;;  %v1905_v31 = vpop.f32.mrb[34].mxu0 }
 0x336   :  { %v2283_v51 = vsel %vm2155_vm0, %v1900_v17, %v2219_v43  ;;  %vm2157_vm2 = vcmp.gt.f32.partialorder %v2061_v25, 0.0  ;;  %v2221_v16 = vmul.f32 0.01, %v2061_v25  ;;  %v1906_v36 = vadd.f32 %v1905_v31, %v1761_v57  ;;  %v1907_v42 = vpop.f32.mrb[35].mxu0 }
 0x337   :  { %v2443_v60 = vmul.f32 %v2366_v24, %v2283_v51  ;;  %v2284_v55 = vsel %vm2156_vm1, %v1902_v41, %v2220_v50  ;;  %vm2158_vm3 = vcmp.gt.f32.partialorder %v2063_v15, 0.0  ;;  %v2222_v40 = vmul.f32 0.01, %v2063_v15  ;;  %v2066_v22 = vpop.f32.mrb[34].mxu1 }
 0x338   :  { %v2285_v33 = vsel %vm2157_vm2, %v2061_v25, %v2221_v16  ;;  %v2444_v32 = vmul.f32 %v2366_v24, %v2284_v55  ;;  %vm2159_vm4 = vcmp.gt.f32.partialorder %v1906_v36, 0.0  ;;  %v2223_v52 = vmul.f32 0.01, %v1906_v36  ;;  %v2068_v61 = vpop.f32.mrb[35].mxu1 }
 0x339   :  { %v2445_v8 = vmul.f32 %v2366_v24, %v2285_v33  ;;  %v2286_v3 = vsel %vm2158_vm3, %v2063_v15, %v2222_v40  ;;  %v2067_v9 = vadd.f32 %v2066_v22, %v1761_v57  ;;  %v1908_v7 = vadd.f32 %v1907_v42, %v1761_v57  ;;  %v1911_v37 = vpop.f32.mrb[36].mxu0  ;;  %v2381_v40 = vpop.permute.xlu1 %2380 }
 0x33a   :  { %v2446_v10 = vmul.f32 %v2366_v24, %v2286_v3  ;;  %v2287_v21 = vsel %vm2159_vm4, %v1906_v36, %v2223_v52  ;;  %v2069_v58 = vadd.f32 %v2068_v61, %v1761_v57  ;;  %v1912_v20 = vadd.f32 %v1911_v37, %v4483_v46  ;;  %v1913_v6 = vpop.f32.mrb[37].mxu0 }
 0x33b   :  { %v2447_v49 = vmul.f32 %v2371_v23, %v2287_v21  ;;  %vm2161_vm5 = vcmp.gt.f32.partialorder %v2067_v9, 0.0  ;;  %v2225_v38 = vmul.f32 0.01, %v2067_v9  ;;  %vm2160_vm6 = vcmp.gt.f32.partialorder %v1908_v7, 0.0  ;;  %v2072_v4 = vpop.f32.mrb[36].mxu1 }
 0x33c   :  { %v2224_v27 = vmul.f32 0.01, %v1908_v7  ;;  %vm2162_vm7 = vcmp.gt.f32.partialorder %v2069_v58, 0.0  ;;  %v2226_v18 = vmul.f32 0.01, %v2069_v58  ;;  %vm2163_vm8 = vcmp.gt.f32.partialorder %v1912_v20, 0.0 }
 0x33d   :  { %v2507_v35 = vadd.f32 %v2447_v49, %v2443_v60  ;;  %v2289_v54 = vsel %vm2161_vm5, %v2067_v9, %v2225_v38  ;;  %v2227_v48 = vmul.f32 0.01, %v1912_v20  ;;  %v2073_v13 = vadd.f32 %v2072_v4, %v4483_v46  ;;  %v2074_v12 = vpop.f32.mrb[37].mxu1  ;;  %v1917_v5 = vpop.f32.mrb[38].mxu0 }
 0x33e   :  { %v2449_v45 = vmul.f32 %v2371_v23, %v2289_v54  ;;  %v2288_v47 = vsel %vm2160_vm6, %v1908_v7, %v2224_v27  ;;  %v2290_v29 = vsel %vm2162_vm7, %v2069_v58, %v2226_v18  ;;  %v1914_v1 = vadd.f32 %v1913_v6, %v4483_v46  ;;  %v1919_v30 = vpop.f32.mrb[39].mxu0  ;;  %v1781_v7 = vpop.permute.xlu0 %1780 }
 0x33f   :  { %v2448_v53 = vmul.f32 %v2371_v23, %v2288_v47  ;;  %v2450_v26 = vmul.f32 %v2371_v23, %v2290_v29  ;;  %v2291_v56 = vsel %vm2163_vm8, %v1912_v20, %v2227_v48  ;;  %vm2165_vm9 = vcmp.gt.f32.partialorder %v2073_v13, 0.0  ;;  %v2078_v19 = vpop.f32.mrb[38].mxu1 }
 0x340   :  { %v2549_v44 = vadd.f32 %v2449_v45, %v2445_v8  ;;  %v2451_v14 = vmul.f32 %v2376_v28, %v2291_v56  ;;  %v2229_v63 = vmul.f32 0.01, %v2073_v13  ;;  %vm2164_vm10 = vcmp.gt.f32.partialorder %v1914_v1, 0.0  ;;  %v2080_v57 = vpop.f32.mrb[39].mxu1  ;;  %v2386_v45 = vpop.permute.xlu1 %2385 }
 0x341   :  { %v2528_v17 = vadd.f32 %v2448_v53, %v2444_v32  ;;  %v2570_v11 = vadd.f32 %v2450_v26, %v2446_v10  ;;  %v2228_v0 = vmul.f32 0.01, %v1914_v1  ;;  %v2075_v41 = vadd.f32 %v2074_v12, %v4483_v46  ;;  %v1923_v43 = vpop.f32.mrb[40].mxu0 }
 0x342   :  { %v2508_v25 = vadd.f32 %v2507_v35, %v2451_v14  ;;  %v2293_v39 = vsel %vm2165_vm9, %v2073_v13, %v2229_v63  ;;  %v1918_v50 = vadd.f32 %v1917_v5, %v4485_v34  ;;  %v2079_v15 = vadd.f32 %v2078_v19, %v4485_v34  ;;  %v1925_v31 = vpop.f32.mrb[41].mxu0  ;;  %v1786_v56 = vpop.permute.xlu0 %1785 }
 0x343   :  { %v2453_v24 = vmul.f32 %v2376_v28, %v2293_v39  ;;  %v2292_v51 = vsel %vm2164_vm10, %v1914_v1, %v2228_v0  ;;  %vm2166_vm11 = vcmp.gt.f32.partialorder %v2075_v41, 0.0  ;;  %v2230_v16 = vmul.f32 0.01, %v2075_v41  ;;  %v2084_v36 = vpop.f32.mrb[40].mxu1 }
 0x344   :  { %v2452_v42 = vmul.f32 %v2376_v28, %v2292_v51  ;;  %vm2167_vm12 = vcmp.gt.f32.partialorder %v1918_v50, 0.0  ;;  %v2231_v60 = vmul.f32 0.01, %v1918_v50  ;;  %vm2169_vm13 = vcmp.gt.f32.partialorder %v2079_v15, 0.0  ;;  %v2086_v55 = vpop.f32.mrb[41].mxu1 }
 0x345   :  { %v2550_v46 = vadd.f32 %v2549_v44, %v2453_v24  ;;  %v2294_v22 = vsel %vm2166_vm11, %v2075_v41, %v2230_v16  ;;  %v2233_v33 = vmul.f32 0.01, %v2079_v15  ;;  %v1920_v32 = vadd.f32 %v1919_v30, %v4485_v34  ;;  %v1929_v52 = vpop.f32.mrb[42].mxu0 }
 0x346   :  { %v2529_v61 = vadd.f32 %v2528_v17, %v2452_v42  ;;  %v2454_v23 = vmul.f32 %v2376_v28, %v2294_v22  ;;  %v2295_v8 = vsel %vm2167_vm12, %v1918_v50, %v2231_v60  ;;  %v2081_v3 = vadd.f32 %v2080_v57, %v4485_v34  ;;  %v4497_v9 = vpop.f32.mrb[43].mxu0 }
 0x347   :  { %v2455_v37 = vmul.f32 %v2381_v40, %v2295_v8  ;;  %v2297_v10 = vsel %vm2169_vm13, %v2079_v15, %v2233_v33  ;;  %vm2168_vm14 = vcmp.gt.f32.partialorder %v1920_v32, 0.0  ;;  %v2232_v21 = vmul.f32 0.01, %v1920_v32  ;;  %v2090_v58 = vpop.f32.mrb[42].mxu1 }
 0x348   :  { %v2571_v20 = vadd.f32 %v2570_v11, %v2454_v23  ;;  %v2457_v6 = vmul.f32 %v2381_v40, %v2297_v10  ;;  %vm2170_vm15 = vcmp.gt.f32.partialorder %v2081_v3, 0.0  ;;  %v2234_v49 = vmul.f32 0.01, %v2081_v3  ;;  %v2092_v38 = vpop.f32.mrb[43].mxu1 }
 0x349   :  { %v2509_v4 = vadd.f32 %v2508_v25, %v2455_v37  ;;  %v2296_v27 = vsel %vm2168_vm14, %v1920_v32, %v2232_v21  ;;  %v1924_v18 = vadd.f32 %v1923_v43, %v4490_v2  ;;  %v2085_v35 = vadd.f32 %v2084_v36, %v4490_v2  ;;  %v1935_v34 = vpop.f32.mrb[44].mxu0 }
 0x34a   :  { %v2551_v54 = vadd.f32 %v2550_v46, %v2457_v6  ;;  %v2456_v48 = vmul.f32 %v2381_v40, %v2296_v27  ;;  %v2298_v13 = vsel %vm2170_vm15, %v2081_v3, %v2234_v49  ;;  %v1926_v12 = vadd.f32 %v1925_v31, %v4490_v2  ;;  %v4502_v5 = vpop.f32.mrb[45].mxu0 }
 0x34b   :  { %v2458_v47 = vmul.f32 %v2381_v40, %v2298_v13  ;;  %vm2171_vm0 = vcmp.gt.f32.partialorder %v1924_v18, 0.0  ;;  %v2235_v29 = vmul.f32 0.01, %v1924_v18  ;;  %vm2173_vm1 = vcmp.gt.f32.partialorder %v2085_v35, 0.0  ;;  %v2096_v1 = vpop.f32.mrb[44].mxu1 }
 0x34c   :  { %v2530_v30 = vadd.f32 %v2529_v61, %v2456_v48  ;;  %v2237_v28 = vmul.f32 0.01, %v2085_v35  ;;  %vm2172_vm2 = vcmp.gt.f32.partialorder %v1926_v12, 0.0  ;;  %v2236_v53 = vmul.f32 0.01, %v1926_v12  ;;  %v4504_v26 = vpop.f32.mrb[45].mxu1 }
 0x34d   :  { %v2572_v19 = vadd.f32 %v2571_v20, %v2458_v47  ;;  %v2299_v44 = vsel %vm2171_vm0, %v1924_v18, %v2235_v29  ;;  %v2087_v14 = vadd.f32 %v2086_v55, %v4490_v2  ;;  %v1930_v63 = vadd.f32 %v1929_v52, %v1781_v7  ;;  %v1941_v57 = vpop.f32.mrb[46].mxu0  ;;  %v2391_v2 = vpop.permute.xlu1 %2390 }
 0x34e   :  { %v2459_v17 = vmul.f32 %v2386_v45, %v2299_v44  ;;  %v2301_v11 = vsel %vm2173_vm1, %v2085_v35, %v2237_v28  ;;  %v2300_v0 = vsel %vm2172_vm2, %v1926_v12, %v2236_v53  ;;  %v2091_v41 = vadd.f32 %v2090_v58, %v1781_v7  ;;  %v4507_v43 = vpop.f32.mrb[47].mxu0  ;;  %v1791_v52 = vpop.permute.xlu0 %1790 }
 0x34f   :  { %v2461_v25 = vmul.f32 %v2386_v45, %v2301_v11  ;;  %v2460_v39 = vmul.f32 %v2386_v45, %v2300_v0  ;;  %vm2174_vm3 = vcmp.gt.f32.partialorder %v2087_v14, 0.0  ;;  %v2238_v50 = vmul.f32 0.01, %v2087_v14  ;;  %v4509_v15 = vpop.f32.mrb[46].mxu1 }
 0x350   :  { %v2510_v31 = vadd.f32 %v2509_v4, %v2459_v17  ;;  %vm2175_vm4 = vcmp.gt.f32.partialorder %v1930_v63, 0.0  ;;  %v2239_v24 = vmul.f32 0.01, %v1930_v63  ;;  %vm2177_vm5 = vcmp.gt.f32.partialorder %v2091_v41, 0.0  ;;  %v4511_v51 = vpop.f32.mrb[47].mxu1 }
 0x351   :  { %v2552_v16 = vadd.f32 %v2551_v54, %v2461_v25  ;;  %v2531_v36 = vadd.f32 %v2530_v30, %v2460_v39  ;;  %v2302_v42 = vsel %vm2174_vm3, %v2087_v14, %v2238_v50  ;;  %v2241_v60 = vmul.f32 0.01, %v2091_v41  ;;  %v4513_v55 = vpop.f32.mrb[48].mxu0  ;;  %v2396_v18 = vpop.permute.xlu1 %2395 }
 0x352   :  { %v2462_v40 = vmul.f32 %v2386_v45, %v2302_v42  ;;  %v2303_v46 = vsel %vm2175_vm4, %v1930_v63, %v2239_v24  ;;  %v1932_v22 = vadd.f32 %v4497_v9, %v1781_v7  ;;  %v2093_v33 = vadd.f32 %v2092_v38, %v1781_v7  ;;  %v4516_v32 = vpop.f32.mrb[49].mxu0  ;;  %v1796_v30 = vpop.permute.xlu0 %1795 }
 0x353   :  { %v2463_v61 = vmul.f32 %v2391_v2, %v2303_v46  ;;  %v2305_v23 = vsel %vm2177_vm5, %v2091_v41, %v2241_v60  ;;  %v1936_v8 = vadd.f32 %v1935_v34, %v1786_v56  ;;  %v2097_v3 = vadd.f32 %v2096_v1, %v1786_v56  ;;  %v4518_v37 = vpop.f32.mrb[48].mxu1 }
 0x354   :  { %v2573_v10 = vadd.f32 %v2572_v19, %v2462_v40  ;;  %v2465_v21 = vmul.f32 %v2391_v2, %v2305_v23  ;;  %vm2176_vm6 = vcmp.gt.f32.partialorder %v1932_v22, 0.0  ;;  %v2240_v58 = vmul.f32 0.01, %v1932_v22  ;;  %v4520_v20 = vpop.f32.mrb[49].mxu1 }
 0x355   :  { %v2511_v6 = vadd.f32 %v2510_v31, %v2463_v61  ;;  %vm2178_vm7 = vcmp.gt.f32.partialorder %v2093_v33, 0.0  ;;  %v2242_v49 = vmul.f32 0.01, %v2093_v33  ;;  %vm2179_vm8 = vcmp.gt.f32.partialorder %v1936_v8, 0.0  ;;  %v4522_v9 = vpop.f32.mrb[50].mxu0  ;;  %v2401_v31 = vpop.permute.xlu1 %2400 }
 0x356   :  { %v2553_v7 = vadd.f32 %v2552_v16, %v2465_v21  ;;  %v2304_v38 = vsel %vm2176_vm6, %v1932_v22, %v2240_v58  ;;  %v2243_v4 = vmul.f32 0.01, %v1936_v8  ;;  %vm2181_vm9 = vcmp.gt.f32.partialorder %v2097_v3, 0.0  ;;  %v4524_v27 = vpop.f32.mrb[51].mxu0 }
 0x357   :  { %v2464_v35 = vmul.f32 %v2391_v2, %v2304_v38  ;;  %v2306_v34 = vsel %vm2178_vm7, %v2093_v33, %v2242_v49  ;;  %v2245_v54 = vmul.f32 0.01, %v2097_v3  ;;  %v1938_v48 = vadd.f32 %v4502_v5, %v1786_v56  ;;  %v4527_v13 = vpop.f32.mrb[50].mxu1  ;;  %v4548_v33 = vpop.permute.xlu0 %1800 }
 0x358   :  { %v2466_v12 = vmul.f32 %v2391_v2, %v2306_v34  ;;  %v2307_v45 = vsel %vm2179_vm8, %v1936_v8, %v2243_v4  ;;  %v2099_v47 = vadd.f32 %v4504_v26, %v1786_v56  ;;  %v1942_v29 = vadd.f32 %v1941_v57, %v1791_v52  ;;  %v4530_v1 = vpop.f32.mrb[51].mxu1 }
 0x359   :  { %v2532_v28 = vadd.f32 %v2531_v36, %v2464_v35  ;;  %v2467_v53 = vmul.f32 %v2396_v18, %v2307_v45  ;;  %v2309_v19 = vsel %vm2181_vm9, %v2097_v3, %v2245_v54  ;;  %vm2180_vm10 = vcmp.gt.f32.partialorder %v1938_v48, 0.0  ;;  %v4533_v44 = vpop.f32.mrb[52].mxu0  ;;  %v2406_v34 = vpop.permute.xlu1 %2405 }
 0x35a   :  { %v2574_v14 = vadd.f32 %v2573_v10, %v2466_v12  ;;  %v2469_v63 = vmul.f32 %v2396_v18, %v2309_v19  ;;  %v2244_v5 = vmul.f32 0.01, %v1938_v48  ;;  %vm2182_vm11 = vcmp.gt.f32.partialorder %v2099_v47, 0.0  ;;  %v4535_v17 = vpop.f32.mrb[53].mxu0 }
 0x35b   :  { %v2512_v11 = vadd.f32 %v2511_v6, %v2467_v53  ;;  %v2246_v0 = vmul.f32 0.01, %v2099_v47  ;;  %vm2183_vm12 = vcmp.gt.f32.partialorder %v1942_v29, 0.0  ;;  %v2247_v26 = vmul.f32 0.01, %v1942_v29  ;;  %v4537_v56 = vpop.f32.mrb[52].mxu1 }
 0x35c   :  { %v2554_v57 = vadd.f32 %v2553_v7, %v2469_v63  ;;  %v2308_v41 = vsel %vm2180_vm10, %v1938_v48, %v2244_v5  ;;  %v2103_v25 = vadd.f32 %v4509_v15, %v1791_v52  ;;  %v1944_v39 = vadd.f32 %v4507_v43, %v1791_v52  ;;  %v4541_v50 = vpop.f32.mrb[53].mxu1 }
 0x35d   :  { %v2468_v24 = vmul.f32 %v2396_v18, %v2308_v41  ;;  %v2310_v2 = vsel %vm2182_vm11, %v2099_v47, %v2246_v0  ;;  %v2311_v16 = vsel %vm2183_vm12, %v1942_v29, %v2247_v26  ;;  %v2105_v36 = vadd.f32 %v4511_v51, %v1791_v52  ;;  %v4544_v42 = vpop.f32.mrb[54].mxu0  ;;  %v1806_v29 = vpop.permute.xlu0 %1805 }
 0x35e   :  { %v2470_v60 = vmul.f32 %v2396_v18, %v2310_v2  ;;  %v2471_v40 = vmul.f32 %v2401_v31, %v2311_v16  ;;  %vm2185_vm13 = vcmp.gt.f32.partialorder %v2103_v25, 0.0  ;;  %v2249_v46 = vmul.f32 0.01, %v2103_v25  ;;  %v4546_v22 = vpop.f32.mrb[55].mxu0  ;;  %v2411_v2 = vpop.permute.xlu1 %2410 }
 0x35f   :  { %v2533_v15 = vadd.f32 %v2532_v28, %v2468_v24  ;;  %vm2184_vm14 = vcmp.gt.f32.partialorder %v1944_v39, 0.0  ;;  %v2248_v43 = vmul.f32 0.01, %v1944_v39  ;;  %vm2186_vm15 = vcmp.gt.f32.partialorder %v2105_v36, 0.0  ;;  %v4550_v61 = vpop.f32.mrb[54].mxu1 }
 0x360   :  { %v2575_v23 = vadd.f32 %v2574_v14, %v2470_v60  ;;  %v2513_v8 = vadd.f32 %v2512_v11, %v2471_v40  ;;  %v2313_v3 = vsel %vm2185_vm13, %v2103_v25, %v2249_v46  ;;  %v2250_v51 = vmul.f32 0.01, %v2105_v36  ;;  %v4552_v52 = vpop.f32.mrb[55].mxu1 }
 0x361   :  { %v2473_v10 = vmul.f32 %v2401_v31, %v2313_v3  ;;  %v2312_v21 = vsel %vm2184_vm14, %v1944_v39, %v2248_v43  ;;  %v1948_v58 = vadd.f32 %v4513_v55, %v1796_v30  ;;  %v2109_v6 = vadd.f32 %v4518_v37, %v1796_v30  ;;  %v4556_v49 = vpop.f32.mrb[56].mxu0 }
 0x362   :  { %v2472_v7 = vmul.f32 %v2401_v31, %v2312_v21  ;;  %v2314_v38 = vsel %vm2186_vm15, %v2105_v36, %v2250_v51  ;;  %v1950_v4 = vadd.f32 %v4516_v32, %v1796_v30  ;;  %v2111_v18 = vadd.f32 %v4520_v20, %v1796_v30  ;;  %v4560_v35 = vpop.f32.mrb[57].mxu0 }
 0x363   :  { %v2555_v54 = vadd.f32 %v2554_v57, %v2473_v10  ;;  %v2474_v48 = vmul.f32 %v2401_v31, %v2314_v38  ;;  %vm2187_vm0 = vcmp.gt.f32.partialorder %v1948_v58, 0.0  ;;  %v2251_v12 = vmul.f32 0.01, %v1948_v58  ;;  %v4562_v45 = vpop.f32.mrb[56].mxu1 }
 0x364   :  { %v2534_v55 = vadd.f32 %v2533_v15, %v2472_v7  ;;  %vm2189_vm1 = vcmp.gt.f32.partialorder %v2109_v6, 0.0  ;;  %v2253_v37 = vmul.f32 0.01, %v2109_v6  ;;  %vm2188_vm2 = vcmp.gt.f32.partialorder %v1950_v4, 0.0  ;;  %v4564_v47 = vpop.f32.mrb[57].mxu1  ;;  %v1811_v15 = vpop.permute.xlu0 %1810 }
 0x365   :  { %v2576_v28 = vadd.f32 %v2575_v23, %v2474_v48  ;;  %v2315_v32 = vsel %vm2187_vm0, %v1948_v58, %v2251_v12  ;;  %v2252_v53 = vmul.f32 0.01, %v1950_v4  ;;  %vm2190_vm3 = vcmp.gt.f32.partialorder %v2111_v18, 0.0  ;;  %v4566_v20 = vpop.f32.mrb[58].mxu0 }
 0x366   :  { %v2475_v30 = vmul.f32 %v2406_v34, %v2315_v32  ;;  %v2317_v19 = vsel %vm2189_vm1, %v2109_v6, %v2253_v37  ;;  %v2254_v14 = vmul.f32 0.01, %v2111_v18  ;;  %v1954_v63 = vadd.f32 %v4522_v9, %v4548_v33  ;;  %v4570_v5 = vpop.f32.mrb[59].mxu0 }
 0x367   :  { %v2477_v11 = vmul.f32 %v2406_v34, %v2317_v19  ;;  %v2316_v0 = vsel %vm2188_vm2, %v1950_v4, %v2252_v53  ;;  %v2115_v26 = vadd.f32 %v4527_v13, %v4548_v33  ;;  %v1956_v57 = vadd.f32 %v4524_v27, %v4548_v33  ;;  %v4576_v41 = vpop.f32.mrb[58].mxu1 }
 0x368   :  { %v2514_v25 = vadd.f32 %v2513_v8, %v2475_v30  ;;  %v2476_v39 = vmul.f32 %v2406_v34, %v2316_v0  ;;  %v2318_v31 = vsel %vm2190_vm3, %v2111_v18, %v2254_v14  ;;  %vm2191_vm4 = vcmp.gt.f32.partialorder %v1954_v63, 0.0  ;;  %v4578_v24 = vpop.f32.mrb[59].mxu1  ;;  %v1816_v14 = vpop.permute.xlu0 %1815 }
 0x369   :  { %v2556_v9 = vadd.f32 %v2555_v54, %v2477_v11  ;;  %v2478_v16 = vmul.f32 %v2406_v34, %v2318_v31  ;;  %v2255_v36 = vmul.f32 0.01, %v1954_v63  ;;  %vm2193_vm5 = vcmp.gt.f32.partialorder %v2115_v26, 0.0  ;;  %v4580_v60 = vpop.f32.mrb[60].mxu0 }
 0x36a   :  { %v2535_v40 = vadd.f32 %v2534_v55, %v2476_v39  ;;  %v2257_v13 = vmul.f32 0.01, %v2115_v26  ;;  %vm2192_vm6 = vcmp.gt.f32.partialorder %v1956_v57, 0.0  ;;  %v2256_v46 = vmul.f32 0.01, %v1956_v57  ;;  %v4582_v27 = vpop.f32.mrb[61].mxu0 }
 0x36b   :  { %v2577_v43 = vadd.f32 %v2576_v28, %v2478_v16  ;;  %v2319_v23 = vsel %vm2191_vm4, %v1954_v63, %v2255_v36  ;;  %v2117_v8 = vadd.f32 %v4530_v1, %v4548_v33  ;;  %v1960_v3 = vadd.f32 %v4533_v44, %v1806_v29  ;;  %v4587_v51 = vpop.f32.mrb[60].mxu1  ;;  %v2416_v33 = vpop.permute.xlu1 %2415 }
 0x36c   :  { %v2479_v10 = vmul.f32 %v2411_v2, %v2319_v23  ;;  %v2321_v21 = vsel %vm2193_vm5, %v2115_v26, %v2257_v13  ;;  %v2320_v58 = vsel %vm2192_vm6, %v1956_v57, %v2256_v46  ;;  %v2121_v6 = vadd.f32 %v4537_v56, %v1806_v29  ;;  %v4590_v7 = vpop.f32.mrb[61].mxu1  ;;  %v1821_v23 = vpop.permute.xlu0 %1820 }
 0x36d   :  { %v2481_v38 = vmul.f32 %v2411_v2, %v2321_v21  ;;  %v2480_v4 = vmul.f32 %v2411_v2, %v2320_v58  ;;  %vm2194_vm7 = vcmp.gt.f32.partialorder %v2117_v8, 0.0  ;;  %v2258_v18 = vmul.f32 0.01, %v2117_v8  ;;  %v4592_v34 = vpop.f32.mrb[62].mxu0 }
 0x36e   :  { %v2515_v54 = vadd.f32 %v2514_v25, %v2479_v10  ;;  %vm2195_vm8 = vcmp.gt.f32.partialorder %v1960_v3, 0.0  ;;  %v2259_v1 = vmul.f32 0.01, %v1960_v3  ;;  %vm2197_vm9 = vcmp.gt.f32.partialorder %v2121_v6, 0.0  ;;  %v4594_v44 = vpop.f32.mrb[63].mxu0 }
 0x36f   :  { %v2557_v48 = vadd.f32 %v2556_v9, %v2481_v38  ;;  %v2536_v12 = vadd.f32 %v2535_v40, %v2480_v4  ;;  %v2322_v55 = vsel %vm2194_vm7, %v2117_v8, %v2258_v18  ;;  %v2261_v37 = vmul.f32 0.01, %v2121_v6  ;;  %v4596_v56 = vpop.f32.mrb[62].mxu1 }
 0x370   :  { %v2482_v28 = vmul.f32 %v2411_v2, %v2322_v55  ;;  %v2323_v32 = vsel %vm2195_vm8, %v1960_v3, %v2259_v1  ;;  %v1962_v53 = vadd.f32 %v4535_v17, %v1806_v29  ;;  %v2123_v30 = vadd.f32 %v4541_v50, %v1806_v29  ;;  %v4600_v19 = vpop.f32.mrb[63].mxu1  ;;  %v2421_v29 = vpop.permute.xlu1 %2420 }
 0x371   :  { %v2483_v63 = vmul.f32 %v2416_v33, %v2323_v32  ;;  %v2325_v11 = vsel %vm2197_vm9, %v2121_v6, %v2261_v37  ;;  %v1966_v0 = vadd.f32 %v4544_v42, %v1811_v15  ;;  %v2127_v26 = vadd.f32 %v4550_v61, %v1811_v15  ;;  %v1826_v32 = vpop.permute.xlu0 %1825 }
 0x372   :  { %v2578_v57 = vadd.f32 %v2577_v43, %v2482_v28  ;;  %v2485_v25 = vmul.f32 %v2416_v33, %v2325_v11  ;;  %vm2196_vm10 = vcmp.gt.f32.partialorder %v1962_v53, 0.0  ;;  %v2260_v39 = vmul.f32 0.01, %v1962_v53 }
 0x373   :  { %v2516_v31 = vadd.f32 %v2515_v54, %v2483_v63  ;;  %vm2198_vm11 = vcmp.gt.f32.partialorder %v2123_v30, 0.0  ;;  %v2262_v2 = vmul.f32 0.01, %v2123_v30  ;;  %vm2199_vm12 = vcmp.gt.f32.partialorder %v1966_v0, 0.0 }
 0x374   :  { %v2558_v17 = vadd.f32 %v2557_v48, %v2485_v25  ;;  %v2324_v9 = vsel %vm2196_vm10, %v1962_v53, %v2260_v39  ;;  %v2263_v50 = vmul.f32 0.01, %v1966_v0  ;;  %vm2201_vm13 = vcmp.gt.f32.partialorder %v2127_v26, 0.0 }
 0x375   :  { %v2484_v16 = vmul.f32 %v2416_v33, %v2324_v9  ;;  %v2326_v36 = vsel %vm2198_vm11, %v2123_v30, %v2262_v2  ;;  %v2265_v40 = vmul.f32 0.01, %v2127_v26  ;;  %v1968_v42 = vadd.f32 %v4546_v22, %v1811_v15 }
 0x376   :  { %v2486_v13 = vmul.f32 %v2416_v33, %v2326_v36  ;;  %v2327_v61 = vsel %vm2199_vm12, %v1966_v0, %v2263_v50  ;;  %v2129_v46 = vadd.f32 %v4552_v52, %v1811_v15  ;;  %v1972_v43 = vadd.f32 %v4556_v49, %v1816_v14  ;;  %v2426_v49 = vpop.permute.xlu1 %2425  ;;  %v1831_v36 = vpop.permute.xlu0 %1830 }
 0x377   :  { %v2537_v8 = vadd.f32 %v2536_v12, %v2484_v16  ;;  %v2487_v3 = vmul.f32 %v2421_v29, %v2327_v61  ;;  %v2329_v10 = vsel %vm2201_vm13, %v2127_v26, %v2265_v40  ;;  %vm2200_vm14 = vcmp.gt.f32.partialorder %v1968_v42, 0.0 }
 0x378   :  { %v2579_v21 = vadd.f32 %v2578_v57, %v2486_v13  ;;  %v2489_v58 = vmul.f32 %v2421_v29, %v2329_v10  ;;  %v2264_v6 = vmul.f32 0.01, %v1968_v42  ;;  %vm2202_vm15 = vcmp.gt.f32.partialorder %v2129_v46, 0.0 }
 0x379   :  { %v2517_v38 = vadd.f32 %v2516_v31, %v2487_v3  ;;  %v2266_v4 = vmul.f32 0.01, %v2129_v46  ;;  %vm2203_vm0 = vcmp.gt.f32.partialorder %v1972_v43, 0.0  ;;  %v2267_v18 = vmul.f32 0.01, %v1972_v43 }
 0x37a   :  { %v2559_v22 = vadd.f32 %v2558_v17, %v2489_v58  ;;  %v2328_v54 = vsel %vm2200_vm14, %v1968_v42, %v2264_v6  ;;  %v2133_v1 = vadd.f32 %v4562_v45, %v1816_v14  ;;  %v1974_v52 = vadd.f32 %v4560_v35, %v1816_v14  ;;  %v2431_v16 = vpop.permute.xlu1 %2430 }
 0x37b   :  { %v2488_v15 = vmul.f32 %v2421_v29, %v2328_v54  ;;  %v2330_v33 = vsel %vm2202_vm15, %v2129_v46, %v2266_v4  ;;  %v2331_v48 = vsel %vm2203_vm0, %v1972_v43, %v2267_v18  ;;  %v2135_v12 = vadd.f32 %v4564_v47, %v1816_v14 }
 0x37c   :  { %v2490_v55 = vmul.f32 %v2421_v29, %v2330_v33  ;;  %v2491_v37 = vmul.f32 %v2426_v49, %v2331_v48  ;;  %vm2205_vm1 = vcmp.gt.f32.partialorder %v2133_v1, 0.0  ;;  %v2269_v28 = vmul.f32 0.01, %v2133_v1 }
 0x37d   :  { %v2538_v53 = vadd.f32 %v2537_v8, %v2488_v15  ;;  %vm2204_vm2 = vcmp.gt.f32.partialorder %v1974_v52, 0.0  ;;  %v2268_v30 = vmul.f32 0.01, %v1974_v52  ;;  %vm2206_vm3 = vcmp.gt.f32.partialorder %v2135_v12, 0.0 }
 0x37e   :  { %v2580_v63 = vadd.f32 %v2579_v21, %v2490_v55  ;;  %v2518_v11 = vadd.f32 %v2517_v38, %v2491_v37  ;;  %v2333_v45 = vsel %vm2205_vm1, %v2133_v1, %v2269_v28  ;;  %v2270_v0 = vmul.f32 0.01, %v2135_v12 }
 0x37f   :  { %v2493_v35 = vmul.f32 %v2426_v49, %v2333_v45  ;;  %v2332_v26 = vsel %vm2204_vm2, %v1974_v52, %v2268_v30  ;;  %v1978_v57 = vadd.f32 %v4566_v20, %v1821_v23  ;;  %v2139_v25 = vadd.f32 %v4576_v41, %v1821_v23 }
 0x380   :  { %v2492_v47 = vmul.f32 %v2426_v49, %v2332_v26  ;;  %v2334_v14 = vsel %vm2206_vm3, %v2135_v12, %v2270_v0  ;;  %v1980_v39 = vadd.f32 %v4570_v5, %v1821_v23  ;;  %v2141_v31 = vadd.f32 %v4578_v24, %v1821_v23 }
 0x381   :  { %v2560_v2 = vadd.f32 %v2559_v22, %v2493_v35  ;;  %v2494_v17 = vmul.f32 %v2426_v49, %v2334_v14  ;;  %vm2207_vm4 = vcmp.gt.f32.partialorder %v1978_v57, 0.0  ;;  %v2271_v9 = vmul.f32 0.01, %v1978_v57  ;;  %v2436_v22 = vpop.permute.xlu0 %2435 }
 0x382   :  { %v2539_v50 = vadd.f32 %v2538_v53, %v2492_v47  ;;  %vm2209_vm5 = vcmp.gt.f32.partialorder %v2139_v25, 0.0  ;;  %v2273_v29 = vmul.f32 0.01, %v2139_v25  ;;  %vm2208_vm6 = vcmp.gt.f32.partialorder %v1980_v39, 0.0 }
 0x383   :  { %v2581_v40 = vadd.f32 %v2580_v63, %v2494_v17  ;;  %v2335_v20 = vsel %vm2207_vm4, %v1978_v57, %v2271_v9  ;;  %v2272_v42 = vmul.f32 0.01, %v1980_v39  ;;  %vm2210_vm7 = vcmp.gt.f32.partialorder %v2141_v31, 0.0 }
 0x384   :  { %v2495_v41 = vmul.f32 %v2431_v16, %v2335_v20  ;;  %v2337_v13 = vsel %vm2209_vm5, %v2139_v25, %v2273_v29  ;;  %v2274_v61 = vmul.f32 0.01, %v2141_v31  ;;  %v1984_v5 = vadd.f32 %v4580_v60, %v1826_v32 }
 0x385   :  { %v2497_v24 = vmul.f32 %v2431_v16, %v2337_v13  ;;  %v2336_v46 = vsel %vm2208_vm6, %v1980_v39, %v2272_v42  ;;  %v2145_v43 = vadd.f32 %v4587_v51, %v1826_v32  ;;  %v1986_v23 = vadd.f32 %v4582_v27, %v1826_v32 }
 0x386   :  { %v2519_v8 = vadd.f32 %v2518_v11, %v2495_v41  ;;  %v2496_v3 = vmul.f32 %v2431_v16, %v2336_v46  ;;  %v2338_v10 = vsel %vm2210_vm7, %v2141_v31, %v2274_v61  ;;  %vm2211_vm8 = vcmp.gt.f32.partialorder %v1984_v5, 0.0 }
 0x387   :  { %v2561_v21 = vadd.f32 %v2560_v2, %v2497_v24  ;;  %v2498_v58 = vmul.f32 %v2431_v16, %v2338_v10  ;;  %v2275_v6 = vmul.f32 0.01, %v1984_v5  ;;  %vm2213_vm9 = vcmp.gt.f32.partialorder %v2145_v43, 0.0 }
 0x388   :  { %v2540_v38 = vadd.f32 %v2539_v50, %v2496_v3  ;;  %v2277_v4 = vmul.f32 0.01, %v2145_v43  ;;  %vm2212_vm10 = vcmp.gt.f32.partialorder %v1986_v23, 0.0  ;;  %v2276_v18 = vmul.f32 0.01, %v1986_v23 }
 0x389   :  { %v2582_v60 = vadd.f32 %v2581_v40, %v2498_v58  ;;  %v2339_v54 = vsel %vm2211_vm8, %v1984_v5, %v2275_v6  ;;  %v2147_v1 = vadd.f32 %v4590_v7, %v1826_v32  ;;  %v1990_v51 = vadd.f32 %v4592_v34, %v1831_v36  ;;  %v2441_v7 = vpop.permute.xlu1 %2440 }
 0x38a   :  { %v2499_v27 = vmul.f32 %v2436_v22, %v2339_v54  ;;  %v2341_v52 = vsel %vm2213_vm9, %v2145_v43, %v2277_v4  ;;  %v2340_v49 = vsel %vm2212_vm10, %v1986_v23, %v2276_v18  ;;  %v2151_v15 = vadd.f32 %v4596_v56, %v1831_v36 }
 0x38b   :  { %v2501_v33 = vmul.f32 %v2436_v22, %v2341_v52  ;;  %v2500_v48 = vmul.f32 %v2436_v22, %v2340_v49  ;;  %vm2214_vm11 = vcmp.gt.f32.partialorder %v2147_v1, 0.0  ;;  %v2278_v12 = vmul.f32 0.01, %v2147_v1 }
 0x38c   :  { %v2520_v55 = vadd.f32 %v2519_v8, %v2499_v27  ;;  %vm2215_vm12 = vcmp.gt.f32.partialorder %v1990_v51, 0.0  ;;  %v2279_v37 = vmul.f32 0.01, %v1990_v51  ;;  %vm2217_vm13 = vcmp.gt.f32.partialorder %v2151_v15, 0.0 }
 0x38d   :  { %v2562_v28 = vadd.f32 %v2561_v21, %v2501_v33  ;;  %v2541_v53 = vadd.f32 %v2540_v38, %v2500_v48  ;;  %v2342_v30 = vsel %vm2214_vm11, %v2147_v1, %v2278_v12  ;;  %v2281_v63 = vmul.f32 0.01, %v2151_v15 }
 0x38e   :  { %v2502_v32 = vmul.f32 %v2436_v22, %v2342_v30  ;;  %v2343_v34 = vsel %vm2215_vm12, %v1990_v51, %v2279_v37  ;;  %v1992_v11 = vadd.f32 %v4594_v44, %v1831_v36  ;;  %v2153_v45 = vadd.f32 %v4600_v19, %v1831_v36 }
 0x38f   :  { %v2503_v56 = vmul.f32 %v2441_v7, %v2343_v34  ;;  %v2345_v0 = vsel %vm2217_vm13, %v2151_v15, %v2281_v63  ;;  %v2834_v43 = vmov 1966171168   ;;  %v2592_v58 = vstv %s4638_s8 }
 0x390   :  { %v2583_v35 = vadd.f32 %v2582_v60, %v2502_v32  ;;  %v2505_v26 = vmul.f32 %v2441_v7, %v2345_v0  ;;  %vm2216_vm14 = vcmp.gt.f32.partialorder %v1992_v11, 0.0  ;;  %v2280_v57 = vmul.f32 0.01, %v1992_v11 }
 0x391   :  { %v2521_v25 = vadd.f32 %v2520_v55, %v2503_v56  ;;  %vm2218_vm15 = vcmp.gt.f32.partialorder %v2153_v45, 0.0  ;;  %v2282_v47 = vmul.f32 0.01, %v2153_v45  ;;  %v2604_v23 = vunpack.c.l.s4 %v2834_v43 }
 0x392   :  { %v2563_v14 = vadd.f32 %v2562_v28, %v2505_v26  ;;  %v2344_v39 = vsel %vm2216_vm14, %v1992_v11, %v2280_v57  ;;  %vm2628_vm0 = vcmp.lt.s32.totalorder %v227_v59, 512 }
 0x393   :  { %v2522_v31 = vrot.slane %v2521_v25, 4  ;;  %v2504_v2 = vmul.f32 %v2441_v7, %v2344_v39  ;;  %v2346_v17 = vsel %vm2218_vm15, %v2153_v45, %v2282_v47  ;;  %v2605_v18 = vunpack.c.0.s8 %v2604_v23 }
 0x394   :  { %v2564_v9 = vrot.slane %v2563_v14, 4  ;;  %v2506_v50 = vmul.f32 %v2441_v7, %v2346_v17 }
 0x395   :  { %v2523_v29 = vadd.f32 %v2522_v31, %v2521_v25  ;;  %v2542_v44 = vadd.f32 %v2541_v53, %v2504_v2  ;;  %v2608_v52 = vsub.s32 %v2605_v18, %v3066_v62 }
 0x396   :  { %v2565_v16 = vadd.f32 %v2564_v9, %v2563_v14  ;;  %v2584_v19 = vadd.f32 %v2583_v35, %v2506_v50 }
 0x397   :  { %v2524_v36 = vrot.slane %v2523_v29, 2  ;;  %v2543_v40 = vrot.slane %v2542_v44, 4 }
 0x398   :  { %v2566_v20 = vrot.slane %v2565_v16, 2  ;;  %v2585_v42 = vrot.slane %v2584_v19, 4 }
 0x399   :  { %v2525_v41 = vadd.f32 %v2524_v36, %v2523_v29  ;;  %v2544_v13 = vadd.f32 %v2543_v40, %v2542_v44 }
 0x39a   :  { %v2567_v61 = vadd.f32 %v2566_v20, %v2565_v16  ;;  %v2586_v5 = vadd.f32 %v2585_v42, %v2584_v19 }
 0x39b   :  { %v2526_v24 = vrot.slane %v2525_v41, 1  ;;  %v2545_v46 = vrot.slane %v2544_v13, 2 }
 0x39c   :  { %v2568_v8 = vrot.slane %v2567_v61, 1  ;;  %v2587_v3 = vrot.slane %v2586_v5, 2 }
 0x39d   :  { %v2527_v10 = vadd.f32 %v2526_v24, %v2525_v41  ;;  %v2546_v21 = vadd.f32 %v2545_v46, %v2544_v13 }
 0x39e   :  { %v2569_v6 = vadd.f32 %v2568_v8, %v2567_v61  ;;  %v2588_v38 = vadd.f32 %v2587_v3, %v2586_v5 }
 0x39f   :  { %v2547_v4 = vrot.slane %v2546_v21, 1  ;;  %v2593_v60 = vadd.f32 %v2592_v58, %v2527_v10 }
 0x3a0   :  { %v2589_v22 = vrot.slane %v2588_v38, 1  ;;  %v2595_v1 = vadd.f32 %v2592_v58, %v2569_v6 }
 0x3a1   :  { %v2548_v54 = vadd.f32 %v2547_v4, %v2546_v21 }
 0x3a2   :  { %v2590_v51 = vadd.f32 %v2589_v22, %v2588_v38 }
 0x3a3   :  { %v2594_v27 = vadd.f32 %v2592_v58, %v2548_v54 }
 0x3a4   :  { %v2596_v49 = vadd.f32 %v2592_v58, %v2590_v51 }
 0x3a5   :  { %v2601_v15 = vcombine.low %v2593_v60, %v2594_v27 }
 0x3a6   :  { %v2602_v33 = vcombine.low %v2595_v1, %v2596_v49 }
 0x3a7   :  { %v2609_v48 = vrot.slane %v2601_v15, %v2608_v52 }
 0x3a8   :  { %v2616_v12 = vrot.slane %v2602_v33, %v2608_v52 }
 0x3aa   :  { %v2617_v55 = vcombine.low %v2609_v48, %v2616_v12 }
 0x3ac   :  { %v2624_v37 = vrot.slane %v2617_v55, %v2608_v52 }
 0x3ae   :  { %2630 = vst.msk [vmem:[%s4639_s9] sm:$0xf] %vm2628_vm0, %v2624_v37 }

</bundles_post_ra>
